<compile_context>
chip_gen: v6e
topology: v6e:2x2x1
jax: 0.10.0
libtpu: 0.0.40
codegen_flags: <defaults>
</compile_context>

<pallas_src>
import functools
import math

import jax
import jax.numpy as jnp
from jax.experimental import pallas as pl
from jax.experimental.pallas import tpu as pltpu

NUM_CLASSES = 15   # classifier[4] replaced with a fresh 1x1 conv -> 15 classes
AUX_CLASSES = 21   # pretrained aux_classifier left untouched (21 classes)
BN_EPS = 1e-5

# Tile sizes: 128-aligned works on the 128-wide MXU granularity of v5e and the
# 256-wide MXUs of v6e/v7x, and the per-step working set (~0.2 MiB) fits the
# default scoped-VMEM limit on every generation (incl. v7x's 64 MiB VMEM).
TM, TN, TK = 128, 128, 128


# ----------------------------------------------------------------------------
# Pallas kernel: tiled fused GEMM  o = act((P @ W) + shift)
# (BN scale is pre-folded into W; covers conv+BN+ReLU and conv+bias.)
# ----------------------------------------------------------------------------
def _gemm_bias_act_kernel(p_ref, w_ref, shift_ref, o_ref, acc_ref, *, apply_relu):
    @pl.when(pl.program_id(2) == 0)
    def _init():
        acc_ref[...] = jnp.zeros_like(acc_ref)

    acc_ref[...] += jnp.dot(p_ref[...], w_ref[...],
                            preferred_element_type=jnp.float32)

    @pl.when(pl.program_id(2) == pl.num_programs(2) - 1)
    def _finalize():
        y = acc_ref[...] + shift_ref[...]
        if apply_relu:
            y = jnp.maximum(y, 0.0)
        o_ref[...] = y.astype(o_ref.dtype)


def _pad_axis(x, multiple, axis):
    pad = (-x.shape[axis]) % multiple
    if pad == 0:
        return x
    widths = [(0, 0)] * x.ndim
    widths[axis] = (0, pad)
    return jnp.pad(x, widths)


def gemm_bias_act(patches, weight, shift, *, apply_relu,
                  out_dtype=jnp.bfloat16, tm=TM, tn=TN, tk=TK):
    """patches: [M, K], weight: [K, N] (scale folded), shift: [1, N] -> [M, N]."""
    M, K = patches.shape
    K2, N = weight.shape
    assert K == K2

    # Pad every GEMM dim to the tile grid (lane-dense output, clean MXU passes).
    # Padded weight columns / shift lanes are zero, so padded outputs are
    # exactly zero through ReLU and are sliced away below.
    p = _pad_axis(_pad_axis(patches.astype(jnp.bfloat16), tm, 0), tk, 1)
    w = _pad_axis(_pad_axis(weight.astype(jnp.bfloat16), tk, 0), tn, 1)
    s = _pad_axis(shift.astype(jnp.float32), tn, 1)

    Mp, Kp = p.shape
    _, Np = w.shape
    grid = (Mp // tm, Np // tn, Kp // tk)

    out_bytes = jnp.dtype(out_dtype).itemsize
    cost = pl.CostEstimate(
        flops=2 * Mp * Np * Kp,
        transcendentals=0,
        bytes_accessed=Mp * Kp * 2 + Kp * Np * 2 + Np * 4 + Mp * Np * out_bytes,
    )

    kernel = functools.partial(_gemm_bias_act_kernel, apply_relu=apply_relu)
    out = pl.pallas_call(
        kernel,
        out_shape=jax.ShapeDtypeStruct((Mp, Np), out_dtype),
        grid=grid,
        in_specs=[
            pl.BlockSpec((tm, tk), lambda i, j, k: (i, k)),
            pl.BlockSpec((tk, tn), lambda i, j, k: (k, j)),
            pl.BlockSpec((1, tn), lambda i, j, k: (0, j)),
        ],
        out_specs=pl.BlockSpec((tm, tn), lambda i, j, k: (i, j)),
        scratch_shapes=[pltpu.VMEM((tm, tn), jnp.float32)],
        compiler_params=pltpu.CompilerParams(
            dimension_semantics=("parallel", "parallel", "arbitrary")),
        cost_estimate=cost,
    )(p, w, s)
    return out[:M, :N]


# ----------------------------------------------------------------------------
# Conv-as-GEMM glue (im2col in plain JAX on bf16, GEMM on the MXU via Pallas)
# ----------------------------------------------------------------------------
def _im2col(x, kh, kw, stride, dilation, padding):
    """x: [N, H, W, C] -> patches [N, Ho, Wo, kh*kw*C] (feature order: (i, j, c))."""
    N, H, W, C = x.shape
    if padding > 0:
        x = jnp.pad(x, ((0, 0), (padding, padding), (padding, padding), (0, 0)))
    Hp = H + 2 * padding
    Wp = W + 2 * padding
    Ho = (Hp - dilation * (kh - 1) - 1) // stride + 1
    Wo = (Wp - dilation * (kw - 1) - 1) // stride + 1
    cols = []
    for i in range(kh):
        for j in range(kw):
            hs = i * dilation
            ws = j * dilation
            sl = x[:, hs: hs + stride * (Ho - 1) + 1: stride,
                      ws: ws + stride * (Wo - 1) + 1: stride, :]
            cols.append(sl)
    return jnp.concatenate(cols, axis=-1), Ho, Wo


def conv2d(x, layer, *, stride=1, dilation=1, padding=0, relu=False,
           out_dtype=jnp.bfloat16):
    """layer['w']: HWIO weight [kh, kw, Cin, Cout] (BN-scale pre-folded);
    layer['shift']: [1, Cout]."""
    w = layer["w"]
    kh, kw, cin, cout = w.shape
    N = x.shape[0]
    patches, Ho, Wo = _im2col(x, kh, kw, stride, dilation, padding)
    P = patches.reshape(N * Ho * Wo, kh * kw * cin)
    Wm = w.reshape(kh * kw * cin, cout)
    out = gemm_bias_act(P, Wm, layer["shift"], apply_relu=relu, out_dtype=out_dtype)
    return out.reshape(N, Ho, Wo, cout)


def bilinear_resize(x, out_h, out_w):
    """F.interpolate(..., mode='bilinear', align_corners=False) equivalent (NHWC)."""
    N, H, W, C = x.shape
    if H == 1 and W == 1:
        return jnp.broadcast_to(x, (N, out_h, out_w, C))
    return jax.image.resize(x, (N, out_h, out_w, C), method="bilinear")


# ----------------------------------------------------------------------------
# Deterministic synthetic parameters (BN scale folded into the conv weight)
# ----------------------------------------------------------------------------
def _make_conv_bn(key, kh, kw, cin, cout):
    kconv, kg, kb, km = jax.random.split(key, 4)
    w = jax.random.normal(kconv, (kh, kw, cin, cout), jnp.float32) / math.sqrt(kh * kw * cin)
    gamma = 1.0 + 0.1 * jax.random.normal(kg, (cout,), jnp.float32)
    beta = 0.05 * jax.random.normal(kb, (cout,), jnp.float32)
    mean = 0.05 * jax.random.normal(km, (cout,), jnp.float32)
    var = jnp.ones((cout,), jnp.float32)
    scale = gamma / jnp.sqrt(var + BN_EPS)
    shift = beta - mean * scale
    w_folded = w * scale.reshape(1, 1, 1, cout)          # fold BN scale into W
    return {"w": w_folded, "shift": shift.reshape(1, cout)}


def _make_conv_bias(key, kh, kw, cin, cout):
    kconv, kb = jax.random.split(key)
    w = jax.random.normal(kconv, (kh, kw, cin, cout), jnp.float32) / math.sqrt(kh * kw * cin)
    b = 0.05 * jax.random.normal(kb, (cout,), jnp.float32)
    return {"w": w, "shift": b.reshape(1, cout)}


# scaled-down channel plan (real ResNet-101 / DeepLabHead channels in comments)
C_STEM, C_L2, C_AUX, C_MAIN = 16, 32, 48, 64   # (64, 512, 1024, 2048)
C_ASPP = 32                                     # (256)


def init_params(key):
    keys = jax.random.split(key, 16)
    p = {}
    # frozen backbone (requires_grad=False in PyTorch; irrelevant for forward)
    p["stem"] = _make_conv_bn(keys[0], 3, 3, 3, C_STEM)          # stride 2
    p["layer2"] = _make_conv_bn(keys[1], 3, 3, C_STEM, C_L2)     # stride 2
    p["layer3"] = _make_conv_bn(keys[2], 3, 3, C_L2, C_AUX)      # stride 2 -> aux feature
    p["layer4"] = _make_conv_bn(keys[3], 3, 3, C_AUX, C_MAIN)    # dilated, stride 1
    # DeepLabHead: ASPP
    p["aspp_b0"] = _make_conv_bn(keys[4], 1, 1, C_MAIN, C_ASPP)
    p["aspp_b1"] = _make_conv_bn(keys[5], 3, 3, C_MAIN, C_ASPP)  # dilation 12
    p["aspp_b2"] = _make_conv_bn(keys[6], 3, 3, C_MAIN, C_ASPP)  # dilation 24
    p["aspp_b3"] = _make_conv_bn(keys[7], 3, 3, C_MAIN, C_ASPP)  # dilation 36
    p["aspp_pool"] = _make_conv_bn(keys[8], 1, 1, C_MAIN, C_ASPP)
    p["aspp_proj"] = _make_conv_bn(keys[9], 1, 1, 5 * C_ASPP, C_ASPP)
    # DeepLabHead: conv3x3 + BN + ReLU, then replaced classifier[4] (1x1, bias)
    p["head_conv"] = _make_conv_bn(keys[10], 3, 3, C_ASPP, C_ASPP)
    p["classifier4"] = _make_conv_bias(keys[11], 1, 1, C_ASPP, NUM_CLASSES)
    # aux FCNHead (untouched by the module): 3x3 -> C/4, BN, ReLU, 1x1 -> 21
    p["aux_conv"] = _make_conv_bn(keys[12], 3, 3, C_AUX, C_AUX // 4)
    p["aux_cls"] = _make_conv_bias(keys[13], 1, 1, C_AUX // 4, AUX_CLASSES)
    return p


# ----------------------------------------------------------------------------
# Forward pass (DeepLabV3 semantics)
# ----------------------------------------------------------------------------
def deeplabv3_forward(params, x_nchw):
    N, _, H_in, W_in = x_nchw.shape
    x = jnp.transpose(x_nchw, (0, 2, 3, 1)).astype(jnp.bfloat16)  # NCHW -> NHWC bf16

    # ---- backbone (output stride 8, dilated last stage) ----
    f = conv2d(x, params["stem"], stride=2, padding=1, relu=True)
    f = conv2d(f, params["layer2"], stride=2, padding=1, relu=True)
    aux_f = conv2d(f, params["layer3"], stride=2, padding=1, relu=True)
    f = conv2d(aux_f, params["layer4"], stride=1, dilation=2, padding=2, relu=True)
    fh, fw = f.shape[1], f.shape[2]

    # ---- classifier: DeepLabHead = ASPP + conv3x3/BN/ReLU + 1x1 conv ----
    b0 = conv2d(f, params["aspp_b0"], relu=True)
    b1 = conv2d(f, params["aspp_b1"], dilation=12, padding=12, relu=True)
    b2 = conv2d(f, params["aspp_b2"], dilation=24, padding=24, relu=True)
    b3 = conv2d(f, params["aspp_b3"], dilation=36, padding=36, relu=True)
    # ASPP image pooling: GAP in plain JAX (tiny), its 1x1 conv on the MXU.
    pooled = jnp.mean(f.astype(jnp.float32), axis=(1, 2), keepdims=True)
    pooled = pooled.astype(jnp.bfloat16)
    b4 = conv2d(pooled, params["aspp_pool"], relu=True)
    b4 = bilinear_resize(b4, fh, fw)
    cat = jnp.concatenate([b0, b1, b2, b3, b4], axis=-1)
    y = conv2d(cat, params["aspp_proj"], relu=True)
    # Dropout(0.5): eval-mode identity
    y = conv2d(y, params["head_conv"], padding=1, relu=True)
    y = conv2d(y, params["classifier4"], relu=False, out_dtype=jnp.float32)
    out = bilinear_resize(y, H_in, W_in)

    # ---- aux classifier: FCNHead on layer3 features ----
    a = conv2d(aux_f, params["aux_conv"], padding=1, relu=True)
    # Dropout(0.1): eval-mode identity
    a = conv2d(a, params["aux_cls"], relu=False, out_dtype=jnp.float32)
    aux = bilinear_resize(a, H_in, W_in)

    return {
        "out": jnp.transpose(out, (0, 3, 1, 2)),   # [N, 15, H, W]
        "aux": jnp.transpose(aux, (0, 3, 1, 2)),   # [N, 21, H, W]
    }


# ----------------------------------------------------------------------------
if __name__ == "__main__":
    key = jax.random.PRNGKey(0)
    pkey, xkey = jax.random.split(key)
    params = init_params(pkey)

    x = jax.random.normal(xkey, (2, 3, 32, 32), jnp.float32)  # small NCHW input

    fwd = jax.jit(lambda xx: deeplabv3_forward(params, xx))
    outputs = fwd(x)
    outputs = jax.block_until_ready(outputs)

    assert outputs["out"].shape == (2, NUM_CLASSES, 32, 32), outputs["out"].shape
    assert outputs["aux"].shape == (2, AUX_CLASSES, 32, 32), outputs["aux"].shape
    assert bool(jnp.all(jnp.isfinite(outputs["out"])))
    assert bool(jnp.all(jnp.isfinite(outputs["aux"])))
    print("KERNEL_OK")
</pallas_src>

<mosaic_0001>
module attributes {stable_mosaic.version = 11 : i64} {
  func.func @_gemm_bias_act_kernel(%arg0: i32, %arg1: i32, %arg2: i32, %arg3: memref<128x128xbf16, #tpu.memory_space<vmem>>, %arg4: memref<128x128xbf16, #tpu.memory_space<vmem>>, %arg5: memref<1x128xf32, #tpu.memory_space<vmem>>, %arg6: memref<128x128xbf16, #tpu.memory_space<vmem>>, %arg7: memref<128x128xf32, #tpu.memory_space<vmem>>) attributes {dimension_semantics = [#tpu.dimension_semantics<parallel>, #tpu.dimension_semantics<parallel>, #tpu.dimension_semantics<arbitrary>], iteration_bounds = array<i64: 4, 1, 1>, scalar_prefetch = 0 : i64, scratch_operands = 1 : i64, tpu.core_type = #tpu.core_type<tc>, window_params = [{transform_indices = @transform_0, window_bounds = array<i64: 128, 128>}, {transform_indices = @transform_1, window_bounds = array<i64: 128, 128>}, {transform_indices = @transform_2, window_bounds = array<i64: 1, 128>}, {transform_indices = @transform_3, window_bounds = array<i64: 128, 128>}]} {
    %c0_i32 = arith.constant 0 : i32
    %0 = arith.cmpi eq, %arg2, %c0_i32 : i32
    %1 = arith.extui %0 : i1 to i32
    %c0_i32_0 = arith.constant 0 : i32
    %2 = arith.cmpi ne, %1, %c0_i32_0 : i32
    scf.if %2 {
      %cst_10 = arith.constant 0.000000e+00 : f32
      %12 = vector.broadcast %cst_10 : f32 to vector<128x128xf32>
      %c0_11 = arith.constant 0 : index
      %c0_12 = arith.constant 0 : index
      %13 = vector.load %arg7[%c0_11, %c0_12] : memref<128x128xf32, #tpu.memory_space<vmem>>, vector<128x128xf32>
      tpu.vector_store %arg7[%c0_11, %c0_12], %12 {strides = array<i32>} : memref<128x128xf32, #tpu.memory_space<vmem>>, vector<128x128xf32>,
    } else {
    }
    %c0 = arith.constant 0 : index
    %c0_1 = arith.constant 0 : index
    %3 = vector.load %arg7[%c0, %c0_1] : memref<128x128xf32, #tpu.memory_space<vmem>>, vector<128x128xf32>
    %c0_2 = arith.constant 0 : index
    %c0_3 = arith.constant 0 : index
    %4 = vector.load %arg3[%c0_2, %c0_3] : memref<128x128xbf16, #tpu.memory_space<vmem>>, vector<128x128xbf16>
    %c0_4 = arith.constant 0 : index
    %c0_5 = arith.constant 0 : index
    %5 = vector.load %arg4[%c0_4, %c0_5] : memref<128x128xbf16, #tpu.memory_space<vmem>>, vector<128x128xbf16>
    %cst = arith.constant dense<0.000000e+00> : vector<128x128xf32>
    %6 = tpu.matmul %4, %5, %cst {dimension_numbers = #tpu.dot_dimension_numbers<[1], [0], [0], [1], [0, 0, 1, 1], [], []>} : vector<128x128xbf16>, vector<128x128xbf16>, vector<128x128xf32> -> vector<128x128xf32>
    %7 = arith.addf %3, %6 : vector<128x128xf32>
    %c0_6 = arith.constant 0 : index
    %c0_7 = arith.constant 0 : index
    %8 = vector.load %arg7[%c0_6, %c0_7] : memref<128x128xf32, #tpu.memory_space<vmem>>, vector<128x128xf32>
    tpu.vector_store %arg7[%c0_6, %c0_7], %7 {strides = array<i32>} : memref<128x128xf32, #tpu.memory_space<vmem>>, vector<128x128xf32>,
    %c0_i32_8 = arith.constant 0 : i32
    %9 = arith.cmpi eq, %arg2, %c0_i32_8 : i32
    %10 = arith.extui %9 : i1 to i32
    %c0_i32_9 = arith.constant 0 : i32
    %11 = arith.cmpi ne, %10, %c0_i32_9 : i32
    scf.if %11 {
      %c0_10 = arith.constant 0 : index
      %c0_11 = arith.constant 0 : index
      %12 = vector.load %arg7[%c0_10, %c0_11] : memref<128x128xf32, #tpu.memory_space<vmem>>, vector<128x128xf32>
      %c0_12 = arith.constant 0 : index
      %c0_13 = arith.constant 0 : index
      %13 = vector.load %arg5[%c0_12, %c0_13] : memref<1x128xf32, #tpu.memory_space<vmem>>, vector<1x128xf32>
      %14 = vector.broadcast %13 : vector<1x128xf32> to vector<128x128xf32>
      %15 = arith.addf %12, %14 : vector<128x128xf32>
      %cst_14 = arith.constant 0.000000e+00 : f32
      %16 = vector.broadcast %cst_14 : f32 to vector<128x128xf32>
      %17 = arith.maximumf %15, %16 : vector<128x128xf32>
      %18 = arith.truncf %17 : vector<128x128xf32> to vector<128x128xbf16>
      %c0_15 = arith.constant 0 : index
      %c0_16 = arith.constant 0 : index
      %19 = vector.load %arg6[%c0_15, %c0_16] : memref<128x128xbf16, #tpu.memory_space<vmem>>, vector<128x128xbf16>
      tpu.vector_store %arg6[%c0_15, %c0_16], %18 {strides = array<i32>} : memref<128x128xbf16, #tpu.memory_space<vmem>>, vector<128x128xbf16>,
    } else {
    }
    return
  }
  func.func @transform_0(%arg0: i32, %arg1: i32, %arg2: i32) -> (i32, i32) {
    %c0_i32 = arith.constant 0 : i32
    return %arg0, %arg2 : i32, i32
  }
  func.func @transform_1(%arg0: i32, %arg1: i32, %arg2: i32) -> (i32, i32) {
    %c0_i32 = arith.constant 0 : i32
    return %arg2, %arg1 : i32, i32
  }
  func.func @transform_2(%arg0: i32, %arg1: i32, %arg2: i32) -> (i32, i32) {
    %c0_i32 = arith.constant 0 : i32
    %c0_i32_0 = arith.constant 0 : i32
    return %c0_i32, %arg1 : i32, i32
  }
  func.func @transform_3(%arg0: i32, %arg1: i32, %arg2: i32) -> (i32, i32) {
    %c0_i32 = arith.constant 0 : i32
    return %arg0, %arg1 : i32, i32
  }
}

module attributes {stable_mosaic.version = 11 : i64} {
  func.func @_gemm_bias_act_kernel(%arg0: i32, %arg1: i32, %arg2: i32, %arg3: memref<128x128xbf16, #tpu.memory_space<vmem>>, %arg4: memref<128x128xbf16, #tpu.memory_space<vmem>>, %arg5: memref<1x128xf32, #tpu.memory_space<vmem>>, %arg6: memref<128x128xbf16, #tpu.memory_space<vmem>>, %arg7: memref<128x128xf32, #tpu.memory_space<vmem>>) attributes {dimension_semantics = [#tpu.dimension_semantics<parallel>, #tpu.dimension_semantics<parallel>, #tpu.dimension_semantics<arbitrary>], iteration_bounds = array<i64: 1, 1, 2>, scalar_prefetch = 0 : i64, scratch_operands = 1 : i64, tpu.core_type = #tpu.core_type<tc>, window_params = [{transform_indices = @transform_0, window_bounds = array<i64: 128, 128>}, {transform_indices = @transform_1, window_bounds = array<i64: 128, 128>}, {transform_indices = @transform_2, window_bounds = array<i64: 1, 128>}, {transform_indices = @transform_3, window_bounds = array<i64: 128, 128>}]} {
    %c0_i32 = arith.constant 0 : i32
    %0 = arith.cmpi eq, %arg2, %c0_i32 : i32
    %1 = arith.extui %0 : i1 to i32
    %c0_i32_0 = arith.constant 0 : i32
    %2 = arith.cmpi ne, %1, %c0_i32_0 : i32
    scf.if %2 {
      %cst_9 = arith.constant 0.000000e+00 : f32
      %12 = vector.broadcast %cst_9 : f32 to vector<128x128xf32>
      %c0_10 = arith.constant 0 : index
      %c0_11 = arith.constant 0 : index
      %13 = vector.load %arg7[%c0_10, %c0_11] : memref<128x128xf32, #tpu.memory_space<vmem>>, vector<128x128xf32>
      tpu.vector_store %arg7[%c0_10, %c0_11], %12 {strides = array<i32>} : memref<128x128xf32, #tpu.memory_space<vmem>>, vector<128x128xf32>,
    } else {
    }
    %c0 = arith.constant 0 : index
    %c0_1 = arith.constant 0 : index
    %3 = vector.load %arg7[%c0, %c0_1] : memref<128x128xf32, #tpu.memory_space<vmem>>, vector<128x128xf32>
    %c0_2 = arith.constant 0 : index
    %c0_3 = arith.constant 0 : index
    %4 = vector.load %arg3[%c0_2, %c0_3] : memref<128x128xbf16, #tpu.memory_space<vmem>>, vector<128x128xbf16>
    %c0_4 = arith.constant 0 : index
    %c0_5 = arith.constant 0 : index
    %5 = vector.load %arg4[%c0_4, %c0_5] : memref<128x128xbf16, #tpu.memory_space<vmem>>, vector<128x128xbf16>
    %cst = arith.constant dense<0.000000e+00> : vector<128x128xf32>
    %6 = tpu.matmul %4, %5, %cst {dimension_numbers = #tpu.dot_dimension_numbers<[1], [0], [0], [1], [0, 0, 1, 1], [], []>} : vector<128x128xbf16>, vector<128x128xbf16>, vector<128x128xf32> -> vector<128x128xf32>
    %7 = arith.addf %3, %6 : vector<128x128xf32>
    %c0_6 = arith.constant 0 : index
    %c0_7 = arith.constant 0 : index
    %8 = vector.load %arg7[%c0_6, %c0_7] : memref<128x128xf32, #tpu.memory_space<vmem>>, vector<128x128xf32>
    tpu.vector_store %arg7[%c0_6, %c0_7], %7 {strides = array<i32>} : memref<128x128xf32, #tpu.memory_space<vmem>>, vector<128x128xf32>,
    %c1_i32 = arith.constant 1 : i32
    %9 = arith.cmpi eq, %arg2, %c1_i32 : i32
    %10 = arith.extui %9 : i1 to i32
    %c0_i32_8 = arith.constant 0 : i32
    %11 = arith.cmpi ne, %10, %c0_i32_8 : i32
    scf.if %11 {
      %c0_9 = arith.constant 0 : index
      %c0_10 = arith.constant 0 : index
      %12 = vector.load %arg7[%c0_9, %c0_10] : memref<128x128xf32, #tpu.memory_space<vmem>>, vector<128x128xf32>
      %c0_11 = arith.constant 0 : index
      %c0_12 = arith.constant 0 : index
      %13 = vector.load %arg5[%c0_11, %c0_12] : memref<1x128xf32, #tpu.memory_space<vmem>>, vector<1x128xf32>
      %14 = vector.broadcast %13 : vector<1x128xf32> to vector<128x128xf32>
      %15 = arith.addf %12, %14 : vector<128x128xf32>
      %cst_13 = arith.constant 0.000000e+00 : f32
      %16 = vector.broadcast %cst_13 : f32 to vector<128x128xf32>
      %17 = arith.maximumf %15, %16 : vector<128x128xf32>
      %18 = arith.truncf %17 : vector<128x128xf32> to vector<128x128xbf16>
      %c0_14 = arith.constant 0 : index
      %c0_15 = arith.constant 0 : index
      %19 = vector.load %arg6[%c0_14, %c0_15] : memref<128x128xbf16, #tpu.memory_space<vmem>>, vector<128x128xbf16>
      tpu.vector_store %arg6[%c0_14, %c0_15], %18 {strides = array<i32>} : memref<128x128xbf16, #tpu.memory_space<vmem>>, vector<128x128xbf16>,
    } else {
    }
    return
  }
  func.func @transform_0(%arg0: i32, %arg1: i32, %arg2: i32) -> (i32, i32) {
    %c0_i32 = arith.constant 0 : i32
    return %arg0, %arg2 : i32, i32
  }
  func.func @transform_1(%arg0: i32, %arg1: i32, %arg2: i32) -> (i32, i32) {
    %c0_i32 = arith.constant 0 : i32
    return %arg2, %arg1 : i32, i32
  }
  func.func @transform_2(%arg0: i32, %arg1: i32, %arg2: i32) -> (i32, i32) {
    %c0_i32 = arith.constant 0 : i32
    %c0_i32_0 = arith.constant 0 : i32
    return %c0_i32, %arg1 : i32, i32
  }
  func.func @transform_3(%arg0: i32, %arg1: i32, %arg2: i32) -> (i32, i32) {
    %c0_i32 = arith.constant 0 : i32
    return %arg0, %arg1 : i32, i32
  }
}

module attributes {stable_mosaic.version = 11 : i64} {
  func.func @_gemm_bias_act_kernel(%arg0: i32, %arg1: i32, %arg2: i32, %arg3: memref<128x128xbf16, #tpu.memory_space<vmem>>, %arg4: memref<128x128xbf16, #tpu.memory_space<vmem>>, %arg5: memref<1x128xf32, #tpu.memory_space<vmem>>, %arg6: memref<128x128xbf16, #tpu.memory_space<vmem>>, %arg7: memref<128x128xf32, #tpu.memory_space<vmem>>) attributes {dimension_semantics = [#tpu.dimension_semantics<parallel>, #tpu.dimension_semantics<parallel>, #tpu.dimension_semantics<arbitrary>], iteration_bounds = array<i64: 1, 1, 3>, scalar_prefetch = 0 : i64, scratch_operands = 1 : i64, tpu.core_type = #tpu.core_type<tc>, window_params = [{transform_indices = @transform_0, window_bounds = array<i64: 128, 128>}, {transform_indices = @transform_1, window_bounds = array<i64: 128, 128>}, {transform_indices = @transform_2, window_bounds = array<i64: 1, 128>}, {transform_indices = @transform_3, window_bounds = array<i64: 128, 128>}]} {
    %c0_i32 = arith.constant 0 : i32
    %0 = arith.cmpi eq, %arg2, %c0_i32 : i32
    %1 = arith.extui %0 : i1 to i32
    %c0_i32_0 = arith.constant 0 : i32
    %2 = arith.cmpi ne, %1, %c0_i32_0 : i32
    scf.if %2 {
      %cst_9 = arith.constant 0.000000e+00 : f32
      %12 = vector.broadcast %cst_9 : f32 to vector<128x128xf32>
      %c0_10 = arith.constant 0 : index
      %c0_11 = arith.constant 0 : index
      %13 = vector.load %arg7[%c0_10, %c0_11] : memref<128x128xf32, #tpu.memory_space<vmem>>, vector<128x128xf32>
      tpu.vector_store %arg7[%c0_10, %c0_11], %12 {strides = array<i32>} : memref<128x128xf32, #tpu.memory_space<vmem>>, vector<128x128xf32>,
    } else {
    }
    %c0 = arith.constant 0 : index
    %c0_1 = arith.constant 0 : index
    %3 = vector.load %arg7[%c0, %c0_1] : memref<128x128xf32, #tpu.memory_space<vmem>>, vector<128x128xf32>
    %c0_2 = arith.constant 0 : index
    %c0_3 = arith.constant 0 : index
    %4 = vector.load %arg3[%c0_2, %c0_3] : memref<128x128xbf16, #tpu.memory_space<vmem>>, vector<128x128xbf16>
    %c0_4 = arith.constant 0 : index
    %c0_5 = arith.constant 0 : index
    %5 = vector.load %arg4[%c0_4, %c0_5] : memref<128x128xbf16, #tpu.memory_space<vmem>>, vector<128x128xbf16>
    %cst = arith.constant dense<0.000000e+00> : vector<128x128xf32>
    %6 = tpu.matmul %4, %5, %cst {dimension_numbers = #tpu.dot_dimension_numbers<[1], [0], [0], [1], [0, 0, 1, 1], [], []>} : vector<128x128xbf16>, vector<128x128xbf16>, vector<128x128xf32> -> vector<128x128xf32>
    %7 = arith.addf %3, %6 : vector<128x128xf32>
    %c0_6 = arith.constant 0 : index
    %c0_7 = arith.constant 0 : index
    %8 = vector.load %arg7[%c0_6, %c0_7] : memref<128x128xf32, #tpu.memory_space<vmem>>, vector<128x128xf32>
    tpu.vector_store %arg7[%c0_6, %c0_7], %7 {strides = array<i32>} : memref<128x128xf32, #tpu.memory_space<vmem>>, vector<128x128xf32>,
    %c2_i32 = arith.constant 2 : i32
    %9 = arith.cmpi eq, %arg2, %c2_i32 : i32
    %10 = arith.extui %9 : i1 to i32
    %c0_i32_8 = arith.constant 0 : i32
    %11 = arith.cmpi ne, %10, %c0_i32_8 : i32
    scf.if %11 {
      %c0_9 = arith.constant 0 : index
      %c0_10 = arith.constant 0 : index
      %12 = vector.load %arg7[%c0_9, %c0_10] : memref<128x128xf32, #tpu.memory_space<vmem>>, vector<128x128xf32>
      %c0_11 = arith.constant 0 : index
      %c0_12 = arith.constant 0 : index
      %13 = vector.load %arg5[%c0_11, %c0_12] : memref<1x128xf32, #tpu.memory_space<vmem>>, vector<1x128xf32>
      %14 = vector.broadcast %13 : vector<1x128xf32> to vector<128x128xf32>
      %15 = arith.addf %12, %14 : vector<128x128xf32>
      %cst_13 = arith.constant 0.000000e+00 : f32
      %16 = vector.broadcast %cst_13 : f32 to vector<128x128xf32>
      %17 = arith.maximumf %15, %16 : vector<128x128xf32>
      %18 = arith.truncf %17 : vector<128x128xf32> to vector<128x128xbf16>
      %c0_14 = arith.constant 0 : index
      %c0_15 = arith.constant 0 : index
      %19 = vector.load %arg6[%c0_14, %c0_15] : memref<128x128xbf16, #tpu.memory_space<vmem>>, vector<128x128xbf16>
      tpu.vector_store %arg6[%c0_14, %c0_15], %18 {strides = array<i32>} : memref<128x128xbf16, #tpu.memory_space<vmem>>, vector<128x128xbf16>,
    } else {
    }
    return
  }
  func.func @transform_0(%arg0: i32, %arg1: i32, %arg2: i32) -> (i32, i32) {
    %c0_i32 = arith.constant 0 : i32
    return %arg0, %arg2 : i32, i32
  }
  func.func @transform_1(%arg0: i32, %arg1: i32, %arg2: i32) -> (i32, i32) {
    %c0_i32 = arith.constant 0 : i32
    return %arg2, %arg1 : i32, i32
  }
  func.func @transform_2(%arg0: i32, %arg1: i32, %arg2: i32) -> (i32, i32) {
    %c0_i32 = arith.constant 0 : i32
    %c0_i32_0 = arith.constant 0 : i32
    return %c0_i32, %arg1 : i32, i32
  }
  func.func @transform_3(%arg0: i32, %arg1: i32, %arg2: i32) -> (i32, i32) {
    %c0_i32 = arith.constant 0 : i32
    return %arg0, %arg1 : i32, i32
  }
}

module attributes {stable_mosaic.version = 11 : i64} {
  func.func @_gemm_bias_act_kernel(%arg0: i32, %arg1: i32, %arg2: i32, %arg3: memref<128x128xbf16, #tpu.memory_space<vmem>>, %arg4: memref<128x128xbf16, #tpu.memory_space<vmem>>, %arg5: memref<1x128xf32, #tpu.memory_space<vmem>>, %arg6: memref<128x128xbf16, #tpu.memory_space<vmem>>, %arg7: memref<128x128xf32, #tpu.memory_space<vmem>>) attributes {dimension_semantics = [#tpu.dimension_semantics<parallel>, #tpu.dimension_semantics<parallel>, #tpu.dimension_semantics<arbitrary>], iteration_bounds = array<i64: 1, 1, 4>, scalar_prefetch = 0 : i64, scratch_operands = 1 : i64, tpu.core_type = #tpu.core_type<tc>, window_params = [{transform_indices = @transform_0, window_bounds = array<i64: 128, 128>}, {transform_indices = @transform_1, window_bounds = array<i64: 128, 128>}, {transform_indices = @transform_2, window_bounds = array<i64: 1, 128>}, {transform_indices = @transform_3, window_bounds = array<i64: 128, 128>}]} {
    %c0_i32 = arith.constant 0 : i32
    %0 = arith.cmpi eq, %arg2, %c0_i32 : i32
    %1 = arith.extui %0 : i1 to i32
    %c0_i32_0 = arith.constant 0 : i32
    %2 = arith.cmpi ne, %1, %c0_i32_0 : i32
    scf.if %2 {
      %cst_9 = arith.constant 0.000000e+00 : f32
      %12 = vector.broadcast %cst_9 : f32 to vector<128x128xf32>
      %c0_10 = arith.constant 0 : index
      %c0_11 = arith.constant 0 : index
      %13 = vector.load %arg7[%c0_10, %c0_11] : memref<128x128xf32, #tpu.memory_space<vmem>>, vector<128x128xf32>
      tpu.vector_store %arg7[%c0_10, %c0_11], %12 {strides = array<i32>} : memref<128x128xf32, #tpu.memory_space<vmem>>, vector<128x128xf32>,
    } else {
    }
    %c0 = arith.constant 0 : index
    %c0_1 = arith.constant 0 : index
    %3 = vector.load %arg7[%c0, %c0_1] : memref<128x128xf32, #tpu.memory_space<vmem>>, vector<128x128xf32>
    %c0_2 = arith.constant 0 : index
    %c0_3 = arith.constant 0 : index
    %4 = vector.load %arg3[%c0_2, %c0_3] : memref<128x128xbf16, #tpu.memory_space<vmem>>, vector<128x128xbf16>
    %c0_4 = arith.constant 0 : index
    %c0_5 = arith.constant 0 : index
    %5 = vector.load %arg4[%c0_4, %c0_5] : memref<128x128xbf16, #tpu.memory_space<vmem>>, vector<128x128xbf16>
    %cst = arith.constant dense<0.000000e+00> : vector<128x128xf32>
    %6 = tpu.matmul %4, %5, %cst {dimension_numbers = #tpu.dot_dimension_numbers<[1], [0], [0], [1], [0, 0, 1, 1], [], []>} : vector<128x128xbf16>, vector<128x128xbf16>, vector<128x128xf32> -> vector<128x128xf32>
    %7 = arith.addf %3, %6 : vector<128x128xf32>
    %c0_6 = arith.constant 0 : index
    %c0_7 = arith.constant 0 : index
    %8 = vector.load %arg7[%c0_6, %c0_7] : memref<128x128xf32, #tpu.memory_space<vmem>>, vector<128x128xf32>
    tpu.vector_store %arg7[%c0_6, %c0_7], %7 {strides = array<i32>} : memref<128x128xf32, #tpu.memory_space<vmem>>, vector<128x128xf32>,
    %c3_i32 = arith.constant 3 : i32
    %9 = arith.cmpi eq, %arg2, %c3_i32 : i32
    %10 = arith.extui %9 : i1 to i32
    %c0_i32_8 = arith.constant 0 : i32
    %11 = arith.cmpi ne, %10, %c0_i32_8 : i32
    scf.if %11 {
      %c0_9 = arith.constant 0 : index
      %c0_10 = arith.constant 0 : index
      %12 = vector.load %arg7[%c0_9, %c0_10] : memref<128x128xf32, #tpu.memory_space<vmem>>, vector<128x128xf32>
      %c0_11 = arith.constant 0 : index
      %c0_12 = arith.constant 0 : index
      %13 = vector.load %arg5[%c0_11, %c0_12] : memref<1x128xf32, #tpu.memory_space<vmem>>, vector<1x128xf32>
      %14 = vector.broadcast %13 : vector<1x128xf32> to vector<128x128xf32>
      %15 = arith.addf %12, %14 : vector<128x128xf32>
      %cst_13 = arith.constant 0.000000e+00 : f32
      %16 = vector.broadcast %cst_13 : f32 to vector<128x128xf32>
      %17 = arith.maximumf %15, %16 : vector<128x128xf32>
      %18 = arith.truncf %17 : vector<128x128xf32> to vector<128x128xbf16>
      %c0_14 = arith.constant 0 : index
      %c0_15 = arith.constant 0 : index
      %19 = vector.load %arg6[%c0_14, %c0_15] : memref<128x128xbf16, #tpu.memory_space<vmem>>, vector<128x128xbf16>
      tpu.vector_store %arg6[%c0_14, %c0_15], %18 {strides = array<i32>} : memref<128x128xbf16, #tpu.memory_space<vmem>>, vector<128x128xbf16>,
    } else {
    }
    return
  }
  func.func @transform_0(%arg0: i32, %arg1: i32, %arg2: i32) -> (i32, i32) {
    %c0_i32 = arith.constant 0 : i32
    return %arg0, %arg2 : i32, i32
  }
  func.func @transform_1(%arg0: i32, %arg1: i32, %arg2: i32) -> (i32, i32) {
    %c0_i32 = arith.constant 0 : i32
    return %arg2, %arg1 : i32, i32
  }
  func.func @transform_2(%arg0: i32, %arg1: i32, %arg2: i32) -> (i32, i32) {
    %c0_i32 = arith.constant 0 : i32
    %c0_i32_0 = arith.constant 0 : i32
    return %c0_i32, %arg1 : i32, i32
  }
  func.func @transform_3(%arg0: i32, %arg1: i32, %arg2: i32) -> (i32, i32) {
    %c0_i32 = arith.constant 0 : i32
    return %arg0, %arg1 : i32, i32
  }
}

module attributes {stable_mosaic.version = 11 : i64} {
  func.func @_gemm_bias_act_kernel(%arg0: i32, %arg1: i32, %arg2: i32, %arg3: memref<128x128xbf16, #tpu.memory_space<vmem>>, %arg4: memref<128x128xbf16, #tpu.memory_space<vmem>>, %arg5: memref<1x128xf32, #tpu.memory_space<vmem>>, %arg6: memref<128x128xf32, #tpu.memory_space<vmem>>, %arg7: memref<128x128xf32, #tpu.memory_space<vmem>>) attributes {dimension_semantics = [#tpu.dimension_semantics<parallel>, #tpu.dimension_semantics<parallel>, #tpu.dimension_semantics<arbitrary>], iteration_bounds = array<i64: 1, 1, 1>, scalar_prefetch = 0 : i64, scratch_operands = 1 : i64, tpu.core_type = #tpu.core_type<tc>, window_params = [{transform_indices = @transform_0, window_bounds = array<i64: 128, 128>}, {transform_indices = @transform_1, window_bounds = array<i64: 128, 128>}, {transform_indices = @transform_2, window_bounds = array<i64: 1, 128>}, {transform_indices = @transform_3, window_bounds = array<i64: 128, 128>}]} {
    %c0_i32 = arith.constant 0 : i32
    %0 = arith.cmpi eq, %arg2, %c0_i32 : i32
    %1 = arith.extui %0 : i1 to i32
    %c0_i32_0 = arith.constant 0 : i32
    %2 = arith.cmpi ne, %1, %c0_i32_0 : i32
    scf.if %2 {
      %cst_10 = arith.constant 0.000000e+00 : f32
      %12 = vector.broadcast %cst_10 : f32 to vector<128x128xf32>
      %c0_11 = arith.constant 0 : index
      %c0_12 = arith.constant 0 : index
      %13 = vector.load %arg7[%c0_11, %c0_12] : memref<128x128xf32, #tpu.memory_space<vmem>>, vector<128x128xf32>
      tpu.vector_store %arg7[%c0_11, %c0_12], %12 {strides = array<i32>} : memref<128x128xf32, #tpu.memory_space<vmem>>, vector<128x128xf32>,
    } else {
    }
    %c0 = arith.constant 0 : index
    %c0_1 = arith.constant 0 : index
    %3 = vector.load %arg7[%c0, %c0_1] : memref<128x128xf32, #tpu.memory_space<vmem>>, vector<128x128xf32>
    %c0_2 = arith.constant 0 : index
    %c0_3 = arith.constant 0 : index
    %4 = vector.load %arg3[%c0_2, %c0_3] : memref<128x128xbf16, #tpu.memory_space<vmem>>, vector<128x128xbf16>
    %c0_4 = arith.constant 0 : index
    %c0_5 = arith.constant 0 : index
    %5 = vector.load %arg4[%c0_4, %c0_5] : memref<128x128xbf16, #tpu.memory_space<vmem>>, vector<128x128xbf16>
    %cst = arith.constant dense<0.000000e+00> : vector<128x128xf32>
    %6 = tpu.matmul %4, %5, %cst {dimension_numbers = #tpu.dot_dimension_numbers<[1], [0], [0], [1], [0, 0, 1, 1], [], []>} : vector<128x128xbf16>, vector<128x128xbf16>, vector<128x128xf32> -> vector<128x128xf32>
    %7 = arith.addf %3, %6 : vector<128x128xf32>
    %c0_6 = arith.constant 0 : index
    %c0_7 = arith.constant 0 : index
    %8 = vector.load %arg7[%c0_6, %c0_7] : memref<128x128xf32, #tpu.memory_space<vmem>>, vector<128x128xf32>
    tpu.vector_store %arg7[%c0_6, %c0_7], %7 {strides = array<i32>} : memref<128x128xf32, #tpu.memory_space<vmem>>, vector<128x128xf32>,
    %c0_i32_8 = arith.constant 0 : i32
    %9 = arith.cmpi eq, %arg2, %c0_i32_8 : i32
    %10 = arith.extui %9 : i1 to i32
    %c0_i32_9 = arith.constant 0 : i32
    %11 = arith.cmpi ne, %10, %c0_i32_9 : i32
    scf.if %11 {
      %c0_10 = arith.constant 0 : index
      %c0_11 = arith.constant 0 : index
      %12 = vector.load %arg7[%c0_10, %c0_11] : memref<128x128xf32, #tpu.memory_space<vmem>>, vector<128x128xf32>
      %c0_12 = arith.constant 0 : index
      %c0_13 = arith.constant 0 : index
      %13 = vector.load %arg5[%c0_12, %c0_13] : memref<1x128xf32, #tpu.memory_space<vmem>>, vector<1x128xf32>
      %14 = vector.broadcast %13 : vector<1x128xf32> to vector<128x128xf32>
      %15 = arith.addf %12, %14 : vector<128x128xf32>
      %c0_14 = arith.constant 0 : index
      %c0_15 = arith.constant 0 : index
      %16 = vector.load %arg6[%c0_14, %c0_15] : memref<128x128xf32, #tpu.memory_space<vmem>>, vector<128x128xf32>
      tpu.vector_store %arg6[%c0_14, %c0_15], %15 {strides = array<i32>} : memref<128x128xf32, #tpu.memory_space<vmem>>, vector<128x128xf32>,
    } else {
    }
    return
  }
  func.func @transform_0(%arg0: i32, %arg1: i32, %arg2: i32) -> (i32, i32) {
    %c0_i32 = arith.constant 0 : i32
    return %arg0, %arg2 : i32, i32
  }
  func.func @transform_1(%arg0: i32, %arg1: i32, %arg2: i32) -> (i32, i32) {
    %c0_i32 = arith.constant 0 : i32
    return %arg2, %arg1 : i32, i32
  }
  func.func @transform_2(%arg0: i32, %arg1: i32, %arg2: i32) -> (i32, i32) {
    %c0_i32 = arith.constant 0 : i32
    %c0_i32_0 = arith.constant 0 : i32
    return %c0_i32, %arg1 : i32, i32
  }
  func.func @transform_3(%arg0: i32, %arg1: i32, %arg2: i32) -> (i32, i32) {
    %c0_i32 = arith.constant 0 : i32
    return %arg0, %arg1 : i32, i32
  }
}

module attributes {stable_mosaic.version = 11 : i64} {
  func.func @_gemm_bias_act_kernel(%arg0: i32, %arg1: i32, %arg2: i32, %arg3: memref<128x128xbf16, #tpu.memory_space<vmem>>, %arg4: memref<128x128xbf16, #tpu.memory_space<vmem>>, %arg5: memref<1x128xf32, #tpu.memory_space<vmem>>, %arg6: memref<128x128xbf16, #tpu.memory_space<vmem>>, %arg7: memref<128x128xf32, #tpu.memory_space<vmem>>) attributes {dimension_semantics = [#tpu.dimension_semantics<parallel>, #tpu.dimension_semantics<parallel>, #tpu.dimension_semantics<arbitrary>], iteration_bounds = array<i64: 1, 1, 1>, scalar_prefetch = 0 : i64, scratch_operands = 1 : i64, tpu.core_type = #tpu.core_type<tc>, window_params = [{transform_indices = @transform_0, window_bounds = array<i64: 128, 128>}, {transform_indices = @transform_1, window_bounds = array<i64: 128, 128>}, {transform_indices = @transform_2, window_bounds = array<i64: 1, 128>}, {transform_indices = @transform_3, window_bounds = array<i64: 128, 128>}]} {
    %c0_i32 = arith.constant 0 : i32
    %0 = arith.cmpi eq, %arg2, %c0_i32 : i32
    %1 = arith.extui %0 : i1 to i32
    %c0_i32_0 = arith.constant 0 : i32
    %2 = arith.cmpi ne, %1, %c0_i32_0 : i32
    scf.if %2 {
      %cst_10 = arith.constant 0.000000e+00 : f32
      %12 = vector.broadcast %cst_10 : f32 to vector<128x128xf32>
      %c0_11 = arith.constant 0 : index
      %c0_12 = arith.constant 0 : index
      %13 = vector.load %arg7[%c0_11, %c0_12] : memref<128x128xf32, #tpu.memory_space<vmem>>, vector<128x128xf32>
      tpu.vector_store %arg7[%c0_11, %c0_12], %12 {strides = array<i32>} : memref<128x128xf32, #tpu.memory_space<vmem>>, vector<128x128xf32>,
    } else {
    }
    %c0 = arith.constant 0 : index
    %c0_1 = arith.constant 0 : index
    %3 = vector.load %arg7[%c0, %c0_1] : memref<128x128xf32, #tpu.memory_space<vmem>>, vector<128x128xf32>
    %c0_2 = arith.constant 0 : index
    %c0_3 = arith.constant 0 : index
    %4 = vector.load %arg3[%c0_2, %c0_3] : memref<128x128xbf16, #tpu.memory_space<vmem>>, vector<128x128xbf16>
    %c0_4 = arith.constant 0 : index
    %c0_5 = arith.constant 0 : index
    %5 = vector.load %arg4[%c0_4, %c0_5] : memref<128x128xbf16, #tpu.memory_space<vmem>>, vector<128x128xbf16>
    %cst = arith.constant dense<0.000000e+00> : vector<128x128xf32>
    %6 = tpu.matmul %4, %5, %cst {dimension_numbers = #tpu.dot_dimension_numbers<[1], [0], [0], [1], [0, 0, 1, 1], [], []>} : vector<128x128xbf16>, vector<128x128xbf16>, vector<128x128xf32> -> vector<128x128xf32>
    %7 = arith.addf %3, %6 : vector<128x128xf32>
    %c0_6 = arith.constant 0 : index
    %c0_7 = arith.constant 0 : index
    %8 = vector.load %arg7[%c0_6, %c0_7] : memref<128x128xf32, #tpu.memory_space<vmem>>, vector<128x128xf32>
    tpu.vector_store %arg7[%c0_6, %c0_7], %7 {strides = array<i32>} : memref<128x128xf32, #tpu.memory_space<vmem>>, vector<128x128xf32>,
    %c0_i32_8 = arith.constant 0 : i32
    %9 = arith.cmpi eq, %arg2, %c0_i32_8 : i32
    %10 = arith.extui %9 : i1 to i32
    %c0_i32_9 = arith.constant 0 : i32
    %11 = arith.cmpi ne, %10, %c0_i32_9 : i32
    scf.if %11 {
      %c0_10 = arith.constant 0 : index
      %c0_11 = arith.constant 0 : index
      %12 = vector.load %arg7[%c0_10, %c0_11] : memref<128x128xf32, #tpu.memory_space<vmem>>, vector<128x128xf32>
      %c0_12 = arith.constant 0 : index
      %c0_13 = arith.constant 0 : index
      %13 = vector.load %arg5[%c0_12, %c0_13] : memref<1x128xf32, #tpu.memory_space<vmem>>, vector<1x128xf32>
      %14 = vector.broadcast %13 : vector<1x128xf32> to vector<128x128xf32>
      %15 = arith.addf %12, %14 : vector<128x128xf32>
      %cst_14 = arith.constant 0.000000e+00 : f32
      %16 = vector.broadcast %cst_14 : f32 to vector<128x128xf32>
      %17 = arith.maximumf %15, %16 : vector<128x128xf32>
      %18 = arith.truncf %17 : vector<128x128xf32> to vector<128x128xbf16>
      %c0_15 = arith.constant 0 : index
      %c0_16 = arith.constant 0 : index
      %19 = vector.load %arg6[%c0_15, %c0_16] : memref<128x128xbf16, #tpu.memory_space<vmem>>, vector<128x128xbf16>
      tpu.vector_store %arg6[%c0_15, %c0_16], %18 {strides = array<i32>} : memref<128x128xbf16, #tpu.memory_space<vmem>>, vector<128x128xbf16>,
    } else {
    }
    return
  }
  func.func @transform_0(%arg0: i32, %arg1: i32, %arg2: i32) -> (i32, i32) {
    %c0_i32 = arith.constant 0 : i32
    return %arg0, %arg2 : i32, i32
  }
  func.func @transform_1(%arg0: i32, %arg1: i32, %arg2: i32) -> (i32, i32) {
    %c0_i32 = arith.constant 0 : i32
    return %arg2, %arg1 : i32, i32
  }
  func.func @transform_2(%arg0: i32, %arg1: i32, %arg2: i32) -> (i32, i32) {
    %c0_i32 = arith.constant 0 : i32
    %c0_i32_0 = arith.constant 0 : i32
    return %c0_i32, %arg1 : i32, i32
  }
  func.func @transform_3(%arg0: i32, %arg1: i32, %arg2: i32) -> (i32, i32) {
    %c0_i32 = arith.constant 0 : i32
    return %arg0, %arg1 : i32, i32
  }
}

module attributes {stable_mosaic.version = 11 : i64} {
  func.func @_gemm_bias_act_kernel(%arg0: i32, %arg1: i32, %arg2: i32, %arg3: memref<128x128xbf16, #tpu.memory_space<vmem>>, %arg4: memref<128x128xbf16, #tpu.memory_space<vmem>>, %arg5: memref<1x128xf32, #tpu.memory_space<vmem>>, %arg6: memref<128x128xbf16, #tpu.memory_space<vmem>>, %arg7: memref<128x128xf32, #tpu.memory_space<vmem>>) attributes {dimension_semantics = [#tpu.dimension_semantics<parallel>, #tpu.dimension_semantics<parallel>, #tpu.dimension_semantics<arbitrary>], iteration_bounds = array<i64: 1, 1, 5>, scalar_prefetch = 0 : i64, scratch_operands = 1 : i64, tpu.core_type = #tpu.core_type<tc>, window_params = [{transform_indices = @transform_0, window_bounds = array<i64: 128, 128>}, {transform_indices = @transform_1, window_bounds = array<i64: 128, 128>}, {transform_indices = @transform_2, window_bounds = array<i64: 1, 128>}, {transform_indices = @transform_3, window_bounds = array<i64: 128, 128>}]} {
    %c0_i32 = arith.constant 0 : i32
    %0 = arith.cmpi eq, %arg2, %c0_i32 : i32
    %1 = arith.extui %0 : i1 to i32
    %c0_i32_0 = arith.constant 0 : i32
    %2 = arith.cmpi ne, %1, %c0_i32_0 : i32
    scf.if %2 {
      %cst_9 = arith.constant 0.000000e+00 : f32
      %12 = vector.broadcast %cst_9 : f32 to vector<128x128xf32>
      %c0_10 = arith.constant 0 : index
      %c0_11 = arith.constant 0 : index
      %13 = vector.load %arg7[%c0_10, %c0_11] : memref<128x128xf32, #tpu.memory_space<vmem>>, vector<128x128xf32>
      tpu.vector_store %arg7[%c0_10, %c0_11], %12 {strides = array<i32>} : memref<128x128xf32, #tpu.memory_space<vmem>>, vector<128x128xf32>,
    } else {
    }
    %c0 = arith.constant 0 : index
    %c0_1 = arith.constant 0 : index
    %3 = vector.load %arg7[%c0, %c0_1] : memref<128x128xf32, #tpu.memory_space<vmem>>, vector<128x128xf32>
    %c0_2 = arith.constant 0 : index
    %c0_3 = arith.constant 0 : index
    %4 = vector.load %arg3[%c0_2, %c0_3] : memref<128x128xbf16, #tpu.memory_space<vmem>>, vector<128x128xbf16>
    %c0_4 = arith.constant 0 : index
    %c0_5 = arith.constant 0 : index
    %5 = vector.load %arg4[%c0_4, %c0_5] : memref<128x128xbf16, #tpu.memory_space<vmem>>, vector<128x128xbf16>
    %cst = arith.constant dense<0.000000e+00> : vector<128x128xf32>
    %6 = tpu.matmul %4, %5, %cst {dimension_numbers = #tpu.dot_dimension_numbers<[1], [0], [0], [1], [0, 0, 1, 1], [], []>} : vector<128x128xbf16>, vector<128x128xbf16>, vector<128x128xf32> -> vector<128x128xf32>
    %7 = arith.addf %3, %6 : vector<128x128xf32>
    %c0_6 = arith.constant 0 : index
    %c0_7 = arith.constant 0 : index
    %8 = vector.load %arg7[%c0_6, %c0_7] : memref<128x128xf32, #tpu.memory_space<vmem>>, vector<128x128xf32>
    tpu.vector_store %arg7[%c0_6, %c0_7], %7 {strides = array<i32>} : memref<128x128xf32, #tpu.memory_space<vmem>>, vector<128x128xf32>,
    %c4_i32 = arith.constant 4 : i32
    %9 = arith.cmpi eq, %arg2, %c4_i32 : i32
    %10 = arith.extui %9 : i1 to i32
    %c0_i32_8 = arith.constant 0 : i32
    %11 = arith.cmpi ne, %10, %c0_i32_8 : i32
    scf.if %11 {
      %c0_9 = arith.constant 0 : index
      %c0_10 = arith.constant 0 : index
      %12 = vector.load %arg7[%c0_9, %c0_10] : memref<128x128xf32, #tpu.memory_space<vmem>>, vector<128x128xf32>
      %c0_11 = arith.constant 0 : index
      %c0_12 = arith.constant 0 : index
      %13 = vector.load %arg5[%c0_11, %c0_12] : memref<1x128xf32, #tpu.memory_space<vmem>>, vector<1x128xf32>
      %14 = vector.broadcast %13 : vector<1x128xf32> to vector<128x128xf32>
      %15 = arith.addf %12, %14 : vector<128x128xf32>
      %cst_13 = arith.constant 0.000000e+00 : f32
      %16 = vector.broadcast %cst_13 : f32 to vector<128x128xf32>
      %17 = arith.maximumf %15, %16 : vector<128x128xf32>
      %18 = arith.truncf %17 : vector<128x128xf32> to vector<128x128xbf16>
      %c0_14 = arith.constant 0 : index
      %c0_15 = arith.constant 0 : index
      %19 = vector.load %arg6[%c0_14, %c0_15] : memref<128x128xbf16, #tpu.memory_space<vmem>>, vector<128x128xbf16>
      tpu.vector_store %arg6[%c0_14, %c0_15], %18 {strides = array<i32>} : memref<128x128xbf16, #tpu.memory_space<vmem>>, vector<128x128xbf16>,
    } else {
    }
    return
  }
  func.func @transform_0(%arg0: i32, %arg1: i32, %arg2: i32) -> (i32, i32) {
    %c0_i32 = arith.constant 0 : i32
    return %arg0, %arg2 : i32, i32
  }
  func.func @transform_1(%arg0: i32, %arg1: i32, %arg2: i32) -> (i32, i32) {
    %c0_i32 = arith.constant 0 : i32
    return %arg2, %arg1 : i32, i32
  }
  func.func @transform_2(%arg0: i32, %arg1: i32, %arg2: i32) -> (i32, i32) {
    %c0_i32 = arith.constant 0 : i32
    %c0_i32_0 = arith.constant 0 : i32
    return %c0_i32, %arg1 : i32, i32
  }
  func.func @transform_3(%arg0: i32, %arg1: i32, %arg2: i32) -> (i32, i32) {
    %c0_i32 = arith.constant 0 : i32
    return %arg0, %arg1 : i32, i32
  }
}

</mosaic_0001>

<bundles_post_ra>
// kernel: _lambda_.14
= control target key start
LH: loop header
LB: loop body
LE: loop exit
PB: predicated region body
PF: predicated region fallthrough
CT: control target
= control target key end

     0   :  { %s1059_s12 = smov 0   ;;  %s1061_s13 = smov 0   ;;  %s1146_s0 = inlined_call_operand.vmem [shape: bf16[512,128], index: 0, kind: input, shape index: {}]   ;;  %s1147_s1 = inlined_call_operand.vmem [shape: bf16[128,128], index: 1, kind: input, shape index: {}]   ;;  %s1148_s2 = inlined_call_operand.vmem [shape: f32[1,128], index: 2, kind: input, shape index: {}]   ;;  %s1149_s3 = inlined_call_operand.vmem [shape: bf16[512,128], index: 3, kind: output, shape index: {}]  }
   0x1   :  { %s1063_s14 = smov 0  }
   0x2 LB: > { %s32_s15 = sadd.s32 1, %s1033_s13  ;;  %p808_p0 = scmp.ge.s32.totalorder %s1037_s14, 1  ;;  %s1037_s14 = sphi %s1063_s14, %s13_s14   ;;  %s1033_s13 = sphi %s1061_s13, %s1151_s13   ;;  %s1029_s12 = sphi %s1059_s12, %s1150_s12  }
   0x3   : > { %p34_p1 = scmp.ge.s32.totalorder %s32_s15, 4  ;;  %p188_p2 = scmp.lt.s32.totalorder %s1037_s14, 5 }
   0x5   : > { %s1153_s15 = smov (%p34_p1, %s32_s15), 0  ;;  %p189_p3 = pnand %p808_p0, %p188_p2 }
   0x6   : > { %s809_s18 = sshll.u32 (!%p189_p3), %s1029_s12, 4 }
   0x7   : > { %192 = sbr.rel (%p189_p3) target bundleno = 259 (0x103), region = 32  ;;  %p230_p4 = scmp.lt.s32.totalorder (!%p189_p3), %s809_s18, 63 }
   0xc   : > { %v999_v0 = vld [vmem:[%s1147_s1 + $0x38] sm:$0xff]   ;;  %v1000_v1 = vld [vmem:[%s1147_s1 + $0x30] sm:$0xff]   ;;  %s1155_s18 = smov (!%p230_p4, %s809_s18), 63  ;;  %v1001_v2 = vld [vmem:[%s1147_s1 + $0x28] sm:$0xff]  }
   0xd   : > { %927 = vmatprep.subr.bf16.mxu0 %v999_v0  ;;  %959 = vmatprep.subr.bf16.mxu1 %v999_v0  ;;  %s810_s23 = sshll.u32 %s1155_s18, 2  ;;  %v1002_v3 = vld [vmem:[%s1147_s1 + $0x20] sm:$0xff]   ;;  %v1003_v6 = vld [vmem:[%s1147_s1 + $0x18] sm:$0xff]   ;;  %v1004_v7 = vld [vmem:[%s1147_s1 + $0x10] sm:$0xff]  }
   0xe   : > { %928 = vmatpush3.bf16.msra.mxu0 %v999_v0  ;;  %967 = vmatpush3.bf16.msra.mxu1 %v999_v0  ;;  %s1094_s26 = scalar_lea.vmem %s1146_s0, %s810_s23  ;;  %v1005_v8 = vld [vmem:[%s1147_s1 + $0x8] sm:$0xff]   ;;  %v1006_v9 = vld [vmem:[%s1147_s1] sm:$0xff]   ;;  %s1127_s17 = scalar_lea.vmem %s1149_s3, %s810_s23 }
   0xf   : > { %929 = vmatprep.subr.bf16.mxu0 %v1000_v1  ;;  %960 = vmatprep.subr.bf16.mxu1 %v1000_v1  ;;  %v1007_v4 = vld [vmem:[%s1094_s26] sm:$0xff]   ;;  %v1009_v10 = vld [vmem:[%s1094_s26 + $0x8] sm:$0xff]   ;;  %v1011_v12 = vld [vmem:[%s1094_s26 + $0x10] sm:$0xff]  }
  0x10   : > { %v1008_v5 = vld [vmem:[%s1094_s26 + $0x20] sm:$0xff]   ;;  %943 = vmatprep.mubr.bf16.mxu0 %v1007_v4  ;;  %v1010_v11 = vld [vmem:[%s1094_s26 + $0x28] sm:$0xff]   ;;  %v1012_v13 = vld [vmem:[%s1094_s26 + $0x30] sm:$0xff]  }
  0x11   : > { %951 = vmatprep.mubr.bf16.mxu1 %v1008_v5  ;;  %v1013_v14 = vld [vmem:[%s1094_s26 + $0x18] sm:$0xff]   ;;  %v829_v16 = vld [vmem:[%s1148_s2] ss:$0 sm:$0xff] }
  0x12   : > { %930 = vmatpush3.bf16.msra.mxu0 %v1000_v1  ;;  %968 = vmatpush3.bf16.msra.mxu1 %v1000_v1  ;;  %v1014_v15 = vld [vmem:[%s1094_s26 + $0x38] sm:$0xff]  }
  0x13   : > { %931 = vmatprep.subr.bf16.mxu0 %v1001_v2  ;;  %961 = vmatprep.subr.bf16.mxu1 %v1001_v2 }
  0x16   : > { %932 = vmatpush3.bf16.msra.mxu0 %v1001_v2  ;;  %969 = vmatpush3.bf16.msra.mxu1 %v1001_v2 }
  0x17   : > { %933 = vmatprep.subr.bf16.mxu0 %v1002_v3  ;;  %962 = vmatprep.subr.bf16.mxu1 %v1002_v3 }
  0x1a   : > { %934 = vmatpush3.bf16.msra.mxu0 %v1002_v3  ;;  %970 = vmatpush3.bf16.msra.mxu1 %v1002_v3 }
  0x1b   : > { %935 = vmatprep.subr.bf16.mxu0 %v1003_v6  ;;  %963 = vmatprep.subr.bf16.mxu1 %v1003_v6 }
  0x1e   : > { %936 = vmatpush3.bf16.msra.mxu0 %v1003_v6  ;;  %971 = vmatpush3.bf16.msra.mxu1 %v1003_v6 }
  0x1f   : > { %937 = vmatprep.subr.bf16.mxu0 %v1004_v7  ;;  %964 = vmatprep.subr.bf16.mxu1 %v1004_v7 }
  0x22   : > { %938 = vmatpush3.bf16.msra.mxu0 %v1004_v7  ;;  %972 = vmatpush3.bf16.msra.mxu1 %v1004_v7 }
  0x23   : > { %939 = vmatprep.subr.bf16.mxu0 %v1005_v8  ;;  %965 = vmatprep.subr.bf16.mxu1 %v1005_v8 }
  0x26   : > { %940 = vmatpush3.bf16.msra.mxu0 %v1005_v8  ;;  %973 = vmatpush3.bf16.msra.mxu1 %v1005_v8 }
  0x27   : > { %941 = vmatprep.subr.bf16.mxu0 %v1006_v9  ;;  %966 = vmatprep.subr.bf16.mxu1 %v1006_v9 }
  0x2a   : > { %942 = vmatpush3.bf16.msra.mxu0 %v1006_v9  ;;  %974 = vmatpush3.bf16.msra.mxu1 %v1006_v9 }
  0x2d   : > { %944 = vmatmul.mubr.bf16.vlgmr.msra.gmra.mxu0 %v1009_v10  ;;  %952 = vmatmul.mubr.bf16.vlgmr.msra.gmra.mxu1 %v1010_v11 }
  0x2e   : > { %947 = vmatprep.mubr.bf16.mxu0 %v1011_v12  ;;  %955 = vmatprep.mubr.bf16.mxu1 %v1012_v13 }
  0x35   : > { %948 = vmatmul.mubr.bf16.gmra.mxu0 %v1013_v14  ;;  %956 = vmatmul.mubr.bf16.gmra.mxu1 %v1014_v15 }
  0xed   : > { %v945_v17 = vpop.f32.mrf.mxu0  ;;  %v953_v18 = vpop.f32.mrf.mxu1 }
  0xee   : > { %v581_v19 = vadd.f32 %v945_v17, %v829_v16  ;;  %v589_v20 = vadd.f32 %v953_v18, %v829_v16 }
  0xef   : > { %v458_v21 = vpop.f32.mrf.mxu0  ;;  %v490_v22 = vpop.f32.mrf.mxu1 }
  0xf0   : > { %v579_v23 = vadd.f32 %v829_v16, %v458_v21  ;;  %v587_v24 = vadd.f32 %v829_v16, %v490_v22  ;;  %v597_v29 = vmax.f32 %v581_v19, 0.0  ;;  %v605_v30 = vmax.f32 %v589_v20, 0.0 }
  0xf1   : > { %v946_v25 = vpop.f32.mrf.mxu0  ;;  %v954_v26 = vpop.f32.mrf.mxu1 }
  0xf2   : > { %v582_v27 = vadd.f32 %v946_v25, %v829_v16  ;;  %v590_v28 = vadd.f32 %v954_v26, %v829_v16  ;;  %v595_v37 = vmax.f32 %v579_v23, 0.0  ;;  %v603_v38 = vmax.f32 %v587_v24, 0.0 }
  0xf3   : > { %v461_v31 = vpop.f32.mrf.mxu0  ;;  %v493_v32 = vpop.f32.mrf.mxu1 }
  0xf4   : > { %v598_v33 = vmax.f32 %v582_v27, 0.0  ;;  %v606_v34 = vmax.f32 %v590_v28, 0.0  ;;  %v580_v35 = vadd.f32 %v829_v16, %v461_v31  ;;  %v588_v36 = vadd.f32 %v829_v16, %v493_v32 }
  0xf5   : > { %v949_v39 = vpop.f32.mrf.mxu0  ;;  %v957_v40 = vpop.f32.mrf.mxu1 }
  0xf6   : > { %v872_v41 = vpack.c.bf16 %v598_v33, %v597_v29  ;;  %v892_v42 = vpack.c.bf16 %v606_v34, %v605_v30  ;;  %v596_v43 = vmax.f32 %v580_v35, 0.0  ;;  %v604_v44 = vmax.f32 %v588_v36, 0.0 }
  0xf7   : > { %v585_v45 = vadd.f32 %v949_v39, %v829_v16  ;;  %v593_v46 = vadd.f32 %v957_v40, %v829_v16  ;;  %v474_v47 = vpop.f32.mrf.mxu0  ;;  %v506_v48 = vpop.f32.mrf.mxu1 }
  0xf8   : > { %904 = vst [vmem:[%s1127_s17 + $0x8] sm:$0xff] %v872_v41   ;;  %908 = vst [vmem:[%s1127_s17 + $0x28] sm:$0xff] %v892_v42   ;;  %v867_v49 = vpack.c.bf16 %v596_v43, %v595_v37  ;;  %v887_v50 = vpack.c.bf16 %v604_v44, %v603_v38  ;;  %v583_v51 = vadd.f32 %v829_v16, %v474_v47 }
  0xf9   : > { %v591_v52 = vadd.f32 %v829_v16, %v506_v48  ;;  %v950_v53 = vpop.f32.mrf.mxu0  ;;  %v958_v54 = vpop.f32.mrf.mxu1  ;;  %v601_v57 = vmax.f32 %v585_v45, 0.0  ;;  %v609_v58 = vmax.f32 %v593_v46, 0.0 }
  0xfa   : > { %868 = vst [vmem:[%s1127_s17] sm:$0xff] %v867_v49   ;;  %907 = vst [vmem:[%s1127_s17 + $0x20] sm:$0xff] %v887_v50   ;;  %v586_v55 = vadd.f32 %v950_v53, %v829_v16  ;;  %v594_v56 = vadd.f32 %v958_v54, %v829_v16  ;;  %v599_v1 = vmax.f32 %v583_v51, 0.0 }
  0xfb   : > { %v477_v59 = vpop.f32.mrf.mxu0  ;;  %v509_v60 = vpop.f32.mrf.mxu1  ;;  %v607_v2 = vmax.f32 %v591_v52, 0.0 }
  0xfc   : > { %v602_v61 = vmax.f32 %v586_v55, 0.0  ;;  %v610_v62 = vmax.f32 %v594_v56, 0.0  ;;  %v584_v63 = vadd.f32 %v829_v16, %v477_v59  ;;  %v592_v0 = vadd.f32 %v829_v16, %v509_v60 }
  0xfe   : > { %v882_v3 = vpack.c.bf16 %v602_v61, %v601_v57  ;;  %v902_v4 = vpack.c.bf16 %v610_v62, %v609_v58  ;;  %v600_v5 = vmax.f32 %v584_v63, 0.0  ;;  %v608_v6 = vmax.f32 %v592_v0, 0.0 }
 0x100   : > { %906 = vst [vmem:[%s1127_s17 + $0x18] sm:$0xff] %v882_v3   ;;  %910 = vst [vmem:[%s1127_s17 + $0x38] sm:$0xff] %v902_v4   ;;  %v877_v7 = vpack.c.bf16 %v600_v5, %v599_v1  ;;  %v897_v8 = vpack.c.bf16 %v608_v6, %v607_v2 }
 0x102   : > { %905 = vst [vmem:[%s1127_s17 + $0x10] sm:$0xff] %v877_v7   ;;  %909 = vst [vmem:[%s1127_s17 + $0x30] sm:$0xff] %v897_v8  }
 0x103 PF: > { %s13_s14 = sadd.s32 1, %s1037_s14   ;;  %s1150_s12 = smov %s1033_s13 }
 0x104   : > { %p10_p5 = scmp.ge.s32.totalorder %s13_s14, 6   ;;  %s1151_s13 = smov %s1153_s15 }
 0x106   :  { %12 = sbr.rel (!%p10_p5) target bundleno = 2 (0x2), region = 76 }

// kernel: _lambda_.15
= control target key start
LH: loop header
LB: loop body
LE: loop exit
PB: predicated region body
PF: predicated region fallthrough
CT: control target
= control target key end

     0   :  { %s1192_s12 = smov 0   ;;  %s1194_s13 = smov 0   ;;  %s1324_s0 = inlined_call_operand.vmem [shape: bf16[128,256], index: 0, kind: input, shape index: {}]   ;;  %s1325_s1 = inlined_call_operand.vmem [shape: bf16[256,128], index: 1, kind: input, shape index: {}]   ;;  %s1326_s2 = inlined_call_operand.vmem [shape: f32[1,128], index: 2, kind: input, shape index: {}]   ;;  %s1327_s3 = inlined_call_operand.vmem [shape: bf16[128,128], index: 3, kind: output, shape index: {}]  }
   0x1   :  { %s1196_s14 = smov 0   ;;  %s1198_s15 = smov 0  }
   0x2   :  { %s1200_s16 = smov 0  }
   0x3 LB: > { %s25_s17 = sadd.s32 1, %s1165_s15  ;;  %p48_p1 = scmp.ne.s32.totalorder %s1157_s13, %s1153_s12  ;;  %s1169_s16 = sphi %s1200_s16, %s13_s16   ;;  %s1165_s15 = sphi %s1198_s15, %s1331_s15   ;;  %s1161_s14 = sphi %s1196_s14, %s1330_s14   ;;  %s1157_s13 = sphi %s1194_s13, %s1329_s13   ;;  %s1153_s12 = sphi %s1192_s12, %s1328_s12  }
   0x4   : > { %p26_p0 = scmp.ge.s32.totalorder %s25_s17, 2  ;;  %p49_p2 = scmp.eq.s32.totalorder %s1169_s16, 0 }
   0x5   : > { %s41_s19 = sadd.s32 1, %s1157_s13  ;;  %p901_p5 = scmp.ge.s32.totalorder %s1169_s16, 2 }
   0x6   : > { %s1333_s17 = smov (%p26_p0, %s25_s17), 0  ;;  %p50_p3 = por %p49_p2, %p48_p1 }
   0x7   : > { %s37_s18 = ssub.s32 %s1165_s15, %s1333_s17  ;;  %162 = sbr.rel (%p901_p5) target bundleno = 26 (0x1a), region = 20 }
   0x8   : > { %p39_p4 = scmp.eq.s32.totalorder %s37_s18, 0 }
   0xa   : > { %s1227_s20 = scalar_select %p39_p4, %s1157_s13, %s41_s19  }
   0xc   : > { %165 = sbr.rel (!%p50_p3) target bundleno = 26 (0x1a), region = 24  ;;  %s167_s21 = sand.u32 (%p50_p3), 1, %s1157_s13  }
   0xd   : > { %s903_s22 = sshll.u32 (%p50_p3), %s1165_s15, 2  ;;  %s902_s23 = sshll.u32 (%p50_p3), %s167_s21, 6 }
   0xe   : > { %s1235_s26 = scalar_lea.vmem (%p50_p3), %s1324_s0, %s903_s22  ;;  %s169_s27 = scalar_lea.vmem (%p50_p3), [#allocation3], %s902_s23 }
   0xf   : > { %v191_v0 = vld [vmem:[%s1235_s26] sm:$0xf] (%p50_p3)  ;;  %v193_v1 = vld [vmem:[%s1235_s26 + $0x8] sm:$0xf] (%p50_p3)  ;;  %v195_v2 = vld [vmem:[%s1235_s26 + $0x10] sm:$0xf] (%p50_p3) }
  0x10   : > { %192 = vst [vmem:[%s169_s27] sm:$0xf] (%p50_p3), %v191_v0  ;;  %194 = vst [vmem:[%s169_s27 + $0x4] sm:$0xf] (%p50_p3), %v193_v1  ;;  %v197_v3 = vld [vmem:[%s1235_s26 + $0x18] sm:$0xf] (%p50_p3) }
  0x11   : > { %v199_v4 = vld [vmem:[%s1235_s26 + $0x20] sm:$0xf]  ;;  %196 = vst [vmem:[%s169_s27 + $0x8] sm:$0xf] %v195_v2  ;;  %198 = vst [vmem:[%s169_s27 + $0xc] sm:$0xf] %v197_v3 }
  0x12   : > { %200 = vst [vmem:[%s169_s27 + $0x10] sm:$0xf] %v199_v4  ;;  %v201_v5 = vld [vmem:[%s1235_s26 + $0x28] sm:$0xf]  ;;  %v203_v6 = vld [vmem:[%s1235_s26 + $0x30] sm:$0xf] }
  0x13   : > { %v205_v7 = vld [vmem:[%s1235_s26 + $0x38] sm:$0xf]  ;;  %202 = vst [vmem:[%s169_s27 + $0x14] sm:$0xf] %v201_v5  ;;  %204 = vst [vmem:[%s169_s27 + $0x18] sm:$0xf] %v203_v6 }
  0x14   : > { %206 = vst [vmem:[%s169_s27 + $0x1c] sm:$0xf] %v205_v7  ;;  %v207_v8 = vld [vmem:[%s1235_s26 + $0x40] sm:$0xf]  ;;  %v209_v9 = vld [vmem:[%s1235_s26 + $0x48] sm:$0xf] }
  0x15   : > { %v211_v10 = vld [vmem:[%s1235_s26 + $0x50] sm:$0xf]  ;;  %208 = vst [vmem:[%s169_s27 + $0x20] sm:$0xf] %v207_v8  ;;  %210 = vst [vmem:[%s169_s27 + $0x24] sm:$0xf] %v209_v9 }
  0x16   : > { %212 = vst [vmem:[%s169_s27 + $0x28] sm:$0xf] %v211_v10  ;;  %v213_v11 = vld [vmem:[%s1235_s26 + $0x58] sm:$0xf]  ;;  %v215_v12 = vld [vmem:[%s1235_s26 + $0x60] sm:$0xf] }
  0x17   : > { %v217_v13 = vld [vmem:[%s1235_s26 + $0x68] sm:$0xf]  ;;  %214 = vst [vmem:[%s169_s27 + $0x2c] sm:$0xf] %v213_v11  ;;  %216 = vst [vmem:[%s169_s27 + $0x30] sm:$0xf] %v215_v12 }
  0x18   : > { %218 = vst [vmem:[%s169_s27 + $0x34] sm:$0xf] %v217_v13  ;;  %v219_v14 = vld [vmem:[%s1235_s26 + $0x70] sm:$0xf]  ;;  %v221_v15 = vld [vmem:[%s1235_s26 + $0x78] sm:$0xf] }
  0x19   : > { %220 = vst [vmem:[%s169_s27 + $0x38] sm:$0xf] %v219_v14  ;;  %222 = vst [vmem:[%s169_s27 + $0x3c] sm:$0xf] %v221_v15 }
  0x1a PF: > { %p904_p6 = scmp.ge.s32.totalorder %s1169_s16, 1  ;;  %p289_p7 = scmp.lt.s32.totalorder %s1169_s16, 3 }
  0x1c   : > { %p290_p8 = pnand %p904_p6, %p289_p7 }
  0x1d   : > { %s296_s28 = sand.u32 (!%p290_p8), 1, %s1153_s12   ;;  %s906_s29 = sshll.u32 (!%p290_p8), %s1161_s14, 4 }
  0x1e   : > { %293 = sbr.rel (%p290_p8) target bundleno = 308 (0x134), region = 69  ;;  %s905_s30 = sshll.u32 (!%p290_p8), %s296_s28, 6 }
  0x1f   : > { %p335_p9 = scmp.lt.s32.totalorder (!%p290_p8), %s906_s29, 31  ;;  %s1262_s8 = scalar_lea.vmem (!%p290_p8), [#allocation3], %s905_s30 }
  0x20   : > { %p908_p10 = scmp.ne.s32.totalorder (!%p290_p8), %s1161_s14, 0 }
  0x23   : > { %s1335_s29 = smov (!%p335_p9, %s906_s29), 31  ;;  %359 = sbr.rel (%p908_p10) target bundleno = 49 (0x31), region = 77 }
  0x24   : > { %s907_s4 = sshll.u32 %s1335_s29, 2 }
  0x25   : > { %s1260_s7 = scalar_lea.vmem %s1325_s1, %s907_s4 }
  0x28   : > { %v1171_v16 = vmov 0.0  }
  0x29   : > { %360 = vst [vmem:[#allocation2 + $0x30] sm:$0xff] %v1171_v16  ;;  %361 = vst [vmem:[#allocation2] sm:$0xff] %v1171_v16 }
  0x2a   : > { %362 = vst [vmem:[#allocation2 + $0x58] sm:$0xff] %v1171_v16  ;;  %363 = vst [vmem:[#allocation2 + $0x18] sm:$0xff] %v1171_v16 }
  0x2b   : > { %364 = vst [vmem:[#allocation2 + $0x50] sm:$0xff] %v1171_v16  ;;  %365 = vst [vmem:[#allocation2 + $0x68] sm:$0xff] %v1171_v16 }
  0x2c   : > { %366 = vst [vmem:[#allocation2 + $0x8] sm:$0xff] %v1171_v16  ;;  %367 = vst [vmem:[#allocation2 + $0x48] sm:$0xff] %v1171_v16 }
  0x2d   : > { %368 = vst [vmem:[#allocation2 + $0x40] sm:$0xff] %v1171_v16  ;;  %369 = vst [vmem:[#allocation2 + $0x20] sm:$0xff] %v1171_v16 }
  0x2e   : > { %370 = vst [vmem:[#allocation2 + $0x10] sm:$0xff] %v1171_v16  ;;  %371 = vst [vmem:[#allocation2 + $0x38] sm:$0xff] %v1171_v16 }
  0x2f   : > { %372 = vst [vmem:[#allocation2 + $0x60] sm:$0xff] %v1171_v16  ;;  %373 = vst [vmem:[#allocation2 + $0x70] sm:$0xff] %v1171_v16 }
  0x30   : > { %374 = vst [vmem:[#allocation2 + $0x78] sm:$0xff] %v1171_v16  ;;  %375 = vst [vmem:[#allocation2 + $0x28] sm:$0xff] %v1171_v16 }
  0x31 PF: > { %v1115_v17 = vld [vmem:[%s1260_s7 + $0x38] sm:$0xff]   ;;  %v1116_v18 = vld [vmem:[%s1260_s7 + $0x30] sm:$0xff]   ;;  %v1117_v19 = vld [vmem:[%s1260_s7 + $0x28] sm:$0xff]   ;;  %p925_p11 = scmp.ne.s32.totalorder %s1161_s14, 1 }
  0x32   : > { %1026 = vmatprep.subr.bf16.mxu0 %v1115_v17  ;;  %1058 = vmatprep.subr.bf16.mxu1 %v1115_v17  ;;  %v1118_v20 = vld [vmem:[%s1260_s7 + $0x20] sm:$0xff]   ;;  %v1119_v23 = vld [vmem:[%s1260_s7 + $0x18] sm:$0xff]   ;;  %v1120_v24 = vld [vmem:[%s1260_s7 + $0x10] sm:$0xff]  }
  0x33   : > { %1027 = vmatpush3.bf16.msra.mxu0 %v1115_v17  ;;  %1066 = vmatpush3.bf16.msra.mxu1 %v1115_v17  ;;  %v1123_v21 = vld [vmem:[%s1262_s8] sm:$0xff]   ;;  %v1121_v25 = vld [vmem:[%s1260_s7 + $0x8] sm:$0xff]   ;;  %v1127_v29 = vld [vmem:[%s1262_s8 + $0x10] sm:$0xff]  }
  0x34   : > { %1028 = vmatprep.subr.bf16.mxu0 %v1116_v18  ;;  %1059 = vmatprep.subr.bf16.mxu1 %v1116_v18  ;;  %v1124_v22 = vld [vmem:[%s1262_s8 + $0x20] sm:$0xff]   ;;  %v1125_v27 = vld [vmem:[%s1262_s8 + $0x8] sm:$0xff]   ;;  %v1128_v30 = vld [vmem:[%s1262_s8 + $0x30] sm:$0xff]  }
  0x35   : > { %1042 = vmatprep.mubr.bf16.mxu0 %v1123_v21  ;;  %1050 = vmatprep.mubr.bf16.mxu1 %v1124_v22  ;;  %v1122_v26 = vld [vmem:[%s1260_s7] sm:$0xff]   ;;  %v1126_v28 = vld [vmem:[%s1262_s8 + $0x28] sm:$0xff]   ;;  %v1129_v31 = vld [vmem:[%s1262_s8 + $0x18] sm:$0xff]  }
  0x36   : > { %v1130_v32 = vld [vmem:[%s1262_s8 + $0x38] sm:$0xff]   ;;  %v386_v34 = vld [vmem:[#allocation2 + $0x10] sm:$0xff]  ;;  %v384_v38 = vld [vmem:[#allocation2 + $0x40] sm:$0xff] }
  0x37   : > { %1029 = vmatpush3.bf16.msra.mxu0 %v1116_v18  ;;  %1067 = vmatpush3.bf16.msra.mxu1 %v1116_v18  ;;  %v378_v33 = vld [vmem:[#allocation2 + $0x58] sm:$0xff]  ;;  %v376_v37 = vld [vmem:[#allocation2 + $0x30] sm:$0xff]  ;;  %v377_v49 = vld [vmem:[#allocation2] sm:$0xff] }
  0x38   : > { %1030 = vmatprep.subr.bf16.mxu0 %v1117_v19  ;;  %1060 = vmatprep.subr.bf16.mxu1 %v1117_v19  ;;  %v379_v43 = vld [vmem:[#allocation2 + $0x18] sm:$0xff]  ;;  %v385_v50 = vld [vmem:[#allocation2 + $0x20] sm:$0xff]  ;;  %v382_v55 = vld [vmem:[#allocation2 + $0x8] sm:$0xff] }
  0x39   : > { %v387_v44 = vld [vmem:[#allocation2 + $0x38] sm:$0xff]  ;;  %v380_v61 = vld [vmem:[#allocation2 + $0x50] sm:$0xff]  ;;  %v388_v62 = vld [vmem:[#allocation2 + $0x60] sm:$0xff] }
  0x3a   : > { %v390_v56 = vld [vmem:[#allocation2 + $0x78] sm:$0xff]  ;;  %v383_v3 = vld [vmem:[#allocation2 + $0x48] sm:$0xff]  ;;  %v389_v10 = vld [vmem:[#allocation2 + $0x70] sm:$0xff] }
  0x3b   : > { %1031 = vmatpush3.bf16.msra.mxu0 %v1117_v19  ;;  %1068 = vmatpush3.bf16.msra.mxu1 %v1117_v19  ;;  %v391_v4 = vld [vmem:[#allocation2 + $0x28] sm:$0xff] }
  0x3c   : > { %1032 = vmatprep.subr.bf16.mxu0 %v1118_v20  ;;  %1061 = vmatprep.subr.bf16.mxu1 %v1118_v20  ;;  %v381_v9 = vld [vmem:[#allocation2 + $0x68] sm:$0xff] }
  0x3f   : > { %1033 = vmatpush3.bf16.msra.mxu0 %v1118_v20  ;;  %1069 = vmatpush3.bf16.msra.mxu1 %v1118_v20 }
  0x40   : > { %1034 = vmatprep.subr.bf16.mxu0 %v1119_v23  ;;  %1062 = vmatprep.subr.bf16.mxu1 %v1119_v23 }
  0x43   : > { %1035 = vmatpush3.bf16.msra.mxu0 %v1119_v23  ;;  %1070 = vmatpush3.bf16.msra.mxu1 %v1119_v23 }
  0x44   : > { %1036 = vmatprep.subr.bf16.mxu0 %v1120_v24  ;;  %1063 = vmatprep.subr.bf16.mxu1 %v1120_v24 }
  0x47   : > { %1037 = vmatpush3.bf16.msra.mxu0 %v1120_v24  ;;  %1071 = vmatpush3.bf16.msra.mxu1 %v1120_v24 }
  0x48   : > { %1038 = vmatprep.subr.bf16.mxu0 %v1121_v25  ;;  %1064 = vmatprep.subr.bf16.mxu1 %v1121_v25 }
  0x4b   : > { %1039 = vmatpush3.bf16.msra.mxu0 %v1121_v25  ;;  %1072 = vmatpush3.bf16.msra.mxu1 %v1121_v25 }
  0x4c   : > { %1040 = vmatprep.subr.bf16.mxu0 %v1122_v26  ;;  %1065 = vmatprep.subr.bf16.mxu1 %v1122_v26 }
  0x4f   : > { %1041 = vmatpush3.bf16.msra.mxu0 %v1122_v26  ;;  %1073 = vmatpush3.bf16.msra.mxu1 %v1122_v26 }
  0x52   : > { %1043 = vmatmul.mubr.bf16.vlgmr.msra.gmra.mxu0 %v1125_v27  ;;  %1051 = vmatmul.mubr.bf16.vlgmr.msra.gmra.mxu1 %v1126_v28 }
  0x53   : > { %1046 = vmatprep.mubr.bf16.mxu0 %v1127_v29  ;;  %1054 = vmatprep.mubr.bf16.mxu1 %v1128_v30 }
  0x5a   : > { %1047 = vmatmul.mubr.bf16.gmra.mxu0 %v1129_v31  ;;  %1055 = vmatmul.mubr.bf16.gmra.mxu1 %v1130_v32 }
 0x112   : > { %v1044_v35 = vpop.f32.mrf.mxu0  ;;  %v1052_v36 = vpop.f32.mrf.mxu1 }
 0x113   : > { %v619_v39 = vadd.f32 %v1044_v35, %v378_v33  ;;  %v627_v40 = vadd.f32 %v1052_v36, %v386_v34 }
 0x114   : > { %v554_v41 = vpop.f32.mrf.mxu0  ;;  %v586_v42 = vpop.f32.mrf.mxu1 }
 0x115   : > { %635 = vst [vmem:[#allocation2 + $0x58] sm:$0xff] %v619_v39  ;;  %643 = vst [vmem:[#allocation2 + $0x10] sm:$0xff] %v627_v40  ;;  %v617_v45 = vadd.f32 %v554_v41, %v376_v37  ;;  %v625_v46 = vadd.f32 %v586_v42, %v384_v38 }
 0x116   : > { %v1045_v47 = vpop.f32.mrf.mxu0  ;;  %v1053_v48 = vpop.f32.mrf.mxu1 }
 0x117   : > { %633 = vst [vmem:[#allocation2 + $0x30] sm:$0xff] %v617_v45  ;;  %641 = vst [vmem:[#allocation2 + $0x40] sm:$0xff] %v625_v46  ;;  %v620_v51 = vadd.f32 %v1045_v47, %v379_v43  ;;  %v628_v52 = vadd.f32 %v1053_v48, %v387_v44 }
 0x118   : > { %v557_v53 = vpop.f32.mrf.mxu0  ;;  %v589_v54 = vpop.f32.mrf.mxu1 }
 0x119   : > { %636 = vst [vmem:[#allocation2 + $0x18] sm:$0xff] %v620_v51  ;;  %644 = vst [vmem:[#allocation2 + $0x38] sm:$0xff] %v628_v52  ;;  %v618_v57 = vadd.f32 %v557_v53, %v377_v49  ;;  %v626_v58 = vadd.f32 %v589_v54, %v385_v50 }
 0x11a   : > { %v1048_v59 = vpop.f32.mrf.mxu0  ;;  %v1056_v60 = vpop.f32.mrf.mxu1 }
 0x11b   : > { %634 = vst [vmem:[#allocation2] sm:$0xff] %v618_v57  ;;  %642 = vst [vmem:[#allocation2 + $0x20] sm:$0xff] %v626_v58  ;;  %v623_v63 = vadd.f32 %v1048_v59, %v382_v55  ;;  %v631_v0 = vadd.f32 %v1056_v60, %v390_v56 }
 0x11c   : > { %v570_v1 = vpop.f32.mrf.mxu0  ;;  %v602_v2 = vpop.f32.mrf.mxu1 }
 0x11d   : > { %639 = vst [vmem:[#allocation2 + $0x8] sm:$0xff] %v623_v63  ;;  %647 = vst [vmem:[#allocation2 + $0x78] sm:$0xff] %v631_v0  ;;  %v621_v5 = vadd.f32 %v570_v1, %v380_v61  ;;  %v629_v6 = vadd.f32 %v602_v2, %v388_v62 }
 0x11e   : > { %v1049_v7 = vpop.f32.mrf.mxu0  ;;  %v1057_v8 = vpop.f32.mrf.mxu1 }
 0x11f   : > { %637 = vst [vmem:[#allocation2 + $0x50] sm:$0xff] %v621_v5  ;;  %645 = vst [vmem:[#allocation2 + $0x60] sm:$0xff] %v629_v6  ;;  %v624_v11 = vadd.f32 %v1049_v7, %v383_v3  ;;  %v632_v12 = vadd.f32 %v1057_v8, %v391_v4  ;;  %652 = sbr.rel (%p925_p11) target bundleno = 308 (0x134), region = 81 }
 0x120   : > { %v573_v13 = vpop.f32.mrf.mxu0  ;;  %v605_v14 = vpop.f32.mrf.mxu1 }
 0x121   : > { %640 = vst [vmem:[#allocation2 + $0x48] sm:$0xff] %v624_v11  ;;  %648 = vst [vmem:[#allocation2 + $0x28] sm:$0xff] %v632_v12  ;;  %v622_v15 = vadd.f32 %v573_v13, %v381_v9  ;;  %v630_v16 = vadd.f32 %v605_v14, %v389_v10 }
 0x123   : > { %638 = vst [vmem:[#allocation2 + $0x68] sm:$0xff] %v622_v15  ;;  %646 = vst [vmem:[#allocation2 + $0x70] sm:$0xff] %v630_v16 }
 0x124   : > { %v653_v17 = vld [vmem:[#allocation2 + $0x30] sm:$0xff]  ;;  %v654_v18 = vld [vmem:[#allocation2] sm:$0xff]  ;;  %v655_v22 = vld [vmem:[#allocation2 + $0x58] sm:$0xff] }
 0x125   : > { %v926_v19 = vld [vmem:[%s1326_s2] ss:$0 sm:$0xff]  ;;  %v656_v23 = vld [vmem:[#allocation2 + $0x18] sm:$0xff]  ;;  %v659_v29 = vld [vmem:[#allocation2 + $0x8] sm:$0xff] }
 0x126   : > { %v676_v20 = vadd.f32 %v926_v19, %v653_v17  ;;  %v677_v21 = vadd.f32 %v926_v19, %v654_v18  ;;  %v657_v24 = vld [vmem:[#allocation2 + $0x50] sm:$0xff]  ;;  %v678_v25 = vadd.f32 %v926_v19, %v655_v22  ;;  %v679_v26 = vadd.f32 %v926_v19, %v656_v23  ;;  %v661_v35 = vld [vmem:[#allocation2 + $0x40] sm:$0xff]  ;;  %v664_v42 = vld [vmem:[#allocation2 + $0x38] sm:$0xff] }
 0x127   : > { %v680_v28 = vadd.f32 %v926_v19, %v657_v24  ;;  %v682_v34 = vadd.f32 %v926_v19, %v659_v29  ;;  %v662_v36 = vld [vmem:[#allocation2 + $0x20] sm:$0xff]  ;;  %v663_v37 = vld [vmem:[#allocation2 + $0x10] sm:$0xff]  ;;  %v684_v47 = vadd.f32 %v926_v19, %v661_v35  ;;  %v667_v53 = vld [vmem:[#allocation2 + $0x78] sm:$0xff]  ;;  %v687_v57 = vadd.f32 %v926_v19, %v664_v42 }
 0x128   : > { %v660_v30 = vld [vmem:[#allocation2 + $0x48] sm:$0xff]  ;;  %v692_v31 = vmax.f32 %v676_v20, 0.0  ;;  %v693_v32 = vmax.f32 %v677_v21, 0.0  ;;  %v694_v38 = vmax.f32 %v678_v25, 0.0  ;;  %v695_v39 = vmax.f32 %v679_v26, 0.0  ;;  %v665_v43 = vld [vmem:[#allocation2 + $0x60] sm:$0xff] }
 0x129   : > { %v696_v40 = vmax.f32 %v680_v28, 0.0  ;;  %v683_v41 = vadd.f32 %v926_v19, %v660_v30  ;;  %v698_v46 = vmax.f32 %v682_v34, 0.0  ;;  %v685_v51 = vadd.f32 %v926_v19, %v662_v36  ;;  %v668_v54 = vld [vmem:[#allocation2 + $0x28] sm:$0xff] }
 0x12a   : > { %v658_v27 = vld [vmem:[#allocation2 + $0x68] sm:$0xff]  ;;  %v966_v44 = vpack.c.bf16 %v693_v32, %v692_v31  ;;  %v666_v48 = vld [vmem:[#allocation2 + $0x70] sm:$0xff]  ;;  %v971_v49 = vpack.c.bf16 %v695_v39, %v694_v38  ;;  %v686_v52 = vadd.f32 %v926_v19, %v663_v37  ;;  %v700_v56 = vmax.f32 %v684_v47, 0.0 }
 0x12b   : > { %v681_v33 = vadd.f32 %v926_v19, %v658_v27  ;;  %v699_v50 = vmax.f32 %v683_v41, 0.0  ;;  %v688_v58 = vadd.f32 %v926_v19, %v665_v43  ;;  %v701_v60 = vmax.f32 %v685_v51, 0.0 }
 0x12c   : > { %967 = vst [vmem:[%s1327_s3] sm:$0xff] %v966_v44   ;;  %1003 = vst [vmem:[%s1327_s3 + $0x8] sm:$0xff] %v971_v49   ;;  %v702_v61 = vmax.f32 %v686_v52, 0.0  ;;  %v689_v62 = vadd.f32 %v926_v19, %v666_v48  ;;  %v703_v63 = vmax.f32 %v687_v57, 0.0  ;;  %v690_v1 = vadd.f32 %v926_v19, %v667_v53 }
 0x12d   : > { %v697_v45 = vmax.f32 %v681_v33, 0.0  ;;  %v981_v59 = vpack.c.bf16 %v699_v50, %v698_v46  ;;  %v704_v0 = vmax.f32 %v688_v58, 0.0  ;;  %v691_v2 = vadd.f32 %v926_v19, %v668_v54 }
 0x12e   : > { %v986_v3 = vpack.c.bf16 %v701_v60, %v700_v56  ;;  %v705_v4 = vmax.f32 %v689_v62, 0.0  ;;  %v991_v5 = vpack.c.bf16 %v703_v63, %v702_v61  ;;  %v706_v6 = vmax.f32 %v690_v1, 0.0 }
 0x12f   : > { %v976_v55 = vpack.c.bf16 %v697_v45, %v696_v40  ;;  %1005 = vst [vmem:[%s1327_s3 + $0x18] sm:$0xff] %v981_v59   ;;  %v707_v7 = vmax.f32 %v691_v2, 0.0 }
 0x130   : > { %1006 = vst [vmem:[%s1327_s3 + $0x20] sm:$0xff] %v986_v3   ;;  %v996_v8 = vpack.c.bf16 %v705_v4, %v704_v0  ;;  %1007 = vst [vmem:[%s1327_s3 + $0x28] sm:$0xff] %v991_v5  }
 0x131   : > { %1004 = vst [vmem:[%s1327_s3 + $0x10] sm:$0xff] %v976_v55   ;;  %v1001_v9 = vpack.c.bf16 %v707_v7, %v706_v6 }
 0x132   : > { %1008 = vst [vmem:[%s1327_s3 + $0x30] sm:$0xff] %v996_v8  }
 0x133   : > { %1009 = vst [vmem:[%s1327_s3 + $0x38] sm:$0xff] %v1001_v9  }
 0x134 PF: > { %s13_s16 = sadd.s32 1, %s1169_s16   ;;  %s1328_s12 = smov %s1157_s13 }
 0x135   : > { %p10_p12 = scmp.ge.s32.totalorder %s13_s16, 4   ;;  %s1329_s13 = smov %s1227_s20 }
 0x136   : > { %s1330_s14 = smov %s1165_s15  ;;  %s1331_s15 = smov %s1333_s17 }
 0x137   :  { %12 = sbr.rel (!%p10_p12) target bundleno = 3 (0x3), region = 122 }

// kernel: _lambda_.16
= control target key start
LH: loop header
LB: loop body
LE: loop exit
PB: predicated region body
PF: predicated region fallthrough
CT: control target
= control target key end

     0   :  { %s1192_s12 = smov 0   ;;  %s1194_s13 = smov 0   ;;  %s1324_s0 = inlined_call_operand.vmem [shape: bf16[128,384], index: 0, kind: input, shape index: {}]   ;;  %s1325_s1 = inlined_call_operand.vmem [shape: bf16[384,128], index: 1, kind: input, shape index: {}]   ;;  %s1326_s2 = inlined_call_operand.vmem [shape: f32[1,128], index: 2, kind: input, shape index: {}]   ;;  %s1327_s3 = inlined_call_operand.vmem [shape: bf16[128,128], index: 3, kind: output, shape index: {}]  }
   0x1   :  { %s1196_s14 = smov 0   ;;  %s1198_s15 = smov 0  }
   0x2   :  { %s1200_s16 = smov 0  }
   0x3 LB: > { %s25_s17 = sadd.s32 1, %s1165_s15  ;;  %p48_p1 = scmp.ne.s32.totalorder %s1157_s13, %s1153_s12  ;;  %s1169_s16 = sphi %s1200_s16, %s13_s16   ;;  %s1165_s15 = sphi %s1198_s15, %s1331_s15   ;;  %s1161_s14 = sphi %s1196_s14, %s1330_s14   ;;  %s1157_s13 = sphi %s1194_s13, %s1329_s13   ;;  %s1153_s12 = sphi %s1192_s12, %s1328_s12  }
   0x4   : > { %p26_p0 = scmp.ge.s32.totalorder %s25_s17, 3  ;;  %p49_p2 = scmp.eq.s32.totalorder %s1169_s16, 0 }
   0x5   : > { %s41_s19 = sadd.s32 1, %s1157_s13  ;;  %p901_p5 = scmp.ge.s32.totalorder %s1169_s16, 3 }
   0x6   : > { %s1333_s17 = smov (%p26_p0, %s25_s17), 0  ;;  %p50_p3 = por %p49_p2, %p48_p1 }
   0x7   : > { %s37_s18 = ssub.s32 %s1165_s15, %s1333_s17  ;;  %162 = sbr.rel (%p901_p5) target bundleno = 26 (0x1a), region = 20 }
   0x8   : > { %p39_p4 = scmp.eq.s32.totalorder %s37_s18, 0 }
   0xa   : > { %s1227_s20 = scalar_select %p39_p4, %s1157_s13, %s41_s19  }
   0xc   : > { %165 = sbr.rel (!%p50_p3) target bundleno = 26 (0x1a), region = 24  ;;  %s167_s21 = sand.u32 (%p50_p3), 1, %s1157_s13  }
   0xd   : > { %s903_s22 = sshll.u32 (%p50_p3), %s1165_s15, 2  ;;  %s902_s23 = sshll.u32 (%p50_p3), %s167_s21, 6 }
   0xe   : > { %s1235_s26 = scalar_lea.vmem (%p50_p3), %s1324_s0, %s903_s22  ;;  %s169_s27 = scalar_lea.vmem (%p50_p3), [#allocation3], %s902_s23 }
   0xf   : > { %v191_v0 = vld [vmem:[%s1235_s26] sm:$0xf] (%p50_p3)  ;;  %v193_v1 = vld [vmem:[%s1235_s26 + $0xc] sm:$0xf] (%p50_p3)  ;;  %v195_v2 = vld [vmem:[%s1235_s26 + $0x18] sm:$0xf] (%p50_p3) }
  0x10   : > { %192 = vst [vmem:[%s169_s27] sm:$0xf] (%p50_p3), %v191_v0  ;;  %194 = vst [vmem:[%s169_s27 + $0x4] sm:$0xf] (%p50_p3), %v193_v1  ;;  %v197_v3 = vld [vmem:[%s1235_s26 + $0x24] sm:$0xf] (%p50_p3) }
  0x11   : > { %v199_v4 = vld [vmem:[%s1235_s26 + $0x30] sm:$0xf]  ;;  %196 = vst [vmem:[%s169_s27 + $0x8] sm:$0xf] %v195_v2  ;;  %198 = vst [vmem:[%s169_s27 + $0xc] sm:$0xf] %v197_v3 }
  0x12   : > { %200 = vst [vmem:[%s169_s27 + $0x10] sm:$0xf] %v199_v4  ;;  %v201_v5 = vld [vmem:[%s1235_s26 + $0x3c] sm:$0xf]  ;;  %v203_v6 = vld [vmem:[%s1235_s26 + $0x48] sm:$0xf] }
  0x13   : > { %v205_v7 = vld [vmem:[%s1235_s26 + $0x54] sm:$0xf]  ;;  %202 = vst [vmem:[%s169_s27 + $0x14] sm:$0xf] %v201_v5  ;;  %204 = vst [vmem:[%s169_s27 + $0x18] sm:$0xf] %v203_v6 }
  0x14   : > { %206 = vst [vmem:[%s169_s27 + $0x1c] sm:$0xf] %v205_v7  ;;  %v207_v8 = vld [vmem:[%s1235_s26 + $0x60] sm:$0xf]  ;;  %v209_v9 = vld [vmem:[%s1235_s26 + $0x6c] sm:$0xf] }
  0x15   : > { %v211_v10 = vld [vmem:[%s1235_s26 + $0x78] sm:$0xf]  ;;  %208 = vst [vmem:[%s169_s27 + $0x20] sm:$0xf] %v207_v8  ;;  %210 = vst [vmem:[%s169_s27 + $0x24] sm:$0xf] %v209_v9 }
  0x16   : > { %212 = vst [vmem:[%s169_s27 + $0x28] sm:$0xf] %v211_v10  ;;  %v213_v11 = vld [vmem:[%s1235_s26 + $0x84] sm:$0xf]  ;;  %v215_v12 = vld [vmem:[%s1235_s26 + $0x90] sm:$0xf] }
  0x17   : > { %v217_v13 = vld [vmem:[%s1235_s26 + $0x9c] sm:$0xf]  ;;  %214 = vst [vmem:[%s169_s27 + $0x2c] sm:$0xf] %v213_v11  ;;  %216 = vst [vmem:[%s169_s27 + $0x30] sm:$0xf] %v215_v12 }
  0x18   : > { %218 = vst [vmem:[%s169_s27 + $0x34] sm:$0xf] %v217_v13  ;;  %v219_v14 = vld [vmem:[%s1235_s26 + $0xa8] sm:$0xf]  ;;  %v221_v15 = vld [vmem:[%s1235_s26 + $0xb4] sm:$0xf] }
  0x19   : > { %220 = vst [vmem:[%s169_s27 + $0x38] sm:$0xf] %v219_v14  ;;  %222 = vst [vmem:[%s169_s27 + $0x3c] sm:$0xf] %v221_v15 }
  0x1a PF: > { %p904_p6 = scmp.ge.s32.totalorder %s1169_s16, 1  ;;  %p289_p7 = scmp.lt.s32.totalorder %s1169_s16, 4 }
  0x1c   : > { %p290_p8 = pnand %p904_p6, %p289_p7 }
  0x1d   : > { %s296_s28 = sand.u32 (!%p290_p8), 1, %s1153_s12   ;;  %s906_s29 = sshll.u32 (!%p290_p8), %s1161_s14, 4 }
  0x1e   : > { %293 = sbr.rel (%p290_p8) target bundleno = 308 (0x134), region = 69  ;;  %s905_s30 = sshll.u32 (!%p290_p8), %s296_s28, 6 }
  0x1f   : > { %p335_p9 = scmp.lt.s32.totalorder (!%p290_p8), %s906_s29, 47  ;;  %s1262_s8 = scalar_lea.vmem (!%p290_p8), [#allocation3], %s905_s30 }
  0x20   : > { %p908_p10 = scmp.ne.s32.totalorder (!%p290_p8), %s1161_s14, 0 }
  0x23   : > { %s1335_s29 = smov (!%p335_p9, %s906_s29), 47  ;;  %359 = sbr.rel (%p908_p10) target bundleno = 49 (0x31), region = 77 }
  0x24   : > { %s907_s4 = sshll.u32 %s1335_s29, 2 }
  0x25   : > { %s1260_s7 = scalar_lea.vmem %s1325_s1, %s907_s4 }
  0x28   : > { %v1171_v16 = vmov 0.0  }
  0x29   : > { %360 = vst [vmem:[#allocation2 + $0x30] sm:$0xff] %v1171_v16  ;;  %361 = vst [vmem:[#allocation2] sm:$0xff] %v1171_v16 }
  0x2a   : > { %362 = vst [vmem:[#allocation2 + $0x58] sm:$0xff] %v1171_v16  ;;  %363 = vst [vmem:[#allocation2 + $0x18] sm:$0xff] %v1171_v16 }
  0x2b   : > { %364 = vst [vmem:[#allocation2 + $0x50] sm:$0xff] %v1171_v16  ;;  %365 = vst [vmem:[#allocation2 + $0x68] sm:$0xff] %v1171_v16 }
  0x2c   : > { %366 = vst [vmem:[#allocation2 + $0x8] sm:$0xff] %v1171_v16  ;;  %367 = vst [vmem:[#allocation2 + $0x48] sm:$0xff] %v1171_v16 }
  0x2d   : > { %368 = vst [vmem:[#allocation2 + $0x40] sm:$0xff] %v1171_v16  ;;  %369 = vst [vmem:[#allocation2 + $0x20] sm:$0xff] %v1171_v16 }
  0x2e   : > { %370 = vst [vmem:[#allocation2 + $0x10] sm:$0xff] %v1171_v16  ;;  %371 = vst [vmem:[#allocation2 + $0x38] sm:$0xff] %v1171_v16 }
  0x2f   : > { %372 = vst [vmem:[#allocation2 + $0x60] sm:$0xff] %v1171_v16  ;;  %373 = vst [vmem:[#allocation2 + $0x70] sm:$0xff] %v1171_v16 }
  0x30   : > { %374 = vst [vmem:[#allocation2 + $0x78] sm:$0xff] %v1171_v16  ;;  %375 = vst [vmem:[#allocation2 + $0x28] sm:$0xff] %v1171_v16 }
  0x31 PF: > { %v1115_v17 = vld [vmem:[%s1260_s7 + $0x38] sm:$0xff]   ;;  %v1116_v18 = vld [vmem:[%s1260_s7 + $0x30] sm:$0xff]   ;;  %v1117_v19 = vld [vmem:[%s1260_s7 + $0x28] sm:$0xff]   ;;  %p925_p11 = scmp.ne.s32.totalorder %s1161_s14, 2 }
  0x32   : > { %1026 = vmatprep.subr.bf16.mxu0 %v1115_v17  ;;  %1058 = vmatprep.subr.bf16.mxu1 %v1115_v17  ;;  %v1118_v20 = vld [vmem:[%s1260_s7 + $0x20] sm:$0xff]   ;;  %v1119_v23 = vld [vmem:[%s1260_s7 + $0x18] sm:$0xff]   ;;  %v1120_v24 = vld [vmem:[%s1260_s7 + $0x10] sm:$0xff]  }
  0x33   : > { %1027 = vmatpush3.bf16.msra.mxu0 %v1115_v17  ;;  %1066 = vmatpush3.bf16.msra.mxu1 %v1115_v17  ;;  %v1123_v21 = vld [vmem:[%s1262_s8] sm:$0xff]   ;;  %v1121_v25 = vld [vmem:[%s1260_s7 + $0x8] sm:$0xff]   ;;  %v1127_v29 = vld [vmem:[%s1262_s8 + $0x10] sm:$0xff]  }
  0x34   : > { %1028 = vmatprep.subr.bf16.mxu0 %v1116_v18  ;;  %1059 = vmatprep.subr.bf16.mxu1 %v1116_v18  ;;  %v1124_v22 = vld [vmem:[%s1262_s8 + $0x20] sm:$0xff]   ;;  %v1125_v27 = vld [vmem:[%s1262_s8 + $0x8] sm:$0xff]   ;;  %v1128_v30 = vld [vmem:[%s1262_s8 + $0x30] sm:$0xff]  }
  0x35   : > { %1042 = vmatprep.mubr.bf16.mxu0 %v1123_v21  ;;  %1050 = vmatprep.mubr.bf16.mxu1 %v1124_v22  ;;  %v1122_v26 = vld [vmem:[%s1260_s7] sm:$0xff]   ;;  %v1126_v28 = vld [vmem:[%s1262_s8 + $0x28] sm:$0xff]   ;;  %v1129_v31 = vld [vmem:[%s1262_s8 + $0x18] sm:$0xff]  }
  0x36   : > { %v1130_v32 = vld [vmem:[%s1262_s8 + $0x38] sm:$0xff]   ;;  %v386_v34 = vld [vmem:[#allocation2 + $0x10] sm:$0xff]  ;;  %v384_v38 = vld [vmem:[#allocation2 + $0x40] sm:$0xff] }
  0x37   : > { %1029 = vmatpush3.bf16.msra.mxu0 %v1116_v18  ;;  %1067 = vmatpush3.bf16.msra.mxu1 %v1116_v18  ;;  %v378_v33 = vld [vmem:[#allocation2 + $0x58] sm:$0xff]  ;;  %v376_v37 = vld [vmem:[#allocation2 + $0x30] sm:$0xff]  ;;  %v377_v49 = vld [vmem:[#allocation2] sm:$0xff] }
  0x38   : > { %1030 = vmatprep.subr.bf16.mxu0 %v1117_v19  ;;  %1060 = vmatprep.subr.bf16.mxu1 %v1117_v19  ;;  %v379_v43 = vld [vmem:[#allocation2 + $0x18] sm:$0xff]  ;;  %v385_v50 = vld [vmem:[#allocation2 + $0x20] sm:$0xff]  ;;  %v382_v55 = vld [vmem:[#allocation2 + $0x8] sm:$0xff] }
  0x39   : > { %v387_v44 = vld [vmem:[#allocation2 + $0x38] sm:$0xff]  ;;  %v380_v61 = vld [vmem:[#allocation2 + $0x50] sm:$0xff]  ;;  %v388_v62 = vld [vmem:[#allocation2 + $0x60] sm:$0xff] }
  0x3a   : > { %v390_v56 = vld [vmem:[#allocation2 + $0x78] sm:$0xff]  ;;  %v383_v3 = vld [vmem:[#allocation2 + $0x48] sm:$0xff]  ;;  %v389_v10 = vld [vmem:[#allocation2 + $0x70] sm:$0xff] }
  0x3b   : > { %1031 = vmatpush3.bf16.msra.mxu0 %v1117_v19  ;;  %1068 = vmatpush3.bf16.msra.mxu1 %v1117_v19  ;;  %v391_v4 = vld [vmem:[#allocation2 + $0x28] sm:$0xff] }
  0x3c   : > { %1032 = vmatprep.subr.bf16.mxu0 %v1118_v20  ;;  %1061 = vmatprep.subr.bf16.mxu1 %v1118_v20  ;;  %v381_v9 = vld [vmem:[#allocation2 + $0x68] sm:$0xff] }
  0x3f   : > { %1033 = vmatpush3.bf16.msra.mxu0 %v1118_v20  ;;  %1069 = vmatpush3.bf16.msra.mxu1 %v1118_v20 }
  0x40   : > { %1034 = vmatprep.subr.bf16.mxu0 %v1119_v23  ;;  %1062 = vmatprep.subr.bf16.mxu1 %v1119_v23 }
  0x43   : > { %1035 = vmatpush3.bf16.msra.mxu0 %v1119_v23  ;;  %1070 = vmatpush3.bf16.msra.mxu1 %v1119_v23 }
  0x44   : > { %1036 = vmatprep.subr.bf16.mxu0 %v1120_v24  ;;  %1063 = vmatprep.subr.bf16.mxu1 %v1120_v24 }
  0x47   : > { %1037 = vmatpush3.bf16.msra.mxu0 %v1120_v24  ;;  %1071 = vmatpush3.bf16.msra.mxu1 %v1120_v24 }
  0x48   : > { %1038 = vmatprep.subr.bf16.mxu0 %v1121_v25  ;;  %1064 = vmatprep.subr.bf16.mxu1 %v1121_v25 }
  0x4b   : > { %1039 = vmatpush3.bf16.msra.mxu0 %v1121_v25  ;;  %1072 = vmatpush3.bf16.msra.mxu1 %v1121_v25 }
  0x4c   : > { %1040 = vmatprep.subr.bf16.mxu0 %v1122_v26  ;;  %1065 = vmatprep.subr.bf16.mxu1 %v1122_v26 }
  0x4f   : > { %1041 = vmatpush3.bf16.msra.mxu0 %v1122_v26  ;;  %1073 = vmatpush3.bf16.msra.mxu1 %v1122_v26 }
  0x52   : > { %1043 = vmatmul.mubr.bf16.vlgmr.msra.gmra.mxu0 %v1125_v27  ;;  %1051 = vmatmul.mubr.bf16.vlgmr.msra.gmra.mxu1 %v1126_v28 }
  0x53   : > { %1046 = vmatprep.mubr.bf16.mxu0 %v1127_v29  ;;  %1054 = vmatprep.mubr.bf16.mxu1 %v1128_v30 }
  0x5a   : > { %1047 = vmatmul.mubr.bf16.gmra.mxu0 %v1129_v31  ;;  %1055 = vmatmul.mubr.bf16.gmra.mxu1 %v1130_v32 }
 0x112   : > { %v1044_v35 = vpop.f32.mrf.mxu0  ;;  %v1052_v36 = vpop.f32.mrf.mxu1 }
 0x113   : > { %v619_v39 = vadd.f32 %v1044_v35, %v378_v33  ;;  %v627_v40 = vadd.f32 %v1052_v36, %v386_v34 }
 0x114   : > { %v554_v41 = vpop.f32.mrf.mxu0  ;;  %v586_v42 = vpop.f32.mrf.mxu1 }
 0x115   : > { %635 = vst [vmem:[#allocation2 + $0x58] sm:$0xff] %v619_v39  ;;  %643 = vst [vmem:[#allocation2 + $0x10] sm:$0xff] %v627_v40  ;;  %v617_v45 = vadd.f32 %v554_v41, %v376_v37  ;;  %v625_v46 = vadd.f32 %v586_v42, %v384_v38 }
 0x116   : > { %v1045_v47 = vpop.f32.mrf.mxu0  ;;  %v1053_v48 = vpop.f32.mrf.mxu1 }
 0x117   : > { %633 = vst [vmem:[#allocation2 + $0x30] sm:$0xff] %v617_v45  ;;  %641 = vst [vmem:[#allocation2 + $0x40] sm:$0xff] %v625_v46  ;;  %v620_v51 = vadd.f32 %v1045_v47, %v379_v43  ;;  %v628_v52 = vadd.f32 %v1053_v48, %v387_v44 }
 0x118   : > { %v557_v53 = vpop.f32.mrf.mxu0  ;;  %v589_v54 = vpop.f32.mrf.mxu1 }
 0x119   : > { %636 = vst [vmem:[#allocation2 + $0x18] sm:$0xff] %v620_v51  ;;  %644 = vst [vmem:[#allocation2 + $0x38] sm:$0xff] %v628_v52  ;;  %v618_v57 = vadd.f32 %v557_v53, %v377_v49  ;;  %v626_v58 = vadd.f32 %v589_v54, %v385_v50 }
 0x11a   : > { %v1048_v59 = vpop.f32.mrf.mxu0  ;;  %v1056_v60 = vpop.f32.mrf.mxu1 }
 0x11b   : > { %634 = vst [vmem:[#allocation2] sm:$0xff] %v618_v57  ;;  %642 = vst [vmem:[#allocation2 + $0x20] sm:$0xff] %v626_v58  ;;  %v623_v63 = vadd.f32 %v1048_v59, %v382_v55  ;;  %v631_v0 = vadd.f32 %v1056_v60, %v390_v56 }
 0x11c   : > { %v570_v1 = vpop.f32.mrf.mxu0  ;;  %v602_v2 = vpop.f32.mrf.mxu1 }
 0x11d   : > { %639 = vst [vmem:[#allocation2 + $0x8] sm:$0xff] %v623_v63  ;;  %647 = vst [vmem:[#allocation2 + $0x78] sm:$0xff] %v631_v0  ;;  %v621_v5 = vadd.f32 %v570_v1, %v380_v61  ;;  %v629_v6 = vadd.f32 %v602_v2, %v388_v62 }
 0x11e   : > { %v1049_v7 = vpop.f32.mrf.mxu0  ;;  %v1057_v8 = vpop.f32.mrf.mxu1 }
 0x11f   : > { %637 = vst [vmem:[#allocation2 + $0x50] sm:$0xff] %v621_v5  ;;  %645 = vst [vmem:[#allocation2 + $0x60] sm:$0xff] %v629_v6  ;;  %v624_v11 = vadd.f32 %v1049_v7, %v383_v3  ;;  %v632_v12 = vadd.f32 %v1057_v8, %v391_v4  ;;  %652 = sbr.rel (%p925_p11) target bundleno = 308 (0x134), region = 81 }
 0x120   : > { %v573_v13 = vpop.f32.mrf.mxu0  ;;  %v605_v14 = vpop.f32.mrf.mxu1 }
 0x121   : > { %640 = vst [vmem:[#allocation2 + $0x48] sm:$0xff] %v624_v11  ;;  %648 = vst [vmem:[#allocation2 + $0x28] sm:$0xff] %v632_v12  ;;  %v622_v15 = vadd.f32 %v573_v13, %v381_v9  ;;  %v630_v16 = vadd.f32 %v605_v14, %v389_v10 }
 0x123   : > { %638 = vst [vmem:[#allocation2 + $0x68] sm:$0xff] %v622_v15  ;;  %646 = vst [vmem:[#allocation2 + $0x70] sm:$0xff] %v630_v16 }
 0x124   : > { %v653_v17 = vld [vmem:[#allocation2 + $0x30] sm:$0xff]  ;;  %v654_v18 = vld [vmem:[#allocation2] sm:$0xff]  ;;  %v655_v22 = vld [vmem:[#allocation2 + $0x58] sm:$0xff] }
 0x125   : > { %v926_v19 = vld [vmem:[%s1326_s2] ss:$0 sm:$0xff]  ;;  %v656_v23 = vld [vmem:[#allocation2 + $0x18] sm:$0xff]  ;;  %v659_v29 = vld [vmem:[#allocation2 + $0x8] sm:$0xff] }
 0x126   : > { %v676_v20 = vadd.f32 %v926_v19, %v653_v17  ;;  %v677_v21 = vadd.f32 %v926_v19, %v654_v18  ;;  %v657_v24 = vld [vmem:[#allocation2 + $0x50] sm:$0xff]  ;;  %v678_v25 = vadd.f32 %v926_v19, %v655_v22  ;;  %v679_v26 = vadd.f32 %v926_v19, %v656_v23  ;;  %v661_v35 = vld [vmem:[#allocation2 + $0x40] sm:$0xff]  ;;  %v664_v42 = vld [vmem:[#allocation2 + $0x38] sm:$0xff] }
 0x127   : > { %v680_v28 = vadd.f32 %v926_v19, %v657_v24  ;;  %v682_v34 = vadd.f32 %v926_v19, %v659_v29  ;;  %v662_v36 = vld [vmem:[#allocation2 + $0x20] sm:$0xff]  ;;  %v663_v37 = vld [vmem:[#allocation2 + $0x10] sm:$0xff]  ;;  %v684_v47 = vadd.f32 %v926_v19, %v661_v35  ;;  %v667_v53 = vld [vmem:[#allocation2 + $0x78] sm:$0xff]  ;;  %v687_v57 = vadd.f32 %v926_v19, %v664_v42 }
 0x128   : > { %v660_v30 = vld [vmem:[#allocation2 + $0x48] sm:$0xff]  ;;  %v692_v31 = vmax.f32 %v676_v20, 0.0  ;;  %v693_v32 = vmax.f32 %v677_v21, 0.0  ;;  %v694_v38 = vmax.f32 %v678_v25, 0.0  ;;  %v695_v39 = vmax.f32 %v679_v26, 0.0  ;;  %v665_v43 = vld [vmem:[#allocation2 + $0x60] sm:$0xff] }
 0x129   : > { %v696_v40 = vmax.f32 %v680_v28, 0.0  ;;  %v683_v41 = vadd.f32 %v926_v19, %v660_v30  ;;  %v698_v46 = vmax.f32 %v682_v34, 0.0  ;;  %v685_v51 = vadd.f32 %v926_v19, %v662_v36  ;;  %v668_v54 = vld [vmem:[#allocation2 + $0x28] sm:$0xff] }
 0x12a   : > { %v658_v27 = vld [vmem:[#allocation2 + $0x68] sm:$0xff]  ;;  %v966_v44 = vpack.c.bf16 %v693_v32, %v692_v31  ;;  %v666_v48 = vld [vmem:[#allocation2 + $0x70] sm:$0xff]  ;;  %v971_v49 = vpack.c.bf16 %v695_v39, %v694_v38  ;;  %v686_v52 = vadd.f32 %v926_v19, %v663_v37  ;;  %v700_v56 = vmax.f32 %v684_v47, 0.0 }
 0x12b   : > { %v681_v33 = vadd.f32 %v926_v19, %v658_v27  ;;  %v699_v50 = vmax.f32 %v683_v41, 0.0  ;;  %v688_v58 = vadd.f32 %v926_v19, %v665_v43  ;;  %v701_v60 = vmax.f32 %v685_v51, 0.0 }
 0x12c   : > { %967 = vst [vmem:[%s1327_s3] sm:$0xff] %v966_v44   ;;  %1003 = vst [vmem:[%s1327_s3 + $0x8] sm:$0xff] %v971_v49   ;;  %v702_v61 = vmax.f32 %v686_v52, 0.0  ;;  %v689_v62 = vadd.f32 %v926_v19, %v666_v48  ;;  %v703_v63 = vmax.f32 %v687_v57, 0.0  ;;  %v690_v1 = vadd.f32 %v926_v19, %v667_v53 }
 0x12d   : > { %v697_v45 = vmax.f32 %v681_v33, 0.0  ;;  %v981_v59 = vpack.c.bf16 %v699_v50, %v698_v46  ;;  %v704_v0 = vmax.f32 %v688_v58, 0.0  ;;  %v691_v2 = vadd.f32 %v926_v19, %v668_v54 }
 0x12e   : > { %v986_v3 = vpack.c.bf16 %v701_v60, %v700_v56  ;;  %v705_v4 = vmax.f32 %v689_v62, 0.0  ;;  %v991_v5 = vpack.c.bf16 %v703_v63, %v702_v61  ;;  %v706_v6 = vmax.f32 %v690_v1, 0.0 }
 0x12f   : > { %v976_v55 = vpack.c.bf16 %v697_v45, %v696_v40  ;;  %1005 = vst [vmem:[%s1327_s3 + $0x18] sm:$0xff] %v981_v59   ;;  %v707_v7 = vmax.f32 %v691_v2, 0.0 }
 0x130   : > { %1006 = vst [vmem:[%s1327_s3 + $0x20] sm:$0xff] %v986_v3   ;;  %v996_v8 = vpack.c.bf16 %v705_v4, %v704_v0  ;;  %1007 = vst [vmem:[%s1327_s3 + $0x28] sm:$0xff] %v991_v5  }
 0x131   : > { %1004 = vst [vmem:[%s1327_s3 + $0x10] sm:$0xff] %v976_v55   ;;  %v1001_v9 = vpack.c.bf16 %v707_v7, %v706_v6 }
 0x132   : > { %1008 = vst [vmem:[%s1327_s3 + $0x30] sm:$0xff] %v996_v8  }
 0x133   : > { %1009 = vst [vmem:[%s1327_s3 + $0x38] sm:$0xff] %v1001_v9  }
 0x134 PF: > { %s13_s16 = sadd.s32 1, %s1169_s16   ;;  %s1328_s12 = smov %s1157_s13 }
 0x135   : > { %p10_p12 = scmp.ge.s32.totalorder %s13_s16, 5   ;;  %s1329_s13 = smov %s1227_s20 }
 0x136   : > { %s1330_s14 = smov %s1165_s15  ;;  %s1331_s15 = smov %s1333_s17 }
 0x137   :  { %12 = sbr.rel (!%p10_p12) target bundleno = 3 (0x3), region = 122 }

// kernel: _lambda_.26
= control target key start
LH: loop header
LB: loop body
LE: loop exit
PB: predicated region body
PF: predicated region fallthrough
CT: control target
= control target key end

     0   :  { %s1192_s12 = smov 0   ;;  %s1194_s13 = smov 0   ;;  %s1324_s0 = inlined_call_operand.vmem [shape: bf16[128,512], index: 0, kind: input, shape index: {}]   ;;  %s1325_s1 = inlined_call_operand.vmem [shape: bf16[512,128], index: 1, kind: input, shape index: {}]   ;;  %s1326_s2 = inlined_call_operand.vmem [shape: f32[1,128], index: 2, kind: input, shape index: {}]   ;;  %s1327_s3 = inlined_call_operand.vmem [shape: bf16[128,128], index: 3, kind: output, shape index: {}]  }
   0x1   :  { %s1196_s14 = smov 0   ;;  %s1198_s15 = smov 0  }
   0x2   :  { %s1200_s16 = smov 0  }
   0x3 LB: > { %s25_s17 = sadd.s32 1, %s1165_s15  ;;  %p48_p1 = scmp.ne.s32.totalorder %s1157_s13, %s1153_s12  ;;  %s1169_s16 = sphi %s1200_s16, %s13_s16   ;;  %s1165_s15 = sphi %s1198_s15, %s1331_s15   ;;  %s1161_s14 = sphi %s1196_s14, %s1330_s14   ;;  %s1157_s13 = sphi %s1194_s13, %s1329_s13   ;;  %s1153_s12 = sphi %s1192_s12, %s1328_s12  }
   0x4   : > { %p26_p0 = scmp.ge.s32.totalorder %s25_s17, 4  ;;  %p49_p2 = scmp.eq.s32.totalorder %s1169_s16, 0 }
   0x5   : > { %s41_s19 = sadd.s32 1, %s1157_s13  ;;  %p901_p5 = scmp.ge.s32.totalorder %s1169_s16, 4 }
   0x6   : > { %s1333_s17 = smov (%p26_p0, %s25_s17), 0  ;;  %p50_p3 = por %p49_p2, %p48_p1 }
   0x7   : > { %s37_s18 = ssub.s32 %s1165_s15, %s1333_s17  ;;  %162 = sbr.rel (%p901_p5) target bundleno = 27 (0x1b), region = 20 }
   0x8   : > { %p39_p4 = scmp.eq.s32.totalorder %s37_s18, 0 }
   0xa   : > { %s1227_s20 = scalar_select %p39_p4, %s1157_s13, %s41_s19  }
   0xc   : > { %165 = sbr.rel (!%p50_p3) target bundleno = 27 (0x1b), region = 24  ;;  %s167_s21 = sand.u32 (%p50_p3), 1, %s1157_s13  }
   0xd   : > { %s903_s22 = sshll.u32 (%p50_p3), %s1165_s15, 2  ;;  %s902_s23 = sshll.u32 (%p50_p3), %s167_s21, 6 }
   0xe   : > { %s1235_s26 = scalar_lea.vmem (%p50_p3), %s1324_s0, %s903_s22  ;;  %s169_s27 = scalar_lea.vmem (%p50_p3), [#allocation3], %s902_s23 }
   0xf   : > { %v191_v0 = vld [vmem:[%s1235_s26] sm:$0xf] (%p50_p3)  ;;  %v193_v1 = vld [vmem:[%s1235_s26 + $0x10] sm:$0xf] (%p50_p3) }
  0x10   : > { %192 = vst [vmem:[%s169_s27] sm:$0xf] (%p50_p3), %v191_v0  ;;  %194 = vst [vmem:[%s169_s27 + $0x4] sm:$0xf] (%p50_p3), %v193_v1  ;;  %v195_v2 = vld [vmem:[%s1235_s26 + $0x20] sm:$0xf] (%p50_p3) }
  0x11   : > { %v197_v3 = vld [vmem:[%s1235_s26 + $0x30] sm:$0xf]  ;;  %v199_v4 = vld [vmem:[%s1235_s26 + $0x40] sm:$0xf]  ;;  %196 = vst [vmem:[%s169_s27 + $0x8] sm:$0xf] %v195_v2 }
  0x12   : > { %198 = vst [vmem:[%s169_s27 + $0xc] sm:$0xf] %v197_v3  ;;  %200 = vst [vmem:[%s169_s27 + $0x10] sm:$0xf] %v199_v4  ;;  %v201_v5 = vld [vmem:[%s1235_s26 + $0x50] sm:$0xf] }
  0x13   : > { %v203_v6 = vld [vmem:[%s1235_s26 + $0x60] sm:$0xf]  ;;  %v205_v7 = vld [vmem:[%s1235_s26 + $0x70] sm:$0xf]  ;;  %202 = vst [vmem:[%s169_s27 + $0x14] sm:$0xf] %v201_v5 }
  0x14   : > { %204 = vst [vmem:[%s169_s27 + $0x18] sm:$0xf] %v203_v6  ;;  %206 = vst [vmem:[%s169_s27 + $0x1c] sm:$0xf] %v205_v7  ;;  %v207_v8 = vld [vmem:[%s1235_s26 + $0x80] sm:$0xf] }
  0x15   : > { %v209_v9 = vld [vmem:[%s1235_s26 + $0x90] sm:$0xf]  ;;  %v211_v10 = vld [vmem:[%s1235_s26 + $0xa0] sm:$0xf]  ;;  %208 = vst [vmem:[%s169_s27 + $0x20] sm:$0xf] %v207_v8 }
  0x16   : > { %210 = vst [vmem:[%s169_s27 + $0x24] sm:$0xf] %v209_v9  ;;  %212 = vst [vmem:[%s169_s27 + $0x28] sm:$0xf] %v211_v10  ;;  %v213_v11 = vld [vmem:[%s1235_s26 + $0xb0] sm:$0xf] }
  0x17   : > { %v215_v12 = vld [vmem:[%s1235_s26 + $0xc0] sm:$0xf]  ;;  %v217_v13 = vld [vmem:[%s1235_s26 + $0xd0] sm:$0xf]  ;;  %214 = vst [vmem:[%s169_s27 + $0x2c] sm:$0xf] %v213_v11 }
  0x18   : > { %216 = vst [vmem:[%s169_s27 + $0x30] sm:$0xf] %v215_v12  ;;  %218 = vst [vmem:[%s169_s27 + $0x34] sm:$0xf] %v217_v13  ;;  %v219_v14 = vld [vmem:[%s1235_s26 + $0xe0] sm:$0xf] }
  0x19   : > { %v221_v15 = vld [vmem:[%s1235_s26 + $0xf0] sm:$0xf]  ;;  %220 = vst [vmem:[%s169_s27 + $0x38] sm:$0xf] %v219_v14 }
  0x1a   : > { %222 = vst [vmem:[%s169_s27 + $0x3c] sm:$0xf] %v221_v15 }
  0x1b PF: > { %p904_p6 = scmp.ge.s32.totalorder %s1169_s16, 1  ;;  %p289_p7 = scmp.lt.s32.totalorder %s1169_s16, 5 }
  0x1d   : > { %p290_p8 = pnand %p904_p6, %p289_p7 }
  0x1e   : > { %s296_s28 = sand.u32 (!%p290_p8), 1, %s1153_s12   ;;  %s906_s29 = sshll.u32 (!%p290_p8), %s1161_s14, 4 }
  0x1f   : > { %293 = sbr.rel (%p290_p8) target bundleno = 309 (0x135), region = 69  ;;  %s905_s30 = sshll.u32 (!%p290_p8), %s296_s28, 6 }
  0x20   : > { %p335_p9 = scmp.lt.s32.totalorder (!%p290_p8), %s906_s29, 63  ;;  %s1262_s8 = scalar_lea.vmem (!%p290_p8), [#allocation3], %s905_s30 }
  0x21   : > { %p908_p10 = scmp.ne.s32.totalorder (!%p290_p8), %s1161_s14, 0 }
  0x24   : > { %s1335_s29 = smov (!%p335_p9, %s906_s29), 63  ;;  %359 = sbr.rel (%p908_p10) target bundleno = 50 (0x32), region = 77 }
  0x25   : > { %s907_s4 = sshll.u32 %s1335_s29, 2 }
  0x26   : > { %s1260_s7 = scalar_lea.vmem %s1325_s1, %s907_s4 }
  0x29   : > { %v1171_v16 = vmov 0.0  }
  0x2a   : > { %360 = vst [vmem:[#allocation2 + $0x30] sm:$0xff] %v1171_v16  ;;  %361 = vst [vmem:[#allocation2] sm:$0xff] %v1171_v16 }
  0x2b   : > { %362 = vst [vmem:[#allocation2 + $0x58] sm:$0xff] %v1171_v16  ;;  %363 = vst [vmem:[#allocation2 + $0x18] sm:$0xff] %v1171_v16 }
  0x2c   : > { %364 = vst [vmem:[#allocation2 + $0x50] sm:$0xff] %v1171_v16  ;;  %365 = vst [vmem:[#allocation2 + $0x68] sm:$0xff] %v1171_v16 }
  0x2d   : > { %366 = vst [vmem:[#allocation2 + $0x8] sm:$0xff] %v1171_v16  ;;  %367 = vst [vmem:[#allocation2 + $0x48] sm:$0xff] %v1171_v16 }
  0x2e   : > { %368 = vst [vmem:[#allocation2 + $0x40] sm:$0xff] %v1171_v16  ;;  %369 = vst [vmem:[#allocation2 + $0x20] sm:$0xff] %v1171_v16 }
  0x2f   : > { %370 = vst [vmem:[#allocation2 + $0x10] sm:$0xff] %v1171_v16  ;;  %371 = vst [vmem:[#allocation2 + $0x38] sm:$0xff] %v1171_v16 }
  0x30   : > { %372 = vst [vmem:[#allocation2 + $0x60] sm:$0xff] %v1171_v16  ;;  %373 = vst [vmem:[#allocation2 + $0x70] sm:$0xff] %v1171_v16 }
  0x31   : > { %374 = vst [vmem:[#allocation2 + $0x78] sm:$0xff] %v1171_v16  ;;  %375 = vst [vmem:[#allocation2 + $0x28] sm:$0xff] %v1171_v16 }
  0x32 PF: > { %v1115_v17 = vld [vmem:[%s1260_s7 + $0x38] sm:$0xff]   ;;  %v1116_v18 = vld [vmem:[%s1260_s7 + $0x30] sm:$0xff]   ;;  %v1117_v19 = vld [vmem:[%s1260_s7 + $0x28] sm:$0xff]   ;;  %p925_p11 = scmp.ne.s32.totalorder %s1161_s14, 3 }
  0x33   : > { %1026 = vmatprep.subr.bf16.mxu0 %v1115_v17  ;;  %1058 = vmatprep.subr.bf16.mxu1 %v1115_v17  ;;  %v1118_v20 = vld [vmem:[%s1260_s7 + $0x20] sm:$0xff]   ;;  %v1119_v23 = vld [vmem:[%s1260_s7 + $0x18] sm:$0xff]   ;;  %v1120_v24 = vld [vmem:[%s1260_s7 + $0x10] sm:$0xff]  }
  0x34   : > { %1027 = vmatpush3.bf16.msra.mxu0 %v1115_v17  ;;  %1066 = vmatpush3.bf16.msra.mxu1 %v1115_v17  ;;  %v1123_v21 = vld [vmem:[%s1262_s8] sm:$0xff]   ;;  %v1121_v25 = vld [vmem:[%s1260_s7 + $0x8] sm:$0xff]   ;;  %v1127_v29 = vld [vmem:[%s1262_s8 + $0x10] sm:$0xff]  }
  0x35   : > { %1028 = vmatprep.subr.bf16.mxu0 %v1116_v18  ;;  %1059 = vmatprep.subr.bf16.mxu1 %v1116_v18  ;;  %v1124_v22 = vld [vmem:[%s1262_s8 + $0x20] sm:$0xff]   ;;  %v1125_v27 = vld [vmem:[%s1262_s8 + $0x8] sm:$0xff]   ;;  %v1128_v30 = vld [vmem:[%s1262_s8 + $0x30] sm:$0xff]  }
  0x36   : > { %1042 = vmatprep.mubr.bf16.mxu0 %v1123_v21  ;;  %1050 = vmatprep.mubr.bf16.mxu1 %v1124_v22  ;;  %v1122_v26 = vld [vmem:[%s1260_s7] sm:$0xff]   ;;  %v1126_v28 = vld [vmem:[%s1262_s8 + $0x28] sm:$0xff]   ;;  %v1129_v31 = vld [vmem:[%s1262_s8 + $0x18] sm:$0xff]  }
  0x37   : > { %v1130_v32 = vld [vmem:[%s1262_s8 + $0x38] sm:$0xff]   ;;  %v386_v34 = vld [vmem:[#allocation2 + $0x10] sm:$0xff]  ;;  %v384_v38 = vld [vmem:[#allocation2 + $0x40] sm:$0xff] }
  0x38   : > { %1029 = vmatpush3.bf16.msra.mxu0 %v1116_v18  ;;  %1067 = vmatpush3.bf16.msra.mxu1 %v1116_v18  ;;  %v378_v33 = vld [vmem:[#allocation2 + $0x58] sm:$0xff]  ;;  %v376_v37 = vld [vmem:[#allocation2 + $0x30] sm:$0xff]  ;;  %v377_v49 = vld [vmem:[#allocation2] sm:$0xff] }
  0x39   : > { %1030 = vmatprep.subr.bf16.mxu0 %v1117_v19  ;;  %1060 = vmatprep.subr.bf16.mxu1 %v1117_v19  ;;  %v379_v43 = vld [vmem:[#allocation2 + $0x18] sm:$0xff]  ;;  %v385_v50 = vld [vmem:[#allocation2 + $0x20] sm:$0xff]  ;;  %v382_v55 = vld [vmem:[#allocation2 + $0x8] sm:$0xff] }
  0x3a   : > { %v387_v44 = vld [vmem:[#allocation2 + $0x38] sm:$0xff]  ;;  %v380_v61 = vld [vmem:[#allocation2 + $0x50] sm:$0xff]  ;;  %v388_v62 = vld [vmem:[#allocation2 + $0x60] sm:$0xff] }
  0x3b   : > { %v390_v56 = vld [vmem:[#allocation2 + $0x78] sm:$0xff]  ;;  %v383_v3 = vld [vmem:[#allocation2 + $0x48] sm:$0xff]  ;;  %v389_v10 = vld [vmem:[#allocation2 + $0x70] sm:$0xff] }
  0x3c   : > { %1031 = vmatpush3.bf16.msra.mxu0 %v1117_v19  ;;  %1068 = vmatpush3.bf16.msra.mxu1 %v1117_v19  ;;  %v391_v4 = vld [vmem:[#allocation2 + $0x28] sm:$0xff] }
  0x3d   : > { %1032 = vmatprep.subr.bf16.mxu0 %v1118_v20  ;;  %1061 = vmatprep.subr.bf16.mxu1 %v1118_v20  ;;  %v381_v9 = vld [vmem:[#allocation2 + $0x68] sm:$0xff] }
  0x40   : > { %1033 = vmatpush3.bf16.msra.mxu0 %v1118_v20  ;;  %1069 = vmatpush3.bf16.msra.mxu1 %v1118_v20 }
  0x41   : > { %1034 = vmatprep.subr.bf16.mxu0 %v1119_v23  ;;  %1062 = vmatprep.subr.bf16.mxu1 %v1119_v23 }
  0x44   : > { %1035 = vmatpush3.bf16.msra.mxu0 %v1119_v23  ;;  %1070 = vmatpush3.bf16.msra.mxu1 %v1119_v23 }
  0x45   : > { %1036 = vmatprep.subr.bf16.mxu0 %v1120_v24  ;;  %1063 = vmatprep.subr.bf16.mxu1 %v1120_v24 }
  0x48   : > { %1037 = vmatpush3.bf16.msra.mxu0 %v1120_v24  ;;  %1071 = vmatpush3.bf16.msra.mxu1 %v1120_v24 }
  0x49   : > { %1038 = vmatprep.subr.bf16.mxu0 %v1121_v25  ;;  %1064 = vmatprep.subr.bf16.mxu1 %v1121_v25 }
  0x4c   : > { %1039 = vmatpush3.bf16.msra.mxu0 %v1121_v25  ;;  %1072 = vmatpush3.bf16.msra.mxu1 %v1121_v25 }
  0x4d   : > { %1040 = vmatprep.subr.bf16.mxu0 %v1122_v26  ;;  %1065 = vmatprep.subr.bf16.mxu1 %v1122_v26 }
  0x50   : > { %1041 = vmatpush3.bf16.msra.mxu0 %v1122_v26  ;;  %1073 = vmatpush3.bf16.msra.mxu1 %v1122_v26 }
  0x53   : > { %1043 = vmatmul.mubr.bf16.vlgmr.msra.gmra.mxu0 %v1125_v27  ;;  %1051 = vmatmul.mubr.bf16.vlgmr.msra.gmra.mxu1 %v1126_v28 }
  0x54   : > { %1046 = vmatprep.mubr.bf16.mxu0 %v1127_v29  ;;  %1054 = vmatprep.mubr.bf16.mxu1 %v1128_v30 }
  0x5b   : > { %1047 = vmatmul.mubr.bf16.gmra.mxu0 %v1129_v31  ;;  %1055 = vmatmul.mubr.bf16.gmra.mxu1 %v1130_v32 }
 0x113   : > { %v1044_v35 = vpop.f32.mrf.mxu0  ;;  %v1052_v36 = vpop.f32.mrf.mxu1 }
 0x114   : > { %v619_v39 = vadd.f32 %v1044_v35, %v378_v33  ;;  %v627_v40 = vadd.f32 %v1052_v36, %v386_v34 }
 0x115   : > { %v554_v41 = vpop.f32.mrf.mxu0  ;;  %v586_v42 = vpop.f32.mrf.mxu1 }
 0x116   : > { %635 = vst [vmem:[#allocation2 + $0x58] sm:$0xff] %v619_v39  ;;  %643 = vst [vmem:[#allocation2 + $0x10] sm:$0xff] %v627_v40  ;;  %v617_v45 = vadd.f32 %v554_v41, %v376_v37  ;;  %v625_v46 = vadd.f32 %v586_v42, %v384_v38 }
 0x117   : > { %v1045_v47 = vpop.f32.mrf.mxu0  ;;  %v1053_v48 = vpop.f32.mrf.mxu1 }
 0x118   : > { %633 = vst [vmem:[#allocation2 + $0x30] sm:$0xff] %v617_v45  ;;  %641 = vst [vmem:[#allocation2 + $0x40] sm:$0xff] %v625_v46  ;;  %v620_v51 = vadd.f32 %v1045_v47, %v379_v43  ;;  %v628_v52 = vadd.f32 %v1053_v48, %v387_v44 }
 0x119   : > { %v557_v53 = vpop.f32.mrf.mxu0  ;;  %v589_v54 = vpop.f32.mrf.mxu1 }
 0x11a   : > { %636 = vst [vmem:[#allocation2 + $0x18] sm:$0xff] %v620_v51  ;;  %644 = vst [vmem:[#allocation2 + $0x38] sm:$0xff] %v628_v52  ;;  %v618_v57 = vadd.f32 %v557_v53, %v377_v49  ;;  %v626_v58 = vadd.f32 %v589_v54, %v385_v50 }
 0x11b   : > { %v1048_v59 = vpop.f32.mrf.mxu0  ;;  %v1056_v60 = vpop.f32.mrf.mxu1 }
 0x11c   : > { %634 = vst [vmem:[#allocation2] sm:$0xff] %v618_v57  ;;  %642 = vst [vmem:[#allocation2 + $0x20] sm:$0xff] %v626_v58  ;;  %v623_v63 = vadd.f32 %v1048_v59, %v382_v55  ;;  %v631_v0 = vadd.f32 %v1056_v60, %v390_v56 }
 0x11d   : > { %v570_v1 = vpop.f32.mrf.mxu0  ;;  %v602_v2 = vpop.f32.mrf.mxu1 }
 0x11e   : > { %639 = vst [vmem:[#allocation2 + $0x8] sm:$0xff] %v623_v63  ;;  %647 = vst [vmem:[#allocation2 + $0x78] sm:$0xff] %v631_v0  ;;  %v621_v5 = vadd.f32 %v570_v1, %v380_v61  ;;  %v629_v6 = vadd.f32 %v602_v2, %v388_v62 }
 0x11f   : > { %v1049_v7 = vpop.f32.mrf.mxu0  ;;  %v1057_v8 = vpop.f32.mrf.mxu1 }
 0x120   : > { %637 = vst [vmem:[#allocation2 + $0x50] sm:$0xff] %v621_v5  ;;  %645 = vst [vmem:[#allocation2 + $0x60] sm:$0xff] %v629_v6  ;;  %v624_v11 = vadd.f32 %v1049_v7, %v383_v3  ;;  %v632_v12 = vadd.f32 %v1057_v8, %v391_v4  ;;  %652 = sbr.rel (%p925_p11) target bundleno = 309 (0x135), region = 81 }
 0x121   : > { %v573_v13 = vpop.f32.mrf.mxu0  ;;  %v605_v14 = vpop.f32.mrf.mxu1 }
 0x122   : > { %640 = vst [vmem:[#allocation2 + $0x48] sm:$0xff] %v624_v11  ;;  %648 = vst [vmem:[#allocation2 + $0x28] sm:$0xff] %v632_v12  ;;  %v622_v15 = vadd.f32 %v573_v13, %v381_v9  ;;  %v630_v16 = vadd.f32 %v605_v14, %v389_v10 }
 0x124   : > { %638 = vst [vmem:[#allocation2 + $0x68] sm:$0xff] %v622_v15  ;;  %646 = vst [vmem:[#allocation2 + $0x70] sm:$0xff] %v630_v16 }
 0x125   : > { %v653_v17 = vld [vmem:[#allocation2 + $0x30] sm:$0xff]  ;;  %v654_v18 = vld [vmem:[#allocation2] sm:$0xff]  ;;  %v655_v22 = vld [vmem:[#allocation2 + $0x58] sm:$0xff] }
 0x126   : > { %v926_v19 = vld [vmem:[%s1326_s2] ss:$0 sm:$0xff]  ;;  %v656_v23 = vld [vmem:[#allocation2 + $0x18] sm:$0xff]  ;;  %v659_v29 = vld [vmem:[#allocation2 + $0x8] sm:$0xff] }
 0x127   : > { %v676_v20 = vadd.f32 %v926_v19, %v653_v17  ;;  %v677_v21 = vadd.f32 %v926_v19, %v654_v18  ;;  %v657_v24 = vld [vmem:[#allocation2 + $0x50] sm:$0xff]  ;;  %v678_v25 = vadd.f32 %v926_v19, %v655_v22  ;;  %v679_v26 = vadd.f32 %v926_v19, %v656_v23  ;;  %v661_v35 = vld [vmem:[#allocation2 + $0x40] sm:$0xff]  ;;  %v664_v42 = vld [vmem:[#allocation2 + $0x38] sm:$0xff] }
 0x128   : > { %v680_v28 = vadd.f32 %v926_v19, %v657_v24  ;;  %v682_v34 = vadd.f32 %v926_v19, %v659_v29  ;;  %v662_v36 = vld [vmem:[#allocation2 + $0x20] sm:$0xff]  ;;  %v663_v37 = vld [vmem:[#allocation2 + $0x10] sm:$0xff]  ;;  %v684_v47 = vadd.f32 %v926_v19, %v661_v35  ;;  %v667_v53 = vld [vmem:[#allocation2 + $0x78] sm:$0xff]  ;;  %v687_v57 = vadd.f32 %v926_v19, %v664_v42 }
 0x129   : > { %v660_v30 = vld [vmem:[#allocation2 + $0x48] sm:$0xff]  ;;  %v692_v31 = vmax.f32 %v676_v20, 0.0  ;;  %v693_v32 = vmax.f32 %v677_v21, 0.0  ;;  %v694_v38 = vmax.f32 %v678_v25, 0.0  ;;  %v695_v39 = vmax.f32 %v679_v26, 0.0  ;;  %v665_v43 = vld [vmem:[#allocation2 + $0x60] sm:$0xff] }
 0x12a   : > { %v696_v40 = vmax.f32 %v680_v28, 0.0  ;;  %v683_v41 = vadd.f32 %v926_v19, %v660_v30  ;;  %v698_v46 = vmax.f32 %v682_v34, 0.0  ;;  %v685_v51 = vadd.f32 %v926_v19, %v662_v36  ;;  %v668_v54 = vld [vmem:[#allocation2 + $0x28] sm:$0xff] }
 0x12b   : > { %v658_v27 = vld [vmem:[#allocation2 + $0x68] sm:$0xff]  ;;  %v966_v44 = vpack.c.bf16 %v693_v32, %v692_v31  ;;  %v666_v48 = vld [vmem:[#allocation2 + $0x70] sm:$0xff]  ;;  %v971_v49 = vpack.c.bf16 %v695_v39, %v694_v38  ;;  %v686_v52 = vadd.f32 %v926_v19, %v663_v37  ;;  %v700_v56 = vmax.f32 %v684_v47, 0.0 }
 0x12c   : > { %v681_v33 = vadd.f32 %v926_v19, %v658_v27  ;;  %v699_v50 = vmax.f32 %v683_v41, 0.0  ;;  %v688_v58 = vadd.f32 %v926_v19, %v665_v43  ;;  %v701_v60 = vmax.f32 %v685_v51, 0.0 }
 0x12d   : > { %967 = vst [vmem:[%s1327_s3] sm:$0xff] %v966_v44   ;;  %1003 = vst [vmem:[%s1327_s3 + $0x8] sm:$0xff] %v971_v49   ;;  %v702_v61 = vmax.f32 %v686_v52, 0.0  ;;  %v689_v62 = vadd.f32 %v926_v19, %v666_v48  ;;  %v703_v63 = vmax.f32 %v687_v57, 0.0  ;;  %v690_v1 = vadd.f32 %v926_v19, %v667_v53 }
 0x12e   : > { %v697_v45 = vmax.f32 %v681_v33, 0.0  ;;  %v981_v59 = vpack.c.bf16 %v699_v50, %v698_v46  ;;  %v704_v0 = vmax.f32 %v688_v58, 0.0  ;;  %v691_v2 = vadd.f32 %v926_v19, %v668_v54 }
 0x12f   : > { %v986_v3 = vpack.c.bf16 %v701_v60, %v700_v56  ;;  %v705_v4 = vmax.f32 %v689_v62, 0.0  ;;  %v991_v5 = vpack.c.bf16 %v703_v63, %v702_v61  ;;  %v706_v6 = vmax.f32 %v690_v1, 0.0 }
 0x130   : > { %v976_v55 = vpack.c.bf16 %v697_v45, %v696_v40  ;;  %1005 = vst [vmem:[%s1327_s3 + $0x18] sm:$0xff] %v981_v59   ;;  %v707_v7 = vmax.f32 %v691_v2, 0.0 }
 0x131   : > { %1006 = vst [vmem:[%s1327_s3 + $0x20] sm:$0xff] %v986_v3   ;;  %v996_v8 = vpack.c.bf16 %v705_v4, %v704_v0  ;;  %1007 = vst [vmem:[%s1327_s3 + $0x28] sm:$0xff] %v991_v5  }
 0x132   : > { %1004 = vst [vmem:[%s1327_s3 + $0x10] sm:$0xff] %v976_v55   ;;  %v1001_v9 = vpack.c.bf16 %v707_v7, %v706_v6 }
 0x133   : > { %1008 = vst [vmem:[%s1327_s3 + $0x30] sm:$0xff] %v996_v8  }
 0x134   : > { %1009 = vst [vmem:[%s1327_s3 + $0x38] sm:$0xff] %v1001_v9  }
 0x135 PF: > { %s13_s16 = sadd.s32 1, %s1169_s16   ;;  %s1328_s12 = smov %s1157_s13 }
 0x136   : > { %p10_p12 = scmp.ge.s32.totalorder %s13_s16, 6   ;;  %s1329_s13 = smov %s1227_s20 }
 0x137   : > { %s1330_s14 = smov %s1165_s15  ;;  %s1331_s15 = smov %s1333_s17 }
 0x138   :  { %12 = sbr.rel (!%p10_p12) target bundleno = 3 (0x3), region = 122 }

// kernel: _lambda_.27
= control target key start
LH: loop header
LB: loop body
LE: loop exit
PB: predicated region body
PF: predicated region fallthrough
CT: control target
= control target key end

     0   :  { %s586_s1 = inlined_call_operand.vmem [shape: bf16[128,128], index: 1, kind: input, shape index: {}]   ;;  %s587_s0 = inlined_call_operand.vmem [shape: bf16[128,128], index: 0, kind: input, shape index: {}]   ;;  %s588_s2 = inlined_call_operand.vmem [shape: f32[1,128], index: 2, kind: input, shape index: {}]   ;;  %s589_s3 = inlined_call_operand.vmem [shape: f32[128,128], index: 3, kind: output, shape index: {}]  }
   0x1   :  { %v451_v0 = vld [vmem:[%s586_s1 + $0x38] sm:$0xff]   ;;  %v452_v1 = vld [vmem:[%s586_s1 + $0x30] sm:$0xff]   ;;  %v453_v2 = vld [vmem:[%s586_s1 + $0x28] sm:$0xff]  }
   0x2   :  { %403 = vmatprep.subr.bf16.mxu0 %v451_v0  ;;  %435 = vmatprep.subr.bf16.mxu1 %v451_v0  ;;  %v454_v3 = vld [vmem:[%s586_s1 + $0x20] sm:$0xff]   ;;  %v455_v6 = vld [vmem:[%s586_s1 + $0x18] sm:$0xff]   ;;  %v456_v7 = vld [vmem:[%s586_s1 + $0x10] sm:$0xff]  }
   0x3   :  { %404 = vmatpush3.bf16.msra.mxu0 %v451_v0  ;;  %443 = vmatpush3.bf16.msra.mxu1 %v451_v0  ;;  %v459_v4 = vld [vmem:[%s587_s0] sm:$0xff]   ;;  %v457_v8 = vld [vmem:[%s586_s1 + $0x8] sm:$0xff]   ;;  %v463_v12 = vld [vmem:[%s587_s0 + $0x10] sm:$0xff]  }
   0x4   :  { %405 = vmatprep.subr.bf16.mxu0 %v452_v1  ;;  %436 = vmatprep.subr.bf16.mxu1 %v452_v1  ;;  %v460_v5 = vld [vmem:[%s587_s0 + $0x20] sm:$0xff]   ;;  %v461_v10 = vld [vmem:[%s587_s0 + $0x8] sm:$0xff]   ;;  %v464_v13 = vld [vmem:[%s587_s0 + $0x30] sm:$0xff]  }
   0x5   :  { %419 = vmatprep.mubr.bf16.mxu0 %v459_v4  ;;  %427 = vmatprep.mubr.bf16.mxu1 %v460_v5  ;;  %v458_v9 = vld [vmem:[%s586_s1] sm:$0xff]   ;;  %v462_v11 = vld [vmem:[%s587_s0 + $0x28] sm:$0xff]   ;;  %v465_v14 = vld [vmem:[%s587_s0 + $0x18] sm:$0xff]  }
   0x6   :  { %v466_v15 = vld [vmem:[%s587_s0 + $0x38] sm:$0xff]   ;;  %v386_v16 = vld [vmem:[%s588_s2] ss:$0 sm:$0xff] }
   0x7   :  { %406 = vmatpush3.bf16.msra.mxu0 %v452_v1  ;;  %444 = vmatpush3.bf16.msra.mxu1 %v452_v1 }
   0x8   :  { %407 = vmatprep.subr.bf16.mxu0 %v453_v2  ;;  %437 = vmatprep.subr.bf16.mxu1 %v453_v2 }
   0xb   :  { %408 = vmatpush3.bf16.msra.mxu0 %v453_v2  ;;  %445 = vmatpush3.bf16.msra.mxu1 %v453_v2 }
   0xc   :  { %409 = vmatprep.subr.bf16.mxu0 %v454_v3  ;;  %438 = vmatprep.subr.bf16.mxu1 %v454_v3 }
   0xf   :  { %410 = vmatpush3.bf16.msra.mxu0 %v454_v3  ;;  %446 = vmatpush3.bf16.msra.mxu1 %v454_v3 }
  0x10   :  { %411 = vmatprep.subr.bf16.mxu0 %v455_v6  ;;  %439 = vmatprep.subr.bf16.mxu1 %v455_v6 }
  0x13   :  { %412 = vmatpush3.bf16.msra.mxu0 %v455_v6  ;;  %447 = vmatpush3.bf16.msra.mxu1 %v455_v6 }
  0x14   :  { %413 = vmatprep.subr.bf16.mxu0 %v456_v7  ;;  %440 = vmatprep.subr.bf16.mxu1 %v456_v7 }
  0x17   :  { %414 = vmatpush3.bf16.msra.mxu0 %v456_v7  ;;  %448 = vmatpush3.bf16.msra.mxu1 %v456_v7 }
  0x18   :  { %415 = vmatprep.subr.bf16.mxu0 %v457_v8  ;;  %441 = vmatprep.subr.bf16.mxu1 %v457_v8 }
  0x1b   :  { %416 = vmatpush3.bf16.msra.mxu0 %v457_v8  ;;  %449 = vmatpush3.bf16.msra.mxu1 %v457_v8 }
  0x1c   :  { %417 = vmatprep.subr.bf16.mxu0 %v458_v9  ;;  %442 = vmatprep.subr.bf16.mxu1 %v458_v9 }
  0x1f   :  { %418 = vmatpush3.bf16.msra.mxu0 %v458_v9  ;;  %450 = vmatpush3.bf16.msra.mxu1 %v458_v9 }
  0x22   :  { %420 = vmatmul.mubr.bf16.vlgmr.msra.gmra.mxu0 %v461_v10  ;;  %428 = vmatmul.mubr.bf16.vlgmr.msra.gmra.mxu1 %v462_v11 }
  0x23   :  { %423 = vmatprep.mubr.bf16.mxu0 %v463_v12  ;;  %431 = vmatprep.mubr.bf16.mxu1 %v464_v13 }
  0x2a   :  { %424 = vmatmul.mubr.bf16.gmra.mxu0 %v465_v14  ;;  %432 = vmatmul.mubr.bf16.gmra.mxu1 %v466_v15 }
  0xe2   :  { %v421_v17 = vpop.f32.mrf.mxu0  ;;  %v429_v18 = vpop.f32.mrf.mxu1 }
  0xe3   :  { %v336_v19 = vadd.f32 %v421_v17, %v386_v16  ;;  %v344_v20 = vadd.f32 %v429_v18, %v386_v16 }
  0xe4   :  { %v213_v21 = vpop.f32.mrf.mxu0  ;;  %v245_v22 = vpop.f32.mrf.mxu1 }
  0xe5   :  { %352 = vst [vmem:[%s589_s3 + $0x10] sm:$0xff] %v336_v19  ;;  %360 = vst [vmem:[%s589_s3 + $0x50] sm:$0xff] %v344_v20  ;;  %v334_v23 = vadd.f32 %v386_v16, %v213_v21  ;;  %v342_v24 = vadd.f32 %v386_v16, %v245_v22 }
  0xe6   :  { %v422_v25 = vpop.f32.mrf.mxu0  ;;  %v430_v26 = vpop.f32.mrf.mxu1 }
  0xe7   :  { %350 = vst [vmem:[%s589_s3] sm:$0xff] %v334_v23  ;;  %358 = vst [vmem:[%s589_s3 + $0x40] sm:$0xff] %v342_v24  ;;  %v337_v27 = vadd.f32 %v422_v25, %v386_v16  ;;  %v345_v28 = vadd.f32 %v430_v26, %v386_v16 }
  0xe8   :  { %v216_v29 = vpop.f32.mrf.mxu0  ;;  %v248_v30 = vpop.f32.mrf.mxu1 }
  0xe9   :  { %353 = vst [vmem:[%s589_s3 + $0x18] sm:$0xff] %v337_v27  ;;  %361 = vst [vmem:[%s589_s3 + $0x58] sm:$0xff] %v345_v28  ;;  %v335_v31 = vadd.f32 %v386_v16, %v216_v29  ;;  %v343_v32 = vadd.f32 %v386_v16, %v248_v30 }
  0xea   :  { %v425_v33 = vpop.f32.mrf.mxu0  ;;  %v433_v34 = vpop.f32.mrf.mxu1 }
  0xeb   :  { %351 = vst [vmem:[%s589_s3 + $0x8] sm:$0xff] %v335_v31  ;;  %359 = vst [vmem:[%s589_s3 + $0x48] sm:$0xff] %v343_v32  ;;  %v340_v35 = vadd.f32 %v425_v33, %v386_v16  ;;  %v348_v36 = vadd.f32 %v433_v34, %v386_v16 }
  0xec   :  { %v229_v37 = vpop.f32.mrf.mxu0  ;;  %v261_v38 = vpop.f32.mrf.mxu1 }
  0xed   :  { %356 = vst [vmem:[%s589_s3 + $0x30] sm:$0xff] %v340_v35  ;;  %364 = vst [vmem:[%s589_s3 + $0x70] sm:$0xff] %v348_v36  ;;  %v338_v39 = vadd.f32 %v386_v16, %v229_v37  ;;  %v346_v40 = vadd.f32 %v386_v16, %v261_v38 }
  0xee   :  { %v426_v41 = vpop.f32.mrf.mxu0  ;;  %v434_v42 = vpop.f32.mrf.mxu1 }
  0xef   :  { %354 = vst [vmem:[%s589_s3 + $0x20] sm:$0xff] %v338_v39  ;;  %362 = vst [vmem:[%s589_s3 + $0x60] sm:$0xff] %v346_v40  ;;  %v341_v43 = vadd.f32 %v426_v41, %v386_v16  ;;  %v349_v44 = vadd.f32 %v434_v42, %v386_v16 }
  0xf0   :  { %v232_v45 = vpop.f32.mrf.mxu0  ;;  %v264_v46 = vpop.f32.mrf.mxu1 }
  0xf1   :  { %357 = vst [vmem:[%s589_s3 + $0x38] sm:$0xff] %v341_v43  ;;  %365 = vst [vmem:[%s589_s3 + $0x78] sm:$0xff] %v349_v44  ;;  %v339_v47 = vadd.f32 %v386_v16, %v232_v45  ;;  %v347_v48 = vadd.f32 %v386_v16, %v264_v46 }
  0xf3   :  { %355 = vst [vmem:[%s589_s3 + $0x28] sm:$0xff] %v339_v47  ;;  %363 = vst [vmem:[%s589_s3 + $0x68] sm:$0xff] %v347_v48 }

// kernel: _lambda_.18
= control target key start
LH: loop header
LB: loop body
LE: loop exit
PB: predicated region body
PF: predicated region fallthrough
CT: control target
= control target key end

     0   :  { %s721_s1 = inlined_call_operand.vmem [shape: bf16[128,128], index: 1, kind: input, shape index: {}]   ;;  %s722_s0 = inlined_call_operand.vmem [shape: bf16[128,128], index: 0, kind: input, shape index: {}]   ;;  %s723_s2 = inlined_call_operand.vmem [shape: f32[1,128], index: 2, kind: input, shape index: {}]   ;;  %s724_s3 = inlined_call_operand.vmem [shape: bf16[128,128], index: 3, kind: output, shape index: {}]  }
   0x1   :  { %v610_v0 = vld [vmem:[%s721_s1 + $0x38] sm:$0xff]   ;;  %v611_v1 = vld [vmem:[%s721_s1 + $0x30] sm:$0xff]   ;;  %v612_v2 = vld [vmem:[%s721_s1 + $0x28] sm:$0xff]  }
   0x2   :  { %562 = vmatprep.subr.bf16.mxu0 %v610_v0  ;;  %594 = vmatprep.subr.bf16.mxu1 %v610_v0  ;;  %v613_v3 = vld [vmem:[%s721_s1 + $0x20] sm:$0xff]   ;;  %v614_v6 = vld [vmem:[%s721_s1 + $0x18] sm:$0xff]   ;;  %v615_v7 = vld [vmem:[%s721_s1 + $0x10] sm:$0xff]  }
   0x3   :  { %563 = vmatpush3.bf16.msra.mxu0 %v610_v0  ;;  %602 = vmatpush3.bf16.msra.mxu1 %v610_v0  ;;  %v618_v4 = vld [vmem:[%s722_s0] sm:$0xff]   ;;  %v616_v8 = vld [vmem:[%s721_s1 + $0x8] sm:$0xff]   ;;  %v622_v12 = vld [vmem:[%s722_s0 + $0x10] sm:$0xff]  }
   0x4   :  { %564 = vmatprep.subr.bf16.mxu0 %v611_v1  ;;  %595 = vmatprep.subr.bf16.mxu1 %v611_v1  ;;  %v619_v5 = vld [vmem:[%s722_s0 + $0x20] sm:$0xff]   ;;  %v620_v10 = vld [vmem:[%s722_s0 + $0x8] sm:$0xff]   ;;  %v623_v13 = vld [vmem:[%s722_s0 + $0x30] sm:$0xff]  }
   0x5   :  { %578 = vmatprep.mubr.bf16.mxu0 %v618_v4  ;;  %586 = vmatprep.mubr.bf16.mxu1 %v619_v5  ;;  %v617_v9 = vld [vmem:[%s721_s1] sm:$0xff]   ;;  %v621_v11 = vld [vmem:[%s722_s0 + $0x28] sm:$0xff]   ;;  %v624_v14 = vld [vmem:[%s722_s0 + $0x18] sm:$0xff]  }
   0x6   :  { %v625_v15 = vld [vmem:[%s722_s0 + $0x38] sm:$0xff]   ;;  %v466_v16 = vld [vmem:[%s723_s2] ss:$0 sm:$0xff] }
   0x7   :  { %565 = vmatpush3.bf16.msra.mxu0 %v611_v1  ;;  %603 = vmatpush3.bf16.msra.mxu1 %v611_v1 }
   0x8   :  { %566 = vmatprep.subr.bf16.mxu0 %v612_v2  ;;  %596 = vmatprep.subr.bf16.mxu1 %v612_v2 }
   0xb   :  { %567 = vmatpush3.bf16.msra.mxu0 %v612_v2  ;;  %604 = vmatpush3.bf16.msra.mxu1 %v612_v2 }
   0xc   :  { %568 = vmatprep.subr.bf16.mxu0 %v613_v3  ;;  %597 = vmatprep.subr.bf16.mxu1 %v613_v3 }
   0xf   :  { %569 = vmatpush3.bf16.msra.mxu0 %v613_v3  ;;  %605 = vmatpush3.bf16.msra.mxu1 %v613_v3 }
  0x10   :  { %570 = vmatprep.subr.bf16.mxu0 %v614_v6  ;;  %598 = vmatprep.subr.bf16.mxu1 %v614_v6 }
  0x13   :  { %571 = vmatpush3.bf16.msra.mxu0 %v614_v6  ;;  %606 = vmatpush3.bf16.msra.mxu1 %v614_v6 }
  0x14   :  { %572 = vmatprep.subr.bf16.mxu0 %v615_v7  ;;  %599 = vmatprep.subr.bf16.mxu1 %v615_v7 }
  0x17   :  { %573 = vmatpush3.bf16.msra.mxu0 %v615_v7  ;;  %607 = vmatpush3.bf16.msra.mxu1 %v615_v7 }
  0x18   :  { %574 = vmatprep.subr.bf16.mxu0 %v616_v8  ;;  %600 = vmatprep.subr.bf16.mxu1 %v616_v8 }
  0x1b   :  { %575 = vmatpush3.bf16.msra.mxu0 %v616_v8  ;;  %608 = vmatpush3.bf16.msra.mxu1 %v616_v8 }
  0x1c   :  { %576 = vmatprep.subr.bf16.mxu0 %v617_v9  ;;  %601 = vmatprep.subr.bf16.mxu1 %v617_v9 }
  0x1f   :  { %577 = vmatpush3.bf16.msra.mxu0 %v617_v9  ;;  %609 = vmatpush3.bf16.msra.mxu1 %v617_v9 }
  0x22   :  { %579 = vmatmul.mubr.bf16.vlgmr.msra.gmra.mxu0 %v620_v10  ;;  %587 = vmatmul.mubr.bf16.vlgmr.msra.gmra.mxu1 %v621_v11 }
  0x23   :  { %582 = vmatprep.mubr.bf16.mxu0 %v622_v12  ;;  %590 = vmatprep.mubr.bf16.mxu1 %v623_v13 }
  0x2a   :  { %583 = vmatmul.mubr.bf16.gmra.mxu0 %v624_v14  ;;  %591 = vmatmul.mubr.bf16.gmra.mxu1 %v625_v15 }
  0xe2   :  { %v580_v17 = vpop.f32.mrf.mxu0  ;;  %v588_v18 = vpop.f32.mrf.mxu1 }
  0xe3   :  { %v336_v19 = vadd.f32 %v580_v17, %v466_v16  ;;  %v344_v20 = vadd.f32 %v588_v18, %v466_v16 }
  0xe4   :  { %v213_v21 = vpop.f32.mrf.mxu0  ;;  %v245_v22 = vpop.f32.mrf.mxu1 }
  0xe5   :  { %v334_v23 = vadd.f32 %v466_v16, %v213_v21  ;;  %v342_v24 = vadd.f32 %v466_v16, %v245_v22  ;;  %v352_v29 = vmax.f32 %v336_v19, 0.0  ;;  %v360_v30 = vmax.f32 %v344_v20, 0.0 }
  0xe6   :  { %v581_v25 = vpop.f32.mrf.mxu0  ;;  %v589_v26 = vpop.f32.mrf.mxu1 }
  0xe7   :  { %v337_v27 = vadd.f32 %v581_v25, %v466_v16  ;;  %v345_v28 = vadd.f32 %v589_v26, %v466_v16  ;;  %v350_v37 = vmax.f32 %v334_v23, 0.0  ;;  %v358_v38 = vmax.f32 %v342_v24, 0.0 }
  0xe8   :  { %v216_v31 = vpop.f32.mrf.mxu0  ;;  %v248_v32 = vpop.f32.mrf.mxu1 }
  0xe9   :  { %v353_v33 = vmax.f32 %v337_v27, 0.0  ;;  %v361_v34 = vmax.f32 %v345_v28, 0.0  ;;  %v335_v35 = vadd.f32 %v466_v16, %v216_v31  ;;  %v343_v36 = vadd.f32 %v466_v16, %v248_v32 }
  0xea   :  { %v584_v39 = vpop.f32.mrf.mxu0  ;;  %v592_v40 = vpop.f32.mrf.mxu1 }
  0xeb   :  { %v507_v41 = vpack.c.bf16 %v353_v33, %v352_v29  ;;  %v527_v42 = vpack.c.bf16 %v361_v34, %v360_v30  ;;  %v351_v43 = vmax.f32 %v335_v35, 0.0  ;;  %v359_v44 = vmax.f32 %v343_v36, 0.0 }
  0xec   :  { %v340_v45 = vadd.f32 %v584_v39, %v466_v16  ;;  %v348_v46 = vadd.f32 %v592_v40, %v466_v16  ;;  %v229_v47 = vpop.f32.mrf.mxu0  ;;  %v261_v48 = vpop.f32.mrf.mxu1 }
  0xed   :  { %539 = vst [vmem:[%s724_s3 + $0x8] sm:$0xff] %v507_v41   ;;  %543 = vst [vmem:[%s724_s3 + $0x28] sm:$0xff] %v527_v42   ;;  %v502_v49 = vpack.c.bf16 %v351_v43, %v350_v37  ;;  %v522_v50 = vpack.c.bf16 %v359_v44, %v358_v38  ;;  %v338_v51 = vadd.f32 %v466_v16, %v229_v47 }
  0xee   :  { %v346_v52 = vadd.f32 %v466_v16, %v261_v48  ;;  %v585_v53 = vpop.f32.mrf.mxu0  ;;  %v593_v54 = vpop.f32.mrf.mxu1  ;;  %v356_v57 = vmax.f32 %v340_v45, 0.0  ;;  %v364_v58 = vmax.f32 %v348_v46, 0.0 }
  0xef   :  { %503 = vst [vmem:[%s724_s3] sm:$0xff] %v502_v49   ;;  %542 = vst [vmem:[%s724_s3 + $0x20] sm:$0xff] %v522_v50   ;;  %v341_v55 = vadd.f32 %v585_v53, %v466_v16  ;;  %v349_v56 = vadd.f32 %v593_v54, %v466_v16  ;;  %v354_v1 = vmax.f32 %v338_v51, 0.0 }
  0xf0   :  { %v232_v59 = vpop.f32.mrf.mxu0  ;;  %v264_v60 = vpop.f32.mrf.mxu1  ;;  %v362_v2 = vmax.f32 %v346_v52, 0.0 }
  0xf1   :  { %v357_v61 = vmax.f32 %v341_v55, 0.0  ;;  %v365_v62 = vmax.f32 %v349_v56, 0.0  ;;  %v339_v63 = vadd.f32 %v466_v16, %v232_v59  ;;  %v347_v0 = vadd.f32 %v466_v16, %v264_v60 }
  0xf3   :  { %v517_v3 = vpack.c.bf16 %v357_v61, %v356_v57  ;;  %v537_v4 = vpack.c.bf16 %v365_v62, %v364_v58  ;;  %v355_v5 = vmax.f32 %v339_v63, 0.0  ;;  %v363_v6 = vmax.f32 %v347_v0, 0.0 }
  0xf5   :  { %541 = vst [vmem:[%s724_s3 + $0x18] sm:$0xff] %v517_v3   ;;  %545 = vst [vmem:[%s724_s3 + $0x38] sm:$0xff] %v537_v4   ;;  %v512_v7 = vpack.c.bf16 %v355_v5, %v354_v1  ;;  %v532_v8 = vpack.c.bf16 %v363_v6, %v362_v2 }
  0xf7   :  { %540 = vst [vmem:[%s724_s3 + $0x10] sm:$0xff] %v512_v7   ;;  %544 = vst [vmem:[%s724_s3 + $0x30] sm:$0xff] %v532_v8  }

// kernel: _lambda_.19
= control target key start
LH: loop header
LB: loop body
LE: loop exit
PB: predicated region body
PF: predicated region fallthrough
CT: control target
= control target key end

     0   :  { %s1192_s12 = smov 0   ;;  %s1194_s13 = smov 0   ;;  %s1324_s0 = inlined_call_operand.vmem [shape: bf16[128,640], index: 0, kind: input, shape index: {}]   ;;  %s1325_s1 = inlined_call_operand.vmem [shape: bf16[640,128], index: 1, kind: input, shape index: {}]   ;;  %s1326_s2 = inlined_call_operand.vmem [shape: f32[1,128], index: 2, kind: input, shape index: {}]   ;;  %s1327_s3 = inlined_call_operand.vmem [shape: bf16[128,128], index: 3, kind: output, shape index: {}]  }
   0x1   :  { %s1196_s14 = smov 0   ;;  %s1198_s15 = smov 0  }
   0x2   :  { %s1200_s16 = smov 0  }
   0x3 LB: > { %s25_s17 = sadd.s32 1, %s1165_s15  ;;  %p48_p1 = scmp.ne.s32.totalorder %s1157_s13, %s1153_s12  ;;  %s1169_s16 = sphi %s1200_s16, %s13_s16   ;;  %s1165_s15 = sphi %s1198_s15, %s1331_s15   ;;  %s1161_s14 = sphi %s1196_s14, %s1330_s14   ;;  %s1157_s13 = sphi %s1194_s13, %s1329_s13   ;;  %s1153_s12 = sphi %s1192_s12, %s1328_s12  }
   0x4   : > { %p26_p0 = scmp.ge.s32.totalorder %s25_s17, 5  ;;  %p49_p2 = scmp.eq.s32.totalorder %s1169_s16, 0 }
   0x5   : > { %s41_s19 = sadd.s32 1, %s1157_s13  ;;  %p901_p5 = scmp.ge.s32.totalorder %s1169_s16, 5 }
   0x6   : > { %s1333_s17 = smov (%p26_p0, %s25_s17), 0  ;;  %p50_p3 = por %p49_p2, %p48_p1 }
   0x7   : > { %s37_s18 = ssub.s32 %s1165_s15, %s1333_s17  ;;  %162 = sbr.rel (%p901_p5) target bundleno = 26 (0x1a), region = 20 }
   0x8   : > { %p39_p4 = scmp.eq.s32.totalorder %s37_s18, 0 }
   0xa   : > { %s1227_s20 = scalar_select %p39_p4, %s1157_s13, %s41_s19  }
   0xc   : > { %165 = sbr.rel (!%p50_p3) target bundleno = 26 (0x1a), region = 24  ;;  %s167_s21 = sand.u32 (%p50_p3), 1, %s1157_s13  }
   0xd   : > { %s903_s22 = sshll.u32 (%p50_p3), %s1165_s15, 2  ;;  %s902_s23 = sshll.u32 (%p50_p3), %s167_s21, 6 }
   0xe   : > { %s1235_s26 = scalar_lea.vmem (%p50_p3), %s1324_s0, %s903_s22  ;;  %s169_s27 = scalar_lea.vmem (%p50_p3), [#allocation3], %s902_s23 }
   0xf   : > { %v191_v0 = vld [vmem:[%s1235_s26] sm:$0xf] (%p50_p3)  ;;  %v193_v1 = vld [vmem:[%s1235_s26 + $0x14] sm:$0xf] (%p50_p3)  ;;  %v195_v2 = vld [vmem:[%s1235_s26 + $0x28] sm:$0xf] (%p50_p3) }
  0x10   : > { %192 = vst [vmem:[%s169_s27] sm:$0xf] (%p50_p3), %v191_v0  ;;  %194 = vst [vmem:[%s169_s27 + $0x4] sm:$0xf] (%p50_p3), %v193_v1  ;;  %v197_v3 = vld [vmem:[%s1235_s26 + $0x3c] sm:$0xf] (%p50_p3) }
  0x11   : > { %v199_v4 = vld [vmem:[%s1235_s26 + $0x50] sm:$0xf]  ;;  %196 = vst [vmem:[%s169_s27 + $0x8] sm:$0xf] %v195_v2  ;;  %198 = vst [vmem:[%s169_s27 + $0xc] sm:$0xf] %v197_v3 }
  0x12   : > { %200 = vst [vmem:[%s169_s27 + $0x10] sm:$0xf] %v199_v4  ;;  %v201_v5 = vld [vmem:[%s1235_s26 + $0x64] sm:$0xf]  ;;  %v203_v6 = vld [vmem:[%s1235_s26 + $0x78] sm:$0xf] }
  0x13   : > { %v205_v7 = vld [vmem:[%s1235_s26 + $0x8c] sm:$0xf]  ;;  %202 = vst [vmem:[%s169_s27 + $0x14] sm:$0xf] %v201_v5  ;;  %204 = vst [vmem:[%s169_s27 + $0x18] sm:$0xf] %v203_v6 }
  0x14   : > { %206 = vst [vmem:[%s169_s27 + $0x1c] sm:$0xf] %v205_v7  ;;  %v207_v8 = vld [vmem:[%s1235_s26 + $0xa0] sm:$0xf]  ;;  %v209_v9 = vld [vmem:[%s1235_s26 + $0xb4] sm:$0xf] }
  0x15   : > { %v211_v10 = vld [vmem:[%s1235_s26 + $0xc8] sm:$0xf]  ;;  %208 = vst [vmem:[%s169_s27 + $0x20] sm:$0xf] %v207_v8  ;;  %210 = vst [vmem:[%s169_s27 + $0x24] sm:$0xf] %v209_v9 }
  0x16   : > { %212 = vst [vmem:[%s169_s27 + $0x28] sm:$0xf] %v211_v10  ;;  %v213_v11 = vld [vmem:[%s1235_s26 + $0xdc] sm:$0xf]  ;;  %v215_v12 = vld [vmem:[%s1235_s26 + $0xf0] sm:$0xf] }
  0x17   : > { %v217_v13 = vld [vmem:[%s1235_s26 + $0x104] sm:$0xf]  ;;  %214 = vst [vmem:[%s169_s27 + $0x2c] sm:$0xf] %v213_v11  ;;  %216 = vst [vmem:[%s169_s27 + $0x30] sm:$0xf] %v215_v12 }
  0x18   : > { %218 = vst [vmem:[%s169_s27 + $0x34] sm:$0xf] %v217_v13  ;;  %v219_v14 = vld [vmem:[%s1235_s26 + $0x118] sm:$0xf]  ;;  %v221_v15 = vld [vmem:[%s1235_s26 + $0x12c] sm:$0xf] }
  0x19   : > { %220 = vst [vmem:[%s169_s27 + $0x38] sm:$0xf] %v219_v14  ;;  %222 = vst [vmem:[%s169_s27 + $0x3c] sm:$0xf] %v221_v15 }
  0x1a PF: > { %p904_p6 = scmp.ge.s32.totalorder %s1169_s16, 1  ;;  %p289_p7 = scmp.lt.s32.totalorder %s1169_s16, 6 }
  0x1c   : > { %p290_p8 = pnand %p904_p6, %p289_p7 }
  0x1d   : > { %s296_s28 = sand.u32 (!%p290_p8), 1, %s1153_s12   ;;  %s906_s29 = sshll.u32 (!%p290_p8), %s1161_s14, 4 }
  0x1e   : > { %293 = sbr.rel (%p290_p8) target bundleno = 308 (0x134), region = 69  ;;  %s905_s30 = sshll.u32 (!%p290_p8), %s296_s28, 6 }
  0x1f   : > { %p335_p9 = scmp.lt.s32.totalorder (!%p290_p8), %s906_s29, 79  ;;  %s1262_s8 = scalar_lea.vmem (!%p290_p8), [#allocation3], %s905_s30 }
  0x20   : > { %p908_p10 = scmp.ne.s32.totalorder (!%p290_p8), %s1161_s14, 0 }
  0x23   : > { %s1335_s29 = smov (!%p335_p9, %s906_s29), 79  ;;  %359 = sbr.rel (%p908_p10) target bundleno = 49 (0x31), region = 77 }
  0x24   : > { %s907_s4 = sshll.u32 %s1335_s29, 2 }
  0x25   : > { %s1260_s7 = scalar_lea.vmem %s1325_s1, %s907_s4 }
  0x28   : > { %v1171_v16 = vmov 0.0  }
  0x29   : > { %360 = vst [vmem:[#allocation2 + $0x30] sm:$0xff] %v1171_v16  ;;  %361 = vst [vmem:[#allocation2] sm:$0xff] %v1171_v16 }
  0x2a   : > { %362 = vst [vmem:[#allocation2 + $0x58] sm:$0xff] %v1171_v16  ;;  %363 = vst [vmem:[#allocation2 + $0x18] sm:$0xff] %v1171_v16 }
  0x2b   : > { %364 = vst [vmem:[#allocation2 + $0x50] sm:$0xff] %v1171_v16  ;;  %365 = vst [vmem:[#allocation2 + $0x68] sm:$0xff] %v1171_v16 }
  0x2c   : > { %366 = vst [vmem:[#allocation2 + $0x8] sm:$0xff] %v1171_v16  ;;  %367 = vst [vmem:[#allocation2 + $0x48] sm:$0xff] %v1171_v16 }
  0x2d   : > { %368 = vst [vmem:[#allocation2 + $0x40] sm:$0xff] %v1171_v16  ;;  %369 = vst [vmem:[#allocation2 + $0x20] sm:$0xff] %v1171_v16 }
  0x2e   : > { %370 = vst [vmem:[#allocation2 + $0x10] sm:$0xff] %v1171_v16  ;;  %371 = vst [vmem:[#allocation2 + $0x38] sm:$0xff] %v1171_v16 }
  0x2f   : > { %372 = vst [vmem:[#allocation2 + $0x60] sm:$0xff] %v1171_v16  ;;  %373 = vst [vmem:[#allocation2 + $0x70] sm:$0xff] %v1171_v16 }
  0x30   : > { %374 = vst [vmem:[#allocation2 + $0x78] sm:$0xff] %v1171_v16  ;;  %375 = vst [vmem:[#allocation2 + $0x28] sm:$0xff] %v1171_v16 }
  0x31 PF: > { %v1115_v17 = vld [vmem:[%s1260_s7 + $0x38] sm:$0xff]   ;;  %v1116_v18 = vld [vmem:[%s1260_s7 + $0x30] sm:$0xff]   ;;  %v1117_v19 = vld [vmem:[%s1260_s7 + $0x28] sm:$0xff]   ;;  %p925_p11 = scmp.ne.s32.totalorder %s1161_s14, 4 }
  0x32   : > { %1026 = vmatprep.subr.bf16.mxu0 %v1115_v17  ;;  %1058 = vmatprep.subr.bf16.mxu1 %v1115_v17  ;;  %v1118_v20 = vld [vmem:[%s1260_s7 + $0x20] sm:$0xff]   ;;  %v1119_v23 = vld [vmem:[%s1260_s7 + $0x18] sm:$0xff]   ;;  %v1120_v24 = vld [vmem:[%s1260_s7 + $0x10] sm:$0xff]  }
  0x33   : > { %1027 = vmatpush3.bf16.msra.mxu0 %v1115_v17  ;;  %1066 = vmatpush3.bf16.msra.mxu1 %v1115_v17  ;;  %v1123_v21 = vld [vmem:[%s1262_s8] sm:$0xff]   ;;  %v1121_v25 = vld [vmem:[%s1260_s7 + $0x8] sm:$0xff]   ;;  %v1127_v29 = vld [vmem:[%s1262_s8 + $0x10] sm:$0xff]  }
  0x34   : > { %1028 = vmatprep.subr.bf16.mxu0 %v1116_v18  ;;  %1059 = vmatprep.subr.bf16.mxu1 %v1116_v18  ;;  %v1124_v22 = vld [vmem:[%s1262_s8 + $0x20] sm:$0xff]   ;;  %v1125_v27 = vld [vmem:[%s1262_s8 + $0x8] sm:$0xff]   ;;  %v1128_v30 = vld [vmem:[%s1262_s8 + $0x30] sm:$0xff]  }
  0x35   : > { %1042 = vmatprep.mubr.bf16.mxu0 %v1123_v21  ;;  %1050 = vmatprep.mubr.bf16.mxu1 %v1124_v22  ;;  %v1122_v26 = vld [vmem:[%s1260_s7] sm:$0xff]   ;;  %v1126_v28 = vld [vmem:[%s1262_s8 + $0x28] sm:$0xff]   ;;  %v1129_v31 = vld [vmem:[%s1262_s8 + $0x18] sm:$0xff]  }
  0x36   : > { %v1130_v32 = vld [vmem:[%s1262_s8 + $0x38] sm:$0xff]   ;;  %v386_v34 = vld [vmem:[#allocation2 + $0x10] sm:$0xff]  ;;  %v384_v38 = vld [vmem:[#allocation2 + $0x40] sm:$0xff] }
  0x37   : > { %1029 = vmatpush3.bf16.msra.mxu0 %v1116_v18  ;;  %1067 = vmatpush3.bf16.msra.mxu1 %v1116_v18  ;;  %v378_v33 = vld [vmem:[#allocation2 + $0x58] sm:$0xff]  ;;  %v376_v37 = vld [vmem:[#allocation2 + $0x30] sm:$0xff]  ;;  %v377_v49 = vld [vmem:[#allocation2] sm:$0xff] }
  0x38   : > { %1030 = vmatprep.subr.bf16.mxu0 %v1117_v19  ;;  %1060 = vmatprep.subr.bf16.mxu1 %v1117_v19  ;;  %v379_v43 = vld [vmem:[#allocation2 + $0x18] sm:$0xff]  ;;  %v385_v50 = vld [vmem:[#allocation2 + $0x20] sm:$0xff]  ;;  %v382_v55 = vld [vmem:[#allocation2 + $0x8] sm:$0xff] }
  0x39   : > { %v387_v44 = vld [vmem:[#allocation2 + $0x38] sm:$0xff]  ;;  %v380_v61 = vld [vmem:[#allocation2 + $0x50] sm:$0xff]  ;;  %v388_v62 = vld [vmem:[#allocation2 + $0x60] sm:$0xff] }
  0x3a   : > { %v390_v56 = vld [vmem:[#allocation2 + $0x78] sm:$0xff]  ;;  %v383_v3 = vld [vmem:[#allocation2 + $0x48] sm:$0xff]  ;;  %v389_v10 = vld [vmem:[#allocation2 + $0x70] sm:$0xff] }
  0x3b   : > { %1031 = vmatpush3.bf16.msra.mxu0 %v1117_v19  ;;  %1068 = vmatpush3.bf16.msra.mxu1 %v1117_v19  ;;  %v391_v4 = vld [vmem:[#allocation2 + $0x28] sm:$0xff] }
  0x3c   : > { %1032 = vmatprep.subr.bf16.mxu0 %v1118_v20  ;;  %1061 = vmatprep.subr.bf16.mxu1 %v1118_v20  ;;  %v381_v9 = vld [vmem:[#allocation2 + $0x68] sm:$0xff] }
  0x3f   : > { %1033 = vmatpush3.bf16.msra.mxu0 %v1118_v20  ;;  %1069 = vmatpush3.bf16.msra.mxu1 %v1118_v20 }
  0x40   : > { %1034 = vmatprep.subr.bf16.mxu0 %v1119_v23  ;;  %1062 = vmatprep.subr.bf16.mxu1 %v1119_v23 }
  0x43   : > { %1035 = vmatpush3.bf16.msra.mxu0 %v1119_v23  ;;  %1070 = vmatpush3.bf16.msra.mxu1 %v1119_v23 }
  0x44   : > { %1036 = vmatprep.subr.bf16.mxu0 %v1120_v24  ;;  %1063 = vmatprep.subr.bf16.mxu1 %v1120_v24 }
  0x47   : > { %1037 = vmatpush3.bf16.msra.mxu0 %v1120_v24  ;;  %1071 = vmatpush3.bf16.msra.mxu1 %v1120_v24 }
  0x48   : > { %1038 = vmatprep.subr.bf16.mxu0 %v1121_v25  ;;  %1064 = vmatprep.subr.bf16.mxu1 %v1121_v25 }
  0x4b   : > { %1039 = vmatpush3.bf16.msra.mxu0 %v1121_v25  ;;  %1072 = vmatpush3.bf16.msra.mxu1 %v1121_v25 }
  0x4c   : > { %1040 = vmatprep.subr.bf16.mxu0 %v1122_v26  ;;  %1065 = vmatprep.subr.bf16.mxu1 %v1122_v26 }
  0x4f   : > { %1041 = vmatpush3.bf16.msra.mxu0 %v1122_v26  ;;  %1073 = vmatpush3.bf16.msra.mxu1 %v1122_v26 }
  0x52   : > { %1043 = vmatmul.mubr.bf16.vlgmr.msra.gmra.mxu0 %v1125_v27  ;;  %1051 = vmatmul.mubr.bf16.vlgmr.msra.gmra.mxu1 %v1126_v28 }
  0x53   : > { %1046 = vmatprep.mubr.bf16.mxu0 %v1127_v29  ;;  %1054 = vmatprep.mubr.bf16.mxu1 %v1128_v30 }
  0x5a   : > { %1047 = vmatmul.mubr.bf16.gmra.mxu0 %v1129_v31  ;;  %1055 = vmatmul.mubr.bf16.gmra.mxu1 %v1130_v32 }
 0x112   : > { %v1044_v35 = vpop.f32.mrf.mxu0  ;;  %v1052_v36 = vpop.f32.mrf.mxu1 }
 0x113   : > { %v619_v39 = vadd.f32 %v1044_v35, %v378_v33  ;;  %v627_v40 = vadd.f32 %v1052_v36, %v386_v34 }
 0x114   : > { %v554_v41 = vpop.f32.mrf.mxu0  ;;  %v586_v42 = vpop.f32.mrf.mxu1 }
 0x115   : > { %635 = vst [vmem:[#allocation2 + $0x58] sm:$0xff] %v619_v39  ;;  %643 = vst [vmem:[#allocation2 + $0x10] sm:$0xff] %v627_v40  ;;  %v617_v45 = vadd.f32 %v554_v41, %v376_v37  ;;  %v625_v46 = vadd.f32 %v586_v42, %v384_v38 }
 0x116   : > { %v1045_v47 = vpop.f32.mrf.mxu0  ;;  %v1053_v48 = vpop.f32.mrf.mxu1 }
 0x117   : > { %633 = vst [vmem:[#allocation2 + $0x30] sm:$0xff] %v617_v45  ;;  %641 = vst [vmem:[#allocation2 + $0x40] sm:$0xff] %v625_v46  ;;  %v620_v51 = vadd.f32 %v1045_v47, %v379_v43  ;;  %v628_v52 = vadd.f32 %v1053_v48, %v387_v44 }
 0x118   : > { %v557_v53 = vpop.f32.mrf.mxu0  ;;  %v589_v54 = vpop.f32.mrf.mxu1 }
 0x119   : > { %636 = vst [vmem:[#allocation2 + $0x18] sm:$0xff] %v620_v51  ;;  %644 = vst [vmem:[#allocation2 + $0x38] sm:$0xff] %v628_v52  ;;  %v618_v57 = vadd.f32 %v557_v53, %v377_v49  ;;  %v626_v58 = vadd.f32 %v589_v54, %v385_v50 }
 0x11a   : > { %v1048_v59 = vpop.f32.mrf.mxu0  ;;  %v1056_v60 = vpop.f32.mrf.mxu1 }
 0x11b   : > { %634 = vst [vmem:[#allocation2] sm:$0xff] %v618_v57  ;;  %642 = vst [vmem:[#allocation2 + $0x20] sm:$0xff] %v626_v58  ;;  %v623_v63 = vadd.f32 %v1048_v59, %v382_v55  ;;  %v631_v0 = vadd.f32 %v1056_v60, %v390_v56 }
 0x11c   : > { %v570_v1 = vpop.f32.mrf.mxu0  ;;  %v602_v2 = vpop.f32.mrf.mxu1 }
 0x11d   : > { %639 = vst [vmem:[#allocation2 + $0x8] sm:$0xff] %v623_v63  ;;  %647 = vst [vmem:[#allocation2 + $0x78] sm:$0xff] %v631_v0  ;;  %v621_v5 = vadd.f32 %v570_v1, %v380_v61  ;;  %v629_v6 = vadd.f32 %v602_v2, %v388_v62 }
 0x11e   : > { %v1049_v7 = vpop.f32.mrf.mxu0  ;;  %v1057_v8 = vpop.f32.mrf.mxu1 }
 0x11f   : > { %637 = vst [vmem:[#allocation2 + $0x50] sm:$0xff] %v621_v5  ;;  %645 = vst [vmem:[#allocation2 + $0x60] sm:$0xff] %v629_v6  ;;  %v624_v11 = vadd.f32 %v1049_v7, %v383_v3  ;;  %v632_v12 = vadd.f32 %v1057_v8, %v391_v4  ;;  %652 = sbr.rel (%p925_p11) target bundleno = 308 (0x134), region = 81 }
 0x120   : > { %v573_v13 = vpop.f32.mrf.mxu0  ;;  %v605_v14 = vpop.f32.mrf.mxu1 }
 0x121   : > { %640 = vst [vmem:[#allocation2 + $0x48] sm:$0xff] %v624_v11  ;;  %648 = vst [vmem:[#allocation2 + $0x28] sm:$0xff] %v632_v12  ;;  %v622_v15 = vadd.f32 %v573_v13, %v381_v9  ;;  %v630_v16 = vadd.f32 %v605_v14, %v389_v10 }
 0x123   : > { %638 = vst [vmem:[#allocation2 + $0x68] sm:$0xff] %v622_v15  ;;  %646 = vst [vmem:[#allocation2 + $0x70] sm:$0xff] %v630_v16 }
 0x124   : > { %v653_v17 = vld [vmem:[#allocation2 + $0x30] sm:$0xff]  ;;  %v654_v18 = vld [vmem:[#allocation2] sm:$0xff]  ;;  %v655_v22 = vld [vmem:[#allocation2 + $0x58] sm:$0xff] }
 0x125   : > { %v926_v19 = vld [vmem:[%s1326_s2] ss:$0 sm:$0xff]  ;;  %v656_v23 = vld [vmem:[#allocation2 + $0x18] sm:$0xff]  ;;  %v659_v29 = vld [vmem:[#allocation2 + $0x8] sm:$0xff] }
 0x126   : > { %v676_v20 = vadd.f32 %v926_v19, %v653_v17  ;;  %v677_v21 = vadd.f32 %v926_v19, %v654_v18  ;;  %v657_v24 = vld [vmem:[#allocation2 + $0x50] sm:$0xff]  ;;  %v678_v25 = vadd.f32 %v926_v19, %v655_v22  ;;  %v679_v26 = vadd.f32 %v926_v19, %v656_v23  ;;  %v661_v35 = vld [vmem:[#allocation2 + $0x40] sm:$0xff]  ;;  %v664_v42 = vld [vmem:[#allocation2 + $0x38] sm:$0xff] }
 0x127   : > { %v680_v28 = vadd.f32 %v926_v19, %v657_v24  ;;  %v682_v34 = vadd.f32 %v926_v19, %v659_v29  ;;  %v662_v36 = vld [vmem:[#allocation2 + $0x20] sm:$0xff]  ;;  %v663_v37 = vld [vmem:[#allocation2 + $0x10] sm:$0xff]  ;;  %v684_v47 = vadd.f32 %v926_v19, %v661_v35  ;;  %v667_v53 = vld [vmem:[#allocation2 + $0x78] sm:$0xff]  ;;  %v687_v57 = vadd.f32 %v926_v19, %v664_v42 }
 0x128   : > { %v660_v30 = vld [vmem:[#allocation2 + $0x48] sm:$0xff]  ;;  %v692_v31 = vmax.f32 %v676_v20, 0.0  ;;  %v693_v32 = vmax.f32 %v677_v21, 0.0  ;;  %v694_v38 = vmax.f32 %v678_v25, 0.0  ;;  %v695_v39 = vmax.f32 %v679_v26, 0.0  ;;  %v665_v43 = vld [vmem:[#allocation2 + $0x60] sm:$0xff] }
 0x129   : > { %v696_v40 = vmax.f32 %v680_v28, 0.0  ;;  %v683_v41 = vadd.f32 %v926_v19, %v660_v30  ;;  %v698_v46 = vmax.f32 %v682_v34, 0.0  ;;  %v685_v51 = vadd.f32 %v926_v19, %v662_v36  ;;  %v668_v54 = vld [vmem:[#allocation2 + $0x28] sm:$0xff] }
 0x12a   : > { %v658_v27 = vld [vmem:[#allocation2 + $0x68] sm:$0xff]  ;;  %v966_v44 = vpack.c.bf16 %v693_v32, %v692_v31  ;;  %v666_v48 = vld [vmem:[#allocation2 + $0x70] sm:$0xff]  ;;  %v971_v49 = vpack.c.bf16 %v695_v39, %v694_v38  ;;  %v686_v52 = vadd.f32 %v926_v19, %v663_v37  ;;  %v700_v56 = vmax.f32 %v684_v47, 0.0 }
 0x12b   : > { %v681_v33 = vadd.f32 %v926_v19, %v658_v27  ;;  %v699_v50 = vmax.f32 %v683_v41, 0.0  ;;  %v688_v58 = vadd.f32 %v926_v19, %v665_v43  ;;  %v701_v60 = vmax.f32 %v685_v51, 0.0 }
 0x12c   : > { %967 = vst [vmem:[%s1327_s3] sm:$0xff] %v966_v44   ;;  %1003 = vst [vmem:[%s1327_s3 + $0x8] sm:$0xff] %v971_v49   ;;  %v702_v61 = vmax.f32 %v686_v52, 0.0  ;;  %v689_v62 = vadd.f32 %v926_v19, %v666_v48  ;;  %v703_v63 = vmax.f32 %v687_v57, 0.0  ;;  %v690_v1 = vadd.f32 %v926_v19, %v667_v53 }
 0x12d   : > { %v697_v45 = vmax.f32 %v681_v33, 0.0  ;;  %v981_v59 = vpack.c.bf16 %v699_v50, %v698_v46  ;;  %v704_v0 = vmax.f32 %v688_v58, 0.0  ;;  %v691_v2 = vadd.f32 %v926_v19, %v668_v54 }
 0x12e   : > { %v986_v3 = vpack.c.bf16 %v701_v60, %v700_v56  ;;  %v705_v4 = vmax.f32 %v689_v62, 0.0  ;;  %v991_v5 = vpack.c.bf16 %v703_v63, %v702_v61  ;;  %v706_v6 = vmax.f32 %v690_v1, 0.0 }
 0x12f   : > { %v976_v55 = vpack.c.bf16 %v697_v45, %v696_v40  ;;  %1005 = vst [vmem:[%s1327_s3 + $0x18] sm:$0xff] %v981_v59   ;;  %v707_v7 = vmax.f32 %v691_v2, 0.0 }
 0x130   : > { %1006 = vst [vmem:[%s1327_s3 + $0x20] sm:$0xff] %v986_v3   ;;  %v996_v8 = vpack.c.bf16 %v705_v4, %v704_v0  ;;  %1007 = vst [vmem:[%s1327_s3 + $0x28] sm:$0xff] %v991_v5  }
 0x131   : > { %1004 = vst [vmem:[%s1327_s3 + $0x10] sm:$0xff] %v976_v55   ;;  %v1001_v9 = vpack.c.bf16 %v707_v7, %v706_v6 }
 0x132   : > { %1008 = vst [vmem:[%s1327_s3 + $0x30] sm:$0xff] %v996_v8  }
 0x133   : > { %1009 = vst [vmem:[%s1327_s3 + $0x38] sm:$0xff] %v1001_v9  }
 0x134 PF: > { %s13_s16 = sadd.s32 1, %s1169_s16   ;;  %s1328_s12 = smov %s1157_s13 }
 0x135   : > { %p10_p12 = scmp.ge.s32.totalorder %s13_s16, 7   ;;  %s1329_s13 = smov %s1227_s20 }
 0x136   : > { %s1330_s14 = smov %s1165_s15  ;;  %s1331_s15 = smov %s1333_s17 }
 0x137   :  { %12 = sbr.rel (!%p10_p12) target bundleno = 3 (0x3), region = 122 }

</bundles_post_ra>
